<compile_context>
chip_gen: v7x
topology: tpu7x:2x2x1
jax: 0.10.0
libtpu: 0.0.40
codegen_flags: <defaults>
</compile_context>

<pallas_src>
import jax
import jax.numpy as jnp
from jax.experimental import pallas as pl
from jax.experimental.pallas import tpu as pltpu


def _round_up(x, m):
    return ((x + m - 1) // m) * m


# ---------------------------------------------------------------------------
# Pallas kernels
# ---------------------------------------------------------------------------
def _matmul_bias_relu_kernel(a_ref, w_ref, b_ref, o_ref):
    # bf16 operands -> fp32 MXU accumulation, fp32 bias + ReLU epilogue,
    # cast to the (narrow) output dtype only at the store.
    acc = jnp.dot(a_ref[...], w_ref[...], preferred_element_type=jnp.float32)
    o_ref[...] = jnp.maximum(acc + b_ref[...], 0.0).astype(o_ref.dtype)


def _fc_tail_kernel(x_ref, w4_ref, b4_ref, w5_ref, b5_ref, o_ref):
    # Fused layer4 + layer5: relu(relu(x@W4+b4) @ W5 + b5); the (M,128)
    # intermediate stays on-chip (vregs/VMEM), no HBM round trip.
    h = jnp.dot(x_ref[...], w4_ref[...], preferred_element_type=jnp.float32)
    h = jnp.maximum(h + b4_ref[...], 0.0).astype(w5_ref.dtype)
    o = jnp.dot(h, w5_ref[...], preferred_element_type=jnp.float32)
    o_ref[...] = jnp.maximum(o + b5_ref[...], 0.0)


# ---------------------------------------------------------------------------
# Pallas wrappers
# ---------------------------------------------------------------------------
def conv_gemm(p, w, b, *, n_steps=1):
    """relu(p @ w + b).  p:(M,K) bf16 patch matrix; w:(K,N) bf16; b:(1,N) f32.
    Returns (M, N) bf16 with only the real N channels (narrow writeback).
    n_steps=2 gives an even 2-way grid split (both TCs on v7x); single-TC
    chips just pay one extra ~0.35us grid step."""
    M, K = p.shape
    N = w.shape[1]
    if n_steps <= 1:
        tm = M                                        # single full-extent block
    else:
        tm = min(_round_up(pl.cdiv(M, n_steps), 8), M)
        tm = min(tm, 2048)   # VMEM guard if batch scales (v7x: 64 MiB physical)
    grid = (pl.cdiv(M, tm),)                          # tail block handled by Pallas

    return pl.pallas_call(
        _matmul_bias_relu_kernel,
        out_shape=jax.ShapeDtypeStruct((M, N), jnp.bfloat16),
        grid_spec=pltpu.PrefetchScalarGridSpec(
            num_scalar_prefetch=0,
            grid=grid,
            in_specs=[
                pl.BlockSpec((tm, K), lambda i: (i, 0)),   # patch rows, tile i
                pl.BlockSpec((K, N), lambda i: (0, 0)),    # weight resident
                pl.BlockSpec((1, N), lambda i: (0, 0)),    # bias row resident
            ],
            out_specs=pl.BlockSpec((tm, N), lambda i: (i, 0)),
        ),
        compiler_params=pltpu.CompilerParams(
            dimension_semantics=("parallel",)),
    )(p, w, b)


def fc_tail(x, w4, b4, w5, b5):
    """Fused layer4+layer5.  x:(B, 1568) bf16 -> (B, output_size) f32."""
    M, K = x.shape
    H = w4.shape[1]
    N = w5.shape[1]
    Mp = _round_up(M, 8)
    x_p = jnp.pad(x, ((0, Mp - M), (0, 0)))           # tiny (few KB) row pad

    out = pl.pallas_call(
        _fc_tail_kernel,
        out_shape=jax.ShapeDtypeStruct((Mp, N), jnp.float32),
        grid_spec=pltpu.PrefetchScalarGridSpec(
            num_scalar_prefetch=0,
            grid=(1,),
            in_specs=[
                pl.BlockSpec((Mp, K), lambda i: (0, 0)),
                pl.BlockSpec((K, H), lambda i: (0, 0)),
                pl.BlockSpec((1, H), lambda i: (0, 0)),
                pl.BlockSpec((H, N), lambda i: (0, 0)),
                pl.BlockSpec((1, N), lambda i: (0, 0)),
            ],
            out_specs=pl.BlockSpec((Mp, N), lambda i: (0, 0)),
        ),
        compiler_params=pltpu.CompilerParams(
            dimension_semantics=("arbitrary",)),
    )(x_p, w4, b4, w5, b5)
    return out[:M]


# ---------------------------------------------------------------------------
# Plain-JAX glue (channels-last, bf16): im2col, pooling
# ---------------------------------------------------------------------------
def _im2col_nhwc(x, k, stride):
    """x:(B,S1,S2,C) -> (B*O1*O2, k*k*C) in x.dtype; patch order (k1, k2, c)."""
    B, H, W, C = x.shape
    OH = (H - k) // stride + 1
    OW = (W - k) // stride + 1
    cols = []
    for di in range(k):
        for dj in range(k):
            cols.append(x[:, di:di + stride * OH:stride,
                          dj:dj + stride * OW:stride, :])
    p = jnp.stack(cols, axis=3)                       # (B, OH, OW, k*k, C)
    return p.reshape(B * OH * OW, k * k * C), OH, OW


def max_pool_2x2_nhwc(x):
    B, H, W, C = x.shape
    H2, W2 = H // 2, W // 2
    x = x[:, :H2 * 2, :W2 * 2, :].reshape(B, H2, 2, W2, 2, C)
    return x.max(axis=(2, 4))


def adaptive_avg_pool_nhwc(x, out_size):
    B, H, W, C = x.shape
    if H == out_size and W == out_size:
        return x                                      # identity on shipped path
    if H % out_size == 0 and W % out_size == 0:
        sh, sw = H // out_size, W // out_size
        return (x.reshape(B, out_size, sh, out_size, sw, C)
                 .astype(jnp.float32).mean(axis=(2, 4)).astype(x.dtype))
    # General PyTorch-bin fallback (kept for correctness at other input sizes).
    rows = []
    for i in range(out_size):
        h0, h1 = (i * H) // out_size, -((-(i + 1) * H) // out_size)
        cols = []
        for j in range(out_size):
            w0, w1 = (j * W) // out_size, -((-(j + 1) * W) // out_size)
            cols.append(x[:, h0:h1, w0:w1, :].astype(jnp.float32).mean(axis=(1, 2)))
        rows.append(jnp.stack(cols, axis=1))
    return jnp.stack(rows, axis=1).astype(x.dtype)    # (B, out, out, C)


# ---------------------------------------------------------------------------
# Parameters: PyTorch-layout init + one-time GEMM-ready preparation
# ---------------------------------------------------------------------------
def init_params(key, input_channels, output_size):
    ks = jax.random.split(key, 8)
    s = 0.05
    return {
        "w1": s * jax.random.normal(ks[0], (16, input_channels, 6, 6), jnp.float32),
        "b1": s * jax.random.normal(ks[1], (16,), jnp.float32),
        "w2": s * jax.random.normal(ks[2], (32, 16, 4, 4), jnp.float32),
        "b2": s * jax.random.normal(ks[3], (32,), jnp.float32),
        "w4": s * jax.random.normal(ks[4], (128, 7 * 7 * 32), jnp.float32),
        "b4": s * jax.random.normal(ks[5], (128,), jnp.float32),
        "w5": s * jax.random.normal(ks[6], (output_size, 128), jnp.float32),
        "b5": s * jax.random.normal(ks[7], (output_size,), jnp.float32),
    }


def prepare_params(params):
    """One-time weight prep (hoisted out of the forward path): GEMM layouts
    matched to the channels-last patch order, bf16 weights (fp32 MXU
    accumulation), fp32 biases, natural (unpadded) output widths.
    NOTE: bf16 operands will not match a fp32 PyTorch reference bit-exactly."""
    def conv_w(w):   # (O, C, k1, k2) -> (k1*k2*C, O)
        O, C, kh, kw = w.shape
        return w.transpose(2, 3, 1, 0).reshape(kh * kw * C, O).astype(jnp.bfloat16)

    # fc1: permute columns from the reference's channel-major flatten
    # (c*49 + s1*7 + s2) to our channels-last flatten (s1*7*32 + s2*32 + c),
    # so the conv2 output feeds fc1 with no runtime transpose.
    w4 = params["w4"]
    w4 = w4.reshape(-1, 32, 7, 7).transpose(0, 2, 3, 1).reshape(w4.shape[0], -1)

    return {
        "w1": conv_w(params["w1"]),
        "b1": params["b1"].astype(jnp.float32).reshape(1, -1),
        "w2": conv_w(params["w2"]),
        "b2": params["b2"].astype(jnp.float32).reshape(1, -1),
        "w4": w4.T.astype(jnp.bfloat16),              # (1568, 128)
        "b4": params["b4"].astype(jnp.float32).reshape(1, -1),
        "w5": params["w5"].T.astype(jnp.bfloat16),    # (128, output_size)
        "b5": params["b5"].astype(jnp.float32).reshape(1, -1),
    }


# ---------------------------------------------------------------------------
# Forward: mirrors CNN.forward.
# Input is channels-last (B, S1, S2, C) (the reference swaps it to (B, C, S1, S2));
# convs are isotropic so we keep channels-last and run over (S1, S2) directly,
# and w4's column permutation matches that (S1, S2, C) flatten order.
# ---------------------------------------------------------------------------
@jax.jit
def cnn_forward(prepared, x):
    if x.ndim == 3:
        x = x[None]
    x = x.astype(jnp.bfloat16)          # cast once; activations stay bf16 NHWC
    B = x.shape[0]

    # layer1: Conv2d(C,16,k=6,s=1) + ReLU (kernel), MaxPool2d(2,2) on the small
    # (B,33,33,16) bf16 tensor in XLA.
    p1, OH1, OW1 = _im2col_nhwc(x, 6, 1)
    y1 = conv_gemm(p1, prepared["w1"], prepared["b1"], n_steps=2)
    y1 = max_pool_2x2_nhwc(y1.reshape(B, OH1, OW1, 16))

    # layer2: Conv2d(16,32,k=4,s=2) + ReLU (kernel) + AdaptiveAvgPool2d(7) + Flatten
    p2, OH2, OW2 = _im2col_nhwc(y1, 4, 2)
    y2 = conv_gemm(p2, prepared["w2"], prepared["b2"], n_steps=1)
    y2 = adaptive_avg_pool_nhwc(y2.reshape(B, OH2, OW2, 32), 7)
    x2 = y2.reshape(B, 7 * 7 * 32)      # (S1,S2,C) flatten, fc1 pre-permuted

    # layer4 + layer5 fused in one pallas_call (Linear+ReLU, Linear+ReLU)
    return fc_tail(x2, prepared["w4"], prepared["b4"],
                   prepared["w5"], prepared["b5"])


if __name__ == "__main__":
    # spatial=38 makes layer2's output exactly 7x7 (38 -> 33 -> 16 -> 7),
    # so AdaptiveAvgPool2d(7) is the identity on this path.
    key = jax.random.PRNGKey(0)
    k_x, k_p = jax.random.split(key)

    batch, spatial, in_channels, output_size = 2, 38, 3, 8
    x = jax.random.uniform(k_x, (batch, spatial, spatial, in_channels), jnp.float32)

    params = init_params(k_p, in_channels, output_size)
    prepared = prepare_params(params)                 # weight prep done ONCE

    out = jax.block_until_ready(cnn_forward(prepared, x))
    assert out.shape == (batch, output_size), out.shape
    assert bool(jnp.all(out >= 0.0))                  # layer5 ends in ReLU (per spec)
    print("KERNEL_OK")
</pallas_src>

<mosaic_0001>
module attributes {stable_mosaic.version = 11 : i64} {
  func.func @_matmul_bias_relu_kernel(%arg0: i32, %arg1: memref<1096x108xbf16, #tpu.memory_space<vmem>>, %arg2: memref<108x16xbf16, #tpu.memory_space<vmem>>, %arg3: memref<1x16xf32, #tpu.memory_space<vmem>>, %arg4: memref<1096x16xbf16, #tpu.memory_space<vmem>>) attributes {dimension_semantics = [#tpu.dimension_semantics<parallel>], iteration_bounds = array<i64: 2>, scalar_prefetch = 0 : i64, scratch_operands = 0 : i64, tpu.core_type = #tpu.core_type<tc>, window_params = [{transform_indices = @transform_0, window_bounds = array<i64: 1096, 108>}, {pipeline_mode = #tpu.pipeline_mode<synchronous>, transform_indices = @transform_1, window_bounds = array<i64: 108, 16>}, {pipeline_mode = #tpu.pipeline_mode<synchronous>, transform_indices = @transform_2, window_bounds = array<i64: 1, 16>}, {transform_indices = @transform_3, window_bounds = array<i64: 1096, 16>}]} {
    %c0 = arith.constant 0 : index
    %c0_0 = arith.constant 0 : index
    %0 = vector.load %arg1[%c0, %c0_0] : memref<1096x108xbf16, #tpu.memory_space<vmem>>, vector<1096x108xbf16>
    %c0_1 = arith.constant 0 : index
    %c0_2 = arith.constant 0 : index
    %1 = vector.load %arg2[%c0_1, %c0_2] : memref<108x16xbf16, #tpu.memory_space<vmem>>, vector<108x16xbf16>
    %cst = arith.constant dense<0.000000e+00> : vector<1096x16xf32>
    %2 = tpu.matmul %0, %1, %cst {dimension_numbers = #tpu.dot_dimension_numbers<[1], [0], [0], [1], [0, 0, 1, 1], [], []>} : vector<1096x108xbf16>, vector<108x16xbf16>, vector<1096x16xf32> -> vector<1096x16xf32>
    %c0_3 = arith.constant 0 : index
    %c0_4 = arith.constant 0 : index
    %3 = vector.load %arg3[%c0_3, %c0_4] : memref<1x16xf32, #tpu.memory_space<vmem>>, vector<1x16xf32>
    %4 = vector.broadcast %3 : vector<1x16xf32> to vector<1096x16xf32>
    %5 = arith.addf %2, %4 : vector<1096x16xf32>
    %cst_5 = arith.constant 0.000000e+00 : f32
    %6 = vector.broadcast %cst_5 : f32 to vector<1096x16xf32>
    %7 = arith.maximumf %5, %6 : vector<1096x16xf32>
    %8 = arith.truncf %7 : vector<1096x16xf32> to vector<1096x16xbf16>
    %c0_6 = arith.constant 0 : index
    %c0_7 = arith.constant 0 : index
    %9 = vector.load %arg4[%c0_6, %c0_7] : memref<1096x16xbf16, #tpu.memory_space<vmem>>, vector<1096x16xbf16>
    tpu.vector_store %arg4[%c0_6, %c0_7], %8 {strides = array<i32>} : memref<1096x16xbf16, #tpu.memory_space<vmem>>, vector<1096x16xbf16>,
    return
  }
  func.func @transform_0(%arg0: i32) -> (i32, i32) {
    %c0_i32 = arith.constant 0 : i32
    %c0_i32_0 = arith.constant 0 : i32
    return %arg0, %c0_i32 : i32, i32
  }
  func.func @transform_1(%arg0: i32) -> (i32, i32) {
    %c0_i32 = arith.constant 0 : i32
    %c0_i32_0 = arith.constant 0 : i32
    %c0_i32_1 = arith.constant 0 : i32
    return %c0_i32, %c0_i32_0 : i32, i32
  }
  func.func @transform_2(%arg0: i32) -> (i32, i32) {
    %c0_i32 = arith.constant 0 : i32
    %c0_i32_0 = arith.constant 0 : i32
    %c0_i32_1 = arith.constant 0 : i32
    return %c0_i32, %c0_i32_0 : i32, i32
  }
  func.func @transform_3(%arg0: i32) -> (i32, i32) {
    %c0_i32 = arith.constant 0 : i32
    %c0_i32_0 = arith.constant 0 : i32
    return %arg0, %c0_i32 : i32, i32
  }
}

module attributes {stable_mosaic.version = 11 : i64} {
  func.func @_matmul_bias_relu_kernel(%arg0: i32, %arg1: memref<98x256xbf16, #tpu.memory_space<vmem>>, %arg2: memref<256x32xbf16, #tpu.memory_space<vmem>>, %arg3: memref<1x32xf32, #tpu.memory_space<vmem>>, %arg4: memref<98x32xbf16, #tpu.memory_space<vmem>>) attributes {dimension_semantics = [#tpu.dimension_semantics<parallel>], iteration_bounds = array<i64: 1>, scalar_prefetch = 0 : i64, scratch_operands = 0 : i64, tpu.core_type = #tpu.core_type<tc>, window_params = [{transform_indices = @transform_0, window_bounds = array<i64: 98, 256>}, {pipeline_mode = #tpu.pipeline_mode<synchronous>, transform_indices = @transform_1, window_bounds = array<i64: 256, 32>}, {pipeline_mode = #tpu.pipeline_mode<synchronous>, transform_indices = @transform_2, window_bounds = array<i64: 1, 32>}, {transform_indices = @transform_3, window_bounds = array<i64: 98, 32>}]} {
    %c0 = arith.constant 0 : index
    %c0_0 = arith.constant 0 : index
    %0 = vector.load %arg1[%c0, %c0_0] : memref<98x256xbf16, #tpu.memory_space<vmem>>, vector<98x256xbf16>
    %c0_1 = arith.constant 0 : index
    %c0_2 = arith.constant 0 : index
    %1 = vector.load %arg2[%c0_1, %c0_2] : memref<256x32xbf16, #tpu.memory_space<vmem>>, vector<256x32xbf16>
    %cst = arith.constant dense<0.000000e+00> : vector<98x32xf32>
    %2 = tpu.matmul %0, %1, %cst {dimension_numbers = #tpu.dot_dimension_numbers<[1], [0], [0], [1], [0, 0, 1, 1], [], []>} : vector<98x256xbf16>, vector<256x32xbf16>, vector<98x32xf32> -> vector<98x32xf32>
    %c0_3 = arith.constant 0 : index
    %c0_4 = arith.constant 0 : index
    %3 = vector.load %arg3[%c0_3, %c0_4] : memref<1x32xf32, #tpu.memory_space<vmem>>, vector<1x32xf32>
    %4 = vector.broadcast %3 : vector<1x32xf32> to vector<98x32xf32>
    %5 = arith.addf %2, %4 : vector<98x32xf32>
    %cst_5 = arith.constant 0.000000e+00 : f32
    %6 = vector.broadcast %cst_5 : f32 to vector<98x32xf32>
    %7 = arith.maximumf %5, %6 : vector<98x32xf32>
    %8 = arith.truncf %7 : vector<98x32xf32> to vector<98x32xbf16>
    %c0_6 = arith.constant 0 : index
    %c0_7 = arith.constant 0 : index
    %9 = vector.load %arg4[%c0_6, %c0_7] : memref<98x32xbf16, #tpu.memory_space<vmem>>, vector<98x32xbf16>
    tpu.vector_store %arg4[%c0_6, %c0_7], %8 {strides = array<i32>} : memref<98x32xbf16, #tpu.memory_space<vmem>>, vector<98x32xbf16>,
    return
  }
  func.func @transform_0(%arg0: i32) -> (i32, i32) {
    %c0_i32 = arith.constant 0 : i32
    %c0_i32_0 = arith.constant 0 : i32
    return %arg0, %c0_i32 : i32, i32
  }
  func.func @transform_1(%arg0: i32) -> (i32, i32) {
    %c0_i32 = arith.constant 0 : i32
    %c0_i32_0 = arith.constant 0 : i32
    %c0_i32_1 = arith.constant 0 : i32
    return %c0_i32, %c0_i32_0 : i32, i32
  }
  func.func @transform_2(%arg0: i32) -> (i32, i32) {
    %c0_i32 = arith.constant 0 : i32
    %c0_i32_0 = arith.constant 0 : i32
    %c0_i32_1 = arith.constant 0 : i32
    return %c0_i32, %c0_i32_0 : i32, i32
  }
  func.func @transform_3(%arg0: i32) -> (i32, i32) {
    %c0_i32 = arith.constant 0 : i32
    %c0_i32_0 = arith.constant 0 : i32
    return %arg0, %c0_i32 : i32, i32
  }
}

module attributes {stable_mosaic.version = 11 : i64} {
  func.func @_fc_tail_kernel(%arg0: i32, %arg1: memref<8x1568xbf16, #tpu.memory_space<vmem>>, %arg2: memref<1568x128xbf16, #tpu.memory_space<vmem>>, %arg3: memref<1x128xf32, #tpu.memory_space<vmem>>, %arg4: memref<128x8xbf16, #tpu.memory_space<vmem>>, %arg5: memref<1x8xf32, #tpu.memory_space<vmem>>, %arg6: memref<8x8xf32, #tpu.memory_space<vmem>>) attributes {dimension_semantics = [#tpu.dimension_semantics<arbitrary>], iteration_bounds = array<i64: 1>, scalar_prefetch = 0 : i64, scratch_operands = 0 : i64, tpu.core_type = #tpu.core_type<tc>, window_params = [{pipeline_mode = #tpu.pipeline_mode<synchronous>, transform_indices = @transform_0, window_bounds = array<i64: 8, 1568>}, {pipeline_mode = #tpu.pipeline_mode<synchronous>, transform_indices = @transform_1, window_bounds = array<i64: 1568, 128>}, {pipeline_mode = #tpu.pipeline_mode<synchronous>, transform_indices = @transform_2, window_bounds = array<i64: 1, 128>}, {pipeline_mode = #tpu.pipeline_mode<synchronous>, transform_indices = @transform_3, window_bounds = array<i64: 128, 8>}, {pipeline_mode = #tpu.pipeline_mode<synchronous>, transform_indices = @transform_4, window_bounds = array<i64: 1, 8>}, {pipeline_mode = #tpu.pipeline_mode<synchronous>, transform_indices = @transform_5, window_bounds = array<i64: 8, 8>}]} {
    %c0 = arith.constant 0 : index
    %c0_0 = arith.constant 0 : index
    %0 = vector.load %arg1[%c0, %c0_0] : memref<8x1568xbf16, #tpu.memory_space<vmem>>, vector<8x1568xbf16>
    %c0_1 = arith.constant 0 : index
    %c0_2 = arith.constant 0 : index
    %1 = vector.load %arg2[%c0_1, %c0_2] : memref<1568x128xbf16, #tpu.memory_space<vmem>>, vector<1568x128xbf16>
    %cst = arith.constant dense<0.000000e+00> : vector<8x128xf32>
    %2 = tpu.matmul %0, %1, %cst {dimension_numbers = #tpu.dot_dimension_numbers<[1], [0], [0], [1], [0, 0, 1, 1], [], []>} : vector<8x1568xbf16>, vector<1568x128xbf16>, vector<8x128xf32> -> vector<8x128xf32>
    %c0_3 = arith.constant 0 : index
    %c0_4 = arith.constant 0 : index
    %3 = vector.load %arg3[%c0_3, %c0_4] : memref<1x128xf32, #tpu.memory_space<vmem>>, vector<1x128xf32>
    %4 = vector.broadcast %3 : vector<1x128xf32> to vector<8x128xf32>
    %5 = arith.addf %2, %4 : vector<8x128xf32>
    %cst_5 = arith.constant 0.000000e+00 : f32
    %6 = vector.broadcast %cst_5 : f32 to vector<8x128xf32>
    %7 = arith.maximumf %5, %6 : vector<8x128xf32>
    %8 = arith.truncf %7 : vector<8x128xf32> to vector<8x128xbf16>
    %c0_6 = arith.constant 0 : index
    %c0_7 = arith.constant 0 : index
    %9 = vector.load %arg4[%c0_6, %c0_7] : memref<128x8xbf16, #tpu.memory_space<vmem>>, vector<128x8xbf16>
    %cst_8 = arith.constant dense<0.000000e+00> : vector<8x8xf32>
    %10 = tpu.matmul %8, %9, %cst_8 {dimension_numbers = #tpu.dot_dimension_numbers<[1], [0], [0], [1], [0, 0, 1, 1], [], []>} : vector<8x128xbf16>, vector<128x8xbf16>, vector<8x8xf32> -> vector<8x8xf32>
    %c0_9 = arith.constant 0 : index
    %c0_10 = arith.constant 0 : index
    %11 = vector.load %arg5[%c0_9, %c0_10] : memref<1x8xf32, #tpu.memory_space<vmem>>, vector<1x8xf32>
    %12 = vector.broadcast %11 : vector<1x8xf32> to vector<8x8xf32>
    %13 = arith.addf %10, %12 : vector<8x8xf32>
    %cst_11 = arith.constant 0.000000e+00 : f32
    %14 = vector.broadcast %cst_11 : f32 to vector<8x8xf32>
    %15 = arith.maximumf %13, %14 : vector<8x8xf32>
    %c0_12 = arith.constant 0 : index
    %c0_13 = arith.constant 0 : index
    %16 = vector.load %arg6[%c0_12, %c0_13] : memref<8x8xf32, #tpu.memory_space<vmem>>, vector<8x8xf32>
    tpu.vector_store %arg6[%c0_12, %c0_13], %15 {strides = array<i32>} : memref<8x8xf32, #tpu.memory_space<vmem>>, vector<8x8xf32>,
    return
  }
  func.func @transform_0(%arg0: i32) -> (i32, i32) {
    %c0_i32 = arith.constant 0 : i32
    %c0_i32_0 = arith.constant 0 : i32
    %c0_i32_1 = arith.constant 0 : i32
    return %c0_i32, %c0_i32_0 : i32, i32
  }
  func.func @transform_1(%arg0: i32) -> (i32, i32) {
    %c0_i32 = arith.constant 0 : i32
    %c0_i32_0 = arith.constant 0 : i32
    %c0_i32_1 = arith.constant 0 : i32
    return %c0_i32, %c0_i32_0 : i32, i32
  }
  func.func @transform_2(%arg0: i32) -> (i32, i32) {
    %c0_i32 = arith.constant 0 : i32
    %c0_i32_0 = arith.constant 0 : i32
    %c0_i32_1 = arith.constant 0 : i32
    return %c0_i32, %c0_i32_0 : i32, i32
  }
  func.func @transform_3(%arg0: i32) -> (i32, i32) {
    %c0_i32 = arith.constant 0 : i32
    %c0_i32_0 = arith.constant 0 : i32
    %c0_i32_1 = arith.constant 0 : i32
    return %c0_i32, %c0_i32_0 : i32, i32
  }
  func.func @transform_4(%arg0: i32) -> (i32, i32) {
    %c0_i32 = arith.constant 0 : i32
    %c0_i32_0 = arith.constant 0 : i32
    %c0_i32_1 = arith.constant 0 : i32
    return %c0_i32, %c0_i32_0 : i32, i32
  }
  func.func @transform_5(%arg0: i32) -> (i32, i32) {
    %c0_i32 = arith.constant 0 : i32
    %c0_i32_0 = arith.constant 0 : i32
    %c0_i32_1 = arith.constant 0 : i32
    return %c0_i32, %c0_i32_0 : i32, i32
  }
}

</mosaic_0001>

<bundles_post_ra>
// kernel: cnn_forward.3
= control target key start
LH: loop header
LB: loop body
LE: loop exit
PB: predicated region body
PF: predicated region fallthrough
CT: control target
= control target key end

     0   :  { %s3922_s12 = smov 0   ;;  %s3924_s13 = smov 0   ;;  %s4895_s0 = inlined_call_operand.vmem [shape: bf16[2178,108], index: 0, kind: input, shape index: {}]   ;;  %s4896_s1 = inlined_call_operand.vmem [shape: bf16[108,16], index: 1, kind: input, shape index: {}]   ;;  %s4897_s2 = inlined_call_operand.vmem [shape: f32[1,16], index: 2, kind: input, shape index: {}]   ;;  %s4898_s3 = inlined_call_operand.vmem [shape: bf16[2178,16], index: 3, kind: output, shape index: {}]  }
   0x1   :  { %s3926_s14 = smov 0  }
   0x2 LB: > { %s3935_s15 = sadd.s32 4294967295, %s3866_s14   ;;  %s3937_s16 = sadd.s32 1, %s3866_s14   ;;  %s3866_s14 = sphi %s3926_s14, %s4905_s14   ;;  %s3862_s13 = sphi %s3924_s13, %s4904_s13   ;;  %s3858_s12 = sphi %s3922_s12, %s4903_s12  }
   0x3   : > { %s85_s17 = ssub.s32 %s3866_s14, %s3937_s16  ;;  %s88_s18 = sadd.s32 1, %s3862_s13 }
   0x4   : > { %p86_p0 = scmp.eq.s32.totalorder %s85_s17, 0  ;;  %p98_p1 = scmp.ne.s32.totalorder %s3862_s13, %s3858_s12 }
   0x5   : > { %p99_p2 = scmp.eq.s32.totalorder %s3935_s15, 1  ;;  %p2824_p3 = scmp.ge.s32.totalorder %s3866_s14, 1 }
   0x6   : > { %s3945_s19 = scalar_select %p86_p0, %s3862_s13, %s88_s18  }
   0x7   : > { %p3947_p4 = por %p99_p2, %p98_p1  ;;  %p146_p5 = scmp.lt.s32.totalorder %s3866_s14, 3 }
   0x9   : > { %p147_p6 = pnand %p2824_p3, %p146_p5 }
   0xa   : > { %v3735_v0 = vld [vmem:[%s4896_s1] sm:$0xff] (!%p147_p6)   ;;  %v3900_v1 = vmov (!%p147_p6), 0.0   ;;  %v3736_v2 = vld [vmem:[%s4896_s1 + $0x8] sm:$0xff] (!%p147_p6)   ;;  %s3962_s25 = smul.u32 (!%p147_p6), 137, %s3935_s15  ;;  %vm3901_vm0 = vmmov (!%p147_p6), 0   ;;  %v3737_v3 = vld [vmem:[%s4896_s1 + $0x10] sm:$0xff] (!%p147_p6)  }
   0xb   : > { %150 = sbr.rel (%p147_p6) target bundleno = 623 (0x26f), region = 32  ;;  %3340 = vmatprep.subr.bf16.mxu0 (!%p147_p6), %v3900_v1  ;;  %3630 = vmatprep.subr.bf16.mxu1 (!%p147_p6), %v3900_v1  ;;  %v3738_v4 = vld [vmem:[%s4896_s1 + $0x18] sm:$0xff] (!%p147_p6)   ;;  %v3739_v5 = vld [vmem:[%s4896_s1 + $0x20] sm:$0xff] (!%p147_p6)   ;;  %v3740_v6 = vld [vmem:[%s4896_s1 + $0x28] sm:$0xff] (!%p147_p6)   ;;  %vm943_vm1 = vcmask (!%p147_p6), 1045504   ;;  %vm735_vm2 = vcmask (!%p147_p6), 883712  }
   0xc   : > { %3341 = vmatpush3.bf16.msra.mxu0 (!%p147_p6), %v3735_v0  ;;  %3637 = vmatpush3.bf16.msra.mxu1 (!%p147_p6), %v3735_v0  ;;  %p178_p7 = scmp.lt.s32.totalorder (!%p147_p6), %s3962_s25, 272  ;;  %v3741_v7 = vld [vmem:[%s4896_s1 + $0x30] sm:$0x3f] (!%p147_p6)   ;;  %s170_s18 = sand.u32 (!%p147_p6), 1, %s3858_s12   ;;  %v4216_v63 = vld [vmem:[%s4897_s2] ss:$0 sm:$0xff] (!%p147_p6) }
   0xd   : > { %3342 = vmatprep.subr.bf16.mxu0 (!%p147_p6), %v3900_v1  ;;  %3631 = vmatprep.subr.bf16.mxu1 (!%p147_p6), %v3900_v1  ;;  %v945_v8 = vsel (!%p147_p6), %vm943_vm1, %v3741_v7, 0  ;;  %s3644_s23 = smul.u32 (!%p147_p6), 548, %s170_s18  ;;  %vm2217_vm3 = vcmask (!%p147_p6), 125952  }
   0xe   : > { %3354 = vmatprep.mubr.msk.bf16.mxu0 (!%p147_p6), %vm3901_vm0, %v3900_v1  ;;  %3494 = vmatprep.mubr.msk.bf16.mxu1 (!%p147_p6), %vm3901_vm0, %v3900_v1 }
   0xf   : > { %s4234_s12 = scalar_lea.vmem (!%p147_p6), [#allocation2], %s3644_s23  }
  0x10   : > { %3343 = vmatpush3.bf16.msra.mxu0 (!%p147_p6), %v3736_v2  ;;  %3638 = vmatpush3.bf16.msra.mxu1 (!%p147_p6), %v3736_v2 }
  0x11   : > { %3344 = vmatprep.subr.bf16.mxu0 (!%p147_p6), %v3900_v1  ;;  %3632 = vmatprep.subr.bf16.mxu1 (!%p147_p6), %v3900_v1 }
  0x12   : > { %s179_s28 = scalar_select %p178_p7, %s3962_s25, 272 }
  0x13   : > { %s2363_s27 = ssub.s32 (%p3947_p4), 273, %s3962_s25 }
  0x14   : > { %s2825_s29 = sshll.u32 %s179_s28, 2  ;;  %3345 = vmatpush3.bf16.msra.mxu0 %v3737_v3  ;;  %3639 = vmatpush3.bf16.msra.mxu1 %v3737_v3  ;;  %s3261_s28 = smul.u32 (%p3947_p4), 548, %s3935_s15 }
  0x15   : > { %s3981_s7 = scalar_lea.vmem %s4895_s0, %s2825_s29  ;;  %3346 = vmatprep.subr.bf16.mxu0 %v3900_v1  ;;  %3633 = vmatprep.subr.bf16.mxu1 %v3900_v1  ;;  %p2364_p8 = scmp.lt.s32.totalorder (%p3947_p4), %s2363_s27, 137 }
  0x16   : > { %v3742_v9 = vld [vmem:[%s3981_s7] sm:$0xff]   ;;  %v3743_v10 = vld [vmem:[%s3981_s7 + $0x118] sm:$0xff]   ;;  %v3744_v11 = vld [vmem:[%s3981_s7 + $0x8] sm:$0xff]   ;;  %s4703_s4 = scalar_lea.vmem (%p3947_p4), %s4898_s3, %s3261_s28  }
  0x17   : > { %v3745_v12 = vld [vmem:[%s3981_s7 + $0x120] sm:$0xff]   ;;  %v3746_v13 = vld [vmem:[%s3981_s7 + $0x10] sm:$0xff]   ;;  %v3747_v14 = vld [vmem:[%s3981_s7 + $0x128] sm:$0xff]  }
  0x18   : > { %3347 = vmatpush3.bf16.msra.mxu0 %v3738_v4  ;;  %3640 = vmatpush3.bf16.msra.mxu1 %v3738_v4  ;;  %v3748_v15 = vld [vmem:[%s3981_s7 + $0x18] sm:$0xff]   ;;  %v3749_v16 = vld [vmem:[%s3981_s7 + $0x130] sm:$0xff]   ;;  %v3750_v17 = vld [vmem:[%s3981_s7 + $0x20] sm:$0xff]  }
  0x19   : > { %3348 = vmatprep.subr.bf16.mxu0 %v3900_v1  ;;  %3634 = vmatprep.subr.bf16.mxu1 %v3900_v1  ;;  %v3751_v18 = vld [vmem:[%s3981_s7 + $0x138] sm:$0xff]   ;;  %v3752_v19 = vld [vmem:[%s3981_s7 + $0x28] sm:$0xff]   ;;  %v3753_v20 = vld [vmem:[%s3981_s7 + $0x140] sm:$0xff]  }
  0x1a   : > { %v3754_v21 = vld [vmem:[%s3981_s7 + $0x30] sm:$0xff]   ;;  %v3755_v22 = vld [vmem:[%s3981_s7 + $0x148] sm:$0xff]   ;;  %v3756_v23 = vld [vmem:[%s3981_s7 + $0x38] sm:$0xff]  }
  0x1b   : > { %v3757_v24 = vld [vmem:[%s3981_s7 + $0x150] sm:$0xff]   ;;  %v3758_v25 = vld [vmem:[%s3981_s7 + $0x40] sm:$0xff]   ;;  %v3759_v26 = vld [vmem:[%s3981_s7 + $0x158] sm:$0xff]  }
  0x1c   : > { %3349 = vmatpush3.bf16.msra.mxu0 %v3739_v5  ;;  %3641 = vmatpush3.bf16.msra.mxu1 %v3739_v5  ;;  %v3760_v27 = vld [vmem:[%s3981_s7 + $0x48] sm:$0xff]   ;;  %v3761_v28 = vld [vmem:[%s3981_s7 + $0x160] sm:$0xff]   ;;  %v3762_v29 = vld [vmem:[%s3981_s7 + $0x50] sm:$0xff]  }
  0x1d   : > { %3350 = vmatprep.subr.bf16.mxu0 %v3900_v1  ;;  %3635 = vmatprep.subr.bf16.mxu1 %v3900_v1  ;;  %v3763_v30 = vld [vmem:[%s3981_s7 + $0x168] sm:$0xff]   ;;  %v3764_v31 = vld [vmem:[%s3981_s7 + $0x58] sm:$0xff]   ;;  %v3765_v32 = vld [vmem:[%s3981_s7 + $0x170] sm:$0xff]  }
  0x1e   : > { %v3766_v33 = vld [vmem:[%s3981_s7 + $0x60] sm:$0xff]   ;;  %v3767_v34 = vld [vmem:[%s3981_s7 + $0x178] sm:$0xff]   ;;  %v3768_v35 = vld [vmem:[%s3981_s7 + $0x68] sm:$0xff]  }
  0x1f   : > { %v3769_v36 = vld [vmem:[%s3981_s7 + $0x180] sm:$0xff]   ;;  %v3770_v37 = vld [vmem:[%s3981_s7 + $0x70] sm:$0xff]   ;;  %v3771_v38 = vld [vmem:[%s3981_s7 + $0x188] sm:$0xff]  }
  0x20   : > { %3351 = vmatpush3.bf16.msra.mxu0 %v3740_v6  ;;  %3642 = vmatpush3.bf16.msra.mxu1 %v3740_v6  ;;  %v3772_v39 = vld [vmem:[%s3981_s7 + $0x78] sm:$0xff]   ;;  %v3773_v40 = vld [vmem:[%s3981_s7 + $0x190] sm:$0xff]   ;;  %v3774_v41 = vld [vmem:[%s3981_s7 + $0x80] sm:$0xff]  }
  0x21   : > { %3352 = vmatprep.subr.bf16.mxu0 %v3900_v1  ;;  %3636 = vmatprep.subr.bf16.mxu1 %v3900_v1  ;;  %v3775_v42 = vld [vmem:[%s3981_s7 + $0x198] sm:$0xff]   ;;  %v3776_v43 = vld [vmem:[%s3981_s7 + $0x88] sm:$0xff]   ;;  %v3777_v44 = vld [vmem:[%s3981_s7 + $0x1a0] sm:$0xff]  }
  0x22   : > { %v3778_v45 = vld [vmem:[%s3981_s7 + $0x90] sm:$0xff]   ;;  %v3779_v46 = vld [vmem:[%s3981_s7 + $0x1a8] sm:$0xff]   ;;  %v3780_v47 = vld [vmem:[%s3981_s7 + $0x98] sm:$0xff]  }
  0x23   : > { %v3781_v48 = vld [vmem:[%s3981_s7 + $0x1b0] sm:$0xff]   ;;  %v3782_v49 = vld [vmem:[%s3981_s7 + $0xa0] sm:$0xff]   ;;  %v3783_v50 = vld [vmem:[%s3981_s7 + $0x1b8] sm:$0xff]  }
  0x24   : > { %3353 = vmatpush3.bf16.msra.mxu0 %v945_v8  ;;  %3643 = vmatpush3.bf16.msra.mxu1 %v945_v8  ;;  %v3784_v51 = vld [vmem:[%s3981_s7 + $0xa8] sm:$0xff]   ;;  %v3785_v52 = vld [vmem:[%s3981_s7 + $0x1c0] sm:$0xff]   ;;  %v3786_v53 = vld [vmem:[%s3981_s7 + $0xb0] sm:$0xff]  }
  0x25   : > { %v3787_v54 = vld [vmem:[%s3981_s7 + $0x1c8] sm:$0xff]   ;;  %v3788_v55 = vld [vmem:[%s3981_s7 + $0xb8] sm:$0xff]   ;;  %v3789_v56 = vld [vmem:[%s3981_s7 + $0x1d0] sm:$0xff]  }
  0x26   : > { %v3790_v57 = vld [vmem:[%s3981_s7 + $0xc0] sm:$0xff]   ;;  %v3791_v58 = vld [vmem:[%s3981_s7 + $0x1d8] sm:$0xff]   ;;  %v3792_v59 = vld [vmem:[%s3981_s7 + $0xc8] sm:$0xff]  }
  0x27   : > { %3355 = vmatmul.mubr.msk.bf16.vlgmr.msra.gmra.mrb[0].mxu0 %vm735_vm2, %v3742_v9  ;;  %3495 = vmatmul.mubr.msk.bf16.vlgmr.msra.gmra.mrb[0].mxu1 %vm735_vm2, %v3743_v10  ;;  %v3793_v60 = vld [vmem:[%s3981_s7 + $0x1e0] sm:$0xff]   ;;  %v3794_v61 = vld [vmem:[%s3981_s7 + $0xd0] sm:$0xff]   ;;  %v3795_v62 = vld [vmem:[%s3981_s7 + $0x1e8] sm:$0xff]  }
  0x28   : > { %3358 = vmatprep.mubr.msk.bf16.mxu0 %vm3901_vm0, %v3900_v1  ;;  %3498 = vmatprep.mubr.msk.bf16.mxu1 %vm3901_vm0, %v3900_v1  ;;  %v3796_v5 = vld [vmem:[%s3981_s7 + $0xd8] sm:$0xff]   ;;  %v3797_v8 = vld [vmem:[%s3981_s7 + $0x1f0] sm:$0xff]  }
  0x2f   : > { %3359 = vmatmul.mubr.msk.bf16.gmra.mrb[4].mxu0 %vm735_vm2, %v3744_v11  ;;  %3499 = vmatmul.mubr.msk.bf16.gmra.mrb[4].mxu1 %vm735_vm2, %v3745_v12 }
  0x30   : > { %3362 = vmatprep.mubr.msk.bf16.mxu0 %vm3901_vm0, %v3900_v1  ;;  %3502 = vmatprep.mubr.msk.bf16.mxu1 %vm3901_vm0, %v3900_v1 }
  0x37   : > { %3363 = vmatmul.mubr.msk.bf16.gmra.mrb[8].mxu0 %vm735_vm2, %v3746_v13  ;;  %3503 = vmatmul.mubr.msk.bf16.gmra.mrb[8].mxu1 %vm735_vm2, %v3747_v14 }
  0x38   : > { %3366 = vmatprep.mubr.msk.bf16.mxu0 %vm3901_vm0, %v3900_v1  ;;  %3506 = vmatprep.mubr.msk.bf16.mxu1 %vm3901_vm0, %v3900_v1 }
  0x3f   : > { %3367 = vmatmul.mubr.msk.bf16.gmra.mrb[12].mxu0 %vm735_vm2, %v3748_v15  ;;  %3507 = vmatmul.mubr.msk.bf16.gmra.mrb[12].mxu1 %vm735_vm2, %v3749_v16 }
  0x40   : > { %3370 = vmatprep.mubr.msk.bf16.mxu0 %vm3901_vm0, %v3900_v1  ;;  %3510 = vmatprep.mubr.msk.bf16.mxu1 %vm3901_vm0, %v3900_v1 }
  0x47   : > { %3371 = vmatmul.mubr.msk.bf16.gmra.mrb[16].mxu0 %vm735_vm2, %v3750_v17  ;;  %3511 = vmatmul.mubr.msk.bf16.gmra.mrb[16].mxu1 %vm735_vm2, %v3751_v18 }
  0x48   : > { %3374 = vmatprep.mubr.msk.bf16.mxu0 %vm3901_vm0, %v3900_v1  ;;  %3514 = vmatprep.mubr.msk.bf16.mxu1 %vm3901_vm0, %v3900_v1 }
  0x4f   : > { %3375 = vmatmul.mubr.msk.bf16.gmra.mrb[20].mxu0 %vm735_vm2, %v3752_v19  ;;  %3515 = vmatmul.mubr.msk.bf16.gmra.mrb[20].mxu1 %vm735_vm2, %v3753_v20 }
  0x50   : > { %3378 = vmatprep.mubr.msk.bf16.mxu0 %vm3901_vm0, %v3900_v1  ;;  %3518 = vmatprep.mubr.msk.bf16.mxu1 %vm3901_vm0, %v3900_v1 }
  0x57   : > { %3379 = vmatmul.mubr.msk.bf16.gmra.mrb[24].mxu0 %vm735_vm2, %v3754_v21  ;;  %3519 = vmatmul.mubr.msk.bf16.gmra.mrb[24].mxu1 %vm735_vm2, %v3755_v22 }
  0x58   : > { %3382 = vmatprep.mubr.msk.bf16.mxu0 %vm3901_vm0, %v3900_v1  ;;  %3522 = vmatprep.mubr.msk.bf16.mxu1 %vm3901_vm0, %v3900_v1 }
  0x5f   : > { %3383 = vmatmul.mubr.msk.bf16.gmra.mrb[28].mxu0 %vm735_vm2, %v3756_v23  ;;  %3523 = vmatmul.mubr.msk.bf16.gmra.mrb[28].mxu1 %vm735_vm2, %v3757_v24 }
  0x60   : > { %3386 = vmatprep.mubr.msk.bf16.mxu0 %vm3901_vm0, %v3900_v1  ;;  %3526 = vmatprep.mubr.msk.bf16.mxu1 %vm3901_vm0, %v3900_v1 }
  0x67   : > { %3387 = vmatmul.mubr.msk.bf16.gmra.mrb[32].mxu0 %vm735_vm2, %v3758_v25  ;;  %3527 = vmatmul.mubr.msk.bf16.gmra.mrb[32].mxu1 %vm735_vm2, %v3759_v26 }
  0x68   : > { %3390 = vmatprep.mubr.msk.bf16.mxu0 %vm3901_vm0, %v3900_v1  ;;  %3530 = vmatprep.mubr.msk.bf16.mxu1 %vm3901_vm0, %v3900_v1 }
  0x6f   : > { %3391 = vmatmul.mubr.msk.bf16.gmra.mrb[36].mxu0 %vm735_vm2, %v3760_v27  ;;  %3531 = vmatmul.mubr.msk.bf16.gmra.mrb[36].mxu1 %vm735_vm2, %v3761_v28  ;;  %v3798_v27 = vld [vmem:[%s3981_s7 + $0xe0] sm:$0xff]  }
  0x70   : > { %3394 = vmatprep.mubr.msk.bf16.mxu0 %vm3901_vm0, %v3900_v1  ;;  %3534 = vmatprep.mubr.msk.bf16.mxu1 %vm3901_vm0, %v3900_v1 }
  0x77   : > { %3395 = vmatmul.mubr.msk.bf16.gmra.mrb[40].mxu0 %vm735_vm2, %v3762_v29  ;;  %3535 = vmatmul.mubr.msk.bf16.gmra.mrb[40].mxu1 %vm735_vm2, %v3763_v30  ;;  %v3799_v30 = vld [vmem:[%s3981_s7 + $0x1f8] sm:$0xff]  }
  0x78   : > { %3398 = vmatprep.mubr.msk.bf16.mxu0 %vm3901_vm0, %v3900_v1  ;;  %3538 = vmatprep.mubr.msk.bf16.mxu1 %vm3901_vm0, %v3900_v1 }
  0x7f   : > { %3399 = vmatmul.mubr.msk.bf16.gmra.mrb[44].mxu0 %vm735_vm2, %v3764_v31  ;;  %3539 = vmatmul.mubr.msk.bf16.gmra.mrb[44].mxu1 %vm735_vm2, %v3765_v32 }
  0x80   : > { %3402 = vmatprep.mubr.msk.bf16.mxu0 %vm3901_vm0, %v3900_v1  ;;  %3542 = vmatprep.mubr.msk.bf16.mxu1 %vm3901_vm0, %v3900_v1 }
  0x87   : > { %3403 = vmatmul.mubr.msk.bf16.gmra.mrb[48].mxu0 %vm735_vm2, %v3766_v33  ;;  %3543 = vmatmul.mubr.msk.bf16.gmra.mrb[48].mxu1 %vm735_vm2, %v3767_v34 }
  0x88   : > { %3406 = vmatprep.mubr.msk.bf16.mxu0 %vm3901_vm0, %v3900_v1  ;;  %3546 = vmatprep.mubr.msk.bf16.mxu1 %vm3901_vm0, %v3900_v1 }
  0x8f   : > { %3407 = vmatmul.mubr.msk.bf16.gmra.mrb[52].mxu0 %vm735_vm2, %v3768_v35  ;;  %3547 = vmatmul.mubr.msk.bf16.gmra.mrb[52].mxu1 %vm735_vm2, %v3769_v36 }
  0x90   : > { %3410 = vmatprep.mubr.msk.bf16.mxu0 %vm3901_vm0, %v3900_v1  ;;  %3550 = vmatprep.mubr.msk.bf16.mxu1 %vm3901_vm0, %v3900_v1 }
  0x97   : > { %3411 = vmatmul.mubr.msk.bf16.gmra.mrb[56].mxu0 %vm735_vm2, %v3770_v37  ;;  %3551 = vmatmul.mubr.msk.bf16.gmra.mrb[56].mxu1 %vm735_vm2, %v3771_v38 }
  0x98   : > { %3414 = vmatprep.mubr.msk.bf16.mxu0 %vm3901_vm0, %v3900_v1  ;;  %3554 = vmatprep.mubr.msk.bf16.mxu1 %vm3901_vm0, %v3900_v1 }
  0x9f   : > { %3415 = vmatmul.mubr.msk.bf16.gmra.mrb[60].mxu0 %vm735_vm2, %v3772_v39  ;;  %3555 = vmatmul.mubr.msk.bf16.gmra.mrb[60].mxu1 %vm735_vm2, %v3773_v40 }
  0xa0   : > { %3418 = vmatprep.mubr.msk.bf16.mxu0 %vm3901_vm0, %v3900_v1  ;;  %3558 = vmatprep.mubr.msk.bf16.mxu1 %vm3901_vm0, %v3900_v1 }
  0xa7   : > { %3419 = vmatmul.mubr.msk.bf16.gmra.mrb[64].mxu0 %vm735_vm2, %v3774_v41  ;;  %3559 = vmatmul.mubr.msk.bf16.gmra.mrb[64].mxu1 %vm735_vm2, %v3775_v42 }
  0xa8   : > { %3422 = vmatprep.mubr.msk.bf16.mxu0 %vm3901_vm0, %v3900_v1  ;;  %3562 = vmatprep.mubr.msk.bf16.mxu1 %vm3901_vm0, %v3900_v1 }
  0xaf   : > { %3423 = vmatmul.mubr.msk.bf16.gmra.mrb[68].mxu0 %vm735_vm2, %v3776_v43  ;;  %3563 = vmatmul.mubr.msk.bf16.gmra.mrb[68].mxu1 %vm735_vm2, %v3777_v44 }
  0xb0   : > { %3426 = vmatprep.mubr.msk.bf16.mxu0 %vm3901_vm0, %v3900_v1  ;;  %3566 = vmatprep.mubr.msk.bf16.mxu1 %vm3901_vm0, %v3900_v1 }
  0xb7   : > { %3427 = vmatmul.mubr.msk.bf16.gmra.mrb[72].mxu0 %vm735_vm2, %v3778_v45  ;;  %3567 = vmatmul.mubr.msk.bf16.gmra.mrb[72].mxu1 %vm735_vm2, %v3779_v46 }
  0xb8   : > { %3430 = vmatprep.mubr.msk.bf16.mxu0 %vm3901_vm0, %v3900_v1  ;;  %3570 = vmatprep.mubr.msk.bf16.mxu1 %vm3901_vm0, %v3900_v1 }
  0xbf   : > { %3431 = vmatmul.mubr.msk.bf16.gmra.mrb[76].mxu0 %vm735_vm2, %v3780_v47  ;;  %3571 = vmatmul.mubr.msk.bf16.gmra.mrb[76].mxu1 %vm735_vm2, %v3781_v48 }
  0xc0   : > { %3434 = vmatprep.mubr.msk.bf16.mxu0 %vm3901_vm0, %v3900_v1  ;;  %3574 = vmatprep.mubr.msk.bf16.mxu1 %vm3901_vm0, %v3900_v1 }
  0xc7   : > { %3435 = vmatmul.mubr.msk.bf16.gmra.mrb[80].mxu0 %vm735_vm2, %v3782_v49  ;;  %3575 = vmatmul.mubr.msk.bf16.gmra.mrb[80].mxu1 %vm735_vm2, %v3783_v50  ;;  %v3800_v49 = vld [vmem:[%s3981_s7 + $0xe8] sm:$0xff]  }
  0xc8   : > { %3438 = vmatprep.mubr.msk.bf16.mxu0 %vm3901_vm0, %v3900_v1  ;;  %3578 = vmatprep.mubr.msk.bf16.mxu1 %vm3901_vm0, %v3900_v1 }
  0xcf   : > { %3439 = vmatmul.mubr.msk.bf16.gmra.mrb[84].mxu0 %vm735_vm2, %v3784_v51  ;;  %3579 = vmatmul.mubr.msk.bf16.gmra.mrb[84].mxu1 %vm735_vm2, %v3785_v52  ;;  %v3801_v52 = vld [vmem:[%s3981_s7 + $0x200] sm:$0xff]  }
  0xd0   : > { %3442 = vmatprep.mubr.msk.bf16.mxu0 %vm3901_vm0, %v3900_v1  ;;  %3582 = vmatprep.mubr.msk.bf16.mxu1 %vm3901_vm0, %v3900_v1 }
  0xd7   : > { %3443 = vmatmul.mubr.msk.bf16.gmra.mrb[88].mxu0 %vm735_vm2, %v3786_v53  ;;  %3583 = vmatmul.mubr.msk.bf16.gmra.mrb[88].mxu1 %vm735_vm2, %v3787_v54 }
  0xd8   : > { %3446 = vmatprep.mubr.msk.bf16.mxu0 %vm3901_vm0, %v3900_v1  ;;  %3586 = vmatprep.mubr.msk.bf16.mxu1 %vm3901_vm0, %v3900_v1 }
  0xdf   : > { %3447 = vmatmul.mubr.msk.bf16.gmra.mrb[92].mxu0 %vm735_vm2, %v3788_v55  ;;  %3587 = vmatmul.mubr.msk.bf16.gmra.mrb[92].mxu1 %vm735_vm2, %v3789_v56 }
  0xe0   : > { %3450 = vmatprep.mubr.msk.bf16.mxu0 %vm3901_vm0, %v3900_v1  ;;  %3590 = vmatprep.mubr.msk.bf16.mxu1 %vm3901_vm0, %v3900_v1 }
  0xe7   : > { %3451 = vmatmul.mubr.msk.bf16.gmra.mrb[96].mxu0 %vm735_vm2, %v3790_v57  ;;  %3591 = vmatmul.mubr.msk.bf16.gmra.mrb[96].mxu1 %vm735_vm2, %v3791_v58 }
  0xe8   : > { %3454 = vmatprep.mubr.msk.bf16.mxu0 %vm3901_vm0, %v3900_v1  ;;  %3594 = vmatprep.mubr.msk.bf16.mxu1 %vm3901_vm0, %v3900_v1 }
  0xef   : > { %3455 = vmatmul.mubr.msk.bf16.gmra.mrb[100].mxu0 %vm735_vm2, %v3792_v59  ;;  %3595 = vmatmul.mubr.msk.bf16.gmra.mrb[100].mxu1 %vm735_vm2, %v3793_v60 }
  0xf0   : > { %3458 = vmatprep.mubr.msk.bf16.mxu0 %vm3901_vm0, %v3900_v1  ;;  %3598 = vmatprep.mubr.msk.bf16.mxu1 %vm3901_vm0, %v3900_v1 }
  0xf7   : > { %3459 = vmatmul.mubr.msk.bf16.gmra.mrb[104].mxu0 %vm735_vm2, %v3794_v61  ;;  %3599 = vmatmul.mubr.msk.bf16.gmra.mrb[104].mxu1 %vm735_vm2, %v3795_v62 }
  0xf8   : > { %3462 = vmatprep.mubr.msk.bf16.mxu0 %vm3901_vm0, %v3900_v1  ;;  %3602 = vmatprep.mubr.msk.bf16.mxu1 %vm3901_vm0, %v3900_v1 }
  0xfa   : > { %v981_v0 = vpop.f32.mrb[0].mxu0  ;;  %v1261_v2 = vpop.f32.mrb[0].mxu1 }
  0xfb   : > { %v982_v3 = vadd.f32 %v4216_v63, %v981_v0  ;;  %v3356_v4 = vpop.f32.mrb[1].mxu0  ;;  %v1262_v6 = vadd.f32 %v4216_v63, %v1261_v2  ;;  %v3496_v7 = vpop.f32.mrb[1].mxu1 }
  0xfc   : > { %v984_v9 = vpop.f32.mrb[2].mxu0  ;;  %v1264_v10 = vpop.f32.mrb[2].mxu1 }
  0xfd   : > { %v1531_v11 = vmax.f32 %v982_v3, 0.0  ;;  %v985_v12 = vadd.f32 %v4216_v63, %v984_v9  ;;  %v3357_v13 = vpop.f32.mrb[3].mxu0  ;;  %v1601_v14 = vmax.f32 %v1262_v6, 0.0  ;;  %v1265_v15 = vadd.f32 %v4216_v63, %v1264_v10  ;;  %v3497_v16 = vpop.f32.mrb[3].mxu1  ;;  %v3802_v9 = vld [vmem:[%s3981_s7 + $0xf0] sm:$0xff]  }
  0xff   : > { %v3124_v17 = vpack.c.bf16 %v1531_v11, %v1531_v11  ;;  %v1532_v18 = vmax.f32 %v985_v12, 0.0  ;;  %3463 = vmatmul.mubr.msk.bf16.gmra.mrb[108].mxu0 %vm735_vm2, %v3796_v5  ;;  %v3194_v19 = vpack.c.bf16 %v1601_v14, %v1601_v14  ;;  %v1602_v20 = vmax.f32 %v1265_v15, 0.0  ;;  %3603 = vmatmul.mubr.msk.bf16.gmra.mrb[108].mxu1 %vm735_vm2, %v3797_v8  ;;  %v3803_v12 = vld [vmem:[%s3981_s7 + $0x208] sm:$0xff]  }
 0x100   : > { %3466 = vmatprep.mubr.msk.bf16.mxu0 %vm3901_vm0, %v3900_v1  ;;  %3606 = vmatprep.mubr.msk.bf16.mxu1 %vm3901_vm0, %v3900_v1 }
 0x101   : > { %2218 = vst.msk [vmem:[%s4234_s12] sm:$0xf] %vm2217_vm3, %v3124_v17  ;;  %v3125_v21 = vpack.c.bf16 %v1532_v18, %v1532_v18  ;;  %2288 = vst.msk [vmem:[%s4234_s12 + $0x118] sm:$0xf] %vm2217_vm3, %v3194_v19  ;;  %v3195_v22 = vpack.c.bf16 %v1602_v20, %v1602_v20 }
 0x102   : > { %v989_v23 = vpop.f32.mrb[4].mxu0  ;;  %v1269_v24 = vpop.f32.mrb[4].mxu1 }
 0x103   : > { %2219 = vst.msk [vmem:[%s4234_s12 + $0x4] sm:$0xf] %vm2217_vm3, %v3125_v21  ;;  %v990_v25 = vadd.f32 %v4216_v63, %v989_v23  ;;  %v3360_v26 = vpop.f32.mrb[5].mxu0  ;;  %2289 = vst.msk [vmem:[%s4234_s12 + $0x11c] sm:$0xf] %vm2217_vm3, %v3195_v22  ;;  %v1270_v28 = vadd.f32 %v4216_v63, %v1269_v24  ;;  %v3500_v29 = vpop.f32.mrb[5].mxu1 }
 0x104   : > { %v992_v31 = vpop.f32.mrb[6].mxu0  ;;  %v1272_v32 = vpop.f32.mrb[6].mxu1 }
 0x105   : > { %v1533_v33 = vmax.f32 %v990_v25, 0.0  ;;  %v993_v34 = vadd.f32 %v4216_v63, %v992_v31  ;;  %v3361_v35 = vpop.f32.mrb[7].mxu0  ;;  %v1603_v36 = vmax.f32 %v1270_v28, 0.0  ;;  %v1273_v37 = vadd.f32 %v4216_v63, %v1272_v32  ;;  %v3501_v38 = vpop.f32.mrb[7].mxu1  ;;  %v3804_v31 = vld [vmem:[%s3981_s7 + $0xf8] sm:$0xff]  }
 0x107   : > { %v3126_v39 = vpack.c.bf16 %v1533_v33, %v1533_v33  ;;  %v1534_v40 = vmax.f32 %v993_v34, 0.0  ;;  %3467 = vmatmul.mubr.msk.bf16.gmra.mrb[112].mxu0 %vm735_vm2, %v3798_v27  ;;  %v3196_v41 = vpack.c.bf16 %v1603_v36, %v1603_v36  ;;  %v1604_v42 = vmax.f32 %v1273_v37, 0.0  ;;  %3607 = vmatmul.mubr.msk.bf16.gmra.mrb[112].mxu1 %vm735_vm2, %v3799_v30  ;;  %v3805_v34 = vld [vmem:[%s3981_s7 + $0x210] sm:$0xff]  }
 0x108   : > { %3470 = vmatprep.mubr.msk.bf16.mxu0 %vm3901_vm0, %v3900_v1  ;;  %3610 = vmatprep.mubr.msk.bf16.mxu1 %vm3901_vm0, %v3900_v1 }
 0x109   : > { %2220 = vst.msk [vmem:[%s4234_s12 + $0x8] sm:$0xf] %vm2217_vm3, %v3126_v39  ;;  %v3127_v43 = vpack.c.bf16 %v1534_v40, %v1534_v40  ;;  %2290 = vst.msk [vmem:[%s4234_s12 + $0x120] sm:$0xf] %vm2217_vm3, %v3196_v41  ;;  %v3197_v44 = vpack.c.bf16 %v1604_v42, %v1604_v42 }
 0x10a   : > { %v997_v45 = vpop.f32.mrb[8].mxu0  ;;  %v1277_v46 = vpop.f32.mrb[8].mxu1 }
 0x10b   : > { %2221 = vst.msk [vmem:[%s4234_s12 + $0xc] sm:$0xf] %vm2217_vm3, %v3127_v43  ;;  %v998_v47 = vadd.f32 %v4216_v63, %v997_v45  ;;  %v3364_v48 = vpop.f32.mrb[9].mxu0  ;;  %2291 = vst.msk [vmem:[%s4234_s12 + $0x124] sm:$0xf] %vm2217_vm3, %v3197_v44  ;;  %v1278_v50 = vadd.f32 %v4216_v63, %v1277_v46  ;;  %v3504_v51 = vpop.f32.mrb[9].mxu1 }
 0x10c   : > { %v1000_v53 = vpop.f32.mrb[10].mxu0  ;;  %v1280_v54 = vpop.f32.mrb[10].mxu1 }
 0x10d   : > { %v1535_v55 = vmax.f32 %v998_v47, 0.0  ;;  %v1001_v56 = vadd.f32 %v4216_v63, %v1000_v53  ;;  %v3365_v57 = vpop.f32.mrb[11].mxu0  ;;  %v1605_v58 = vmax.f32 %v1278_v50, 0.0  ;;  %v1281_v59 = vadd.f32 %v4216_v63, %v1280_v54  ;;  %v3505_v60 = vpop.f32.mrb[11].mxu1  ;;  %v3806_v53 = vld [vmem:[%s3981_s7 + $0x100] sm:$0xff]  }
 0x10f   : > { %v3128_v61 = vpack.c.bf16 %v1535_v55, %v1535_v55  ;;  %v1536_v62 = vmax.f32 %v1001_v56, 0.0  ;;  %3471 = vmatmul.mubr.msk.bf16.gmra.mrb[116].mxu0 %vm735_vm2, %v3800_v49  ;;  %v3198_v0 = vpack.c.bf16 %v1605_v58, %v1605_v58  ;;  %v1606_v2 = vmax.f32 %v1281_v59, 0.0  ;;  %3611 = vmatmul.mubr.msk.bf16.gmra.mrb[116].mxu1 %vm735_vm2, %v3801_v52  ;;  %v3807_v56 = vld [vmem:[%s3981_s7 + $0x218] sm:$0xff]  }
 0x110   : > { %3474 = vmatprep.mubr.msk.bf16.mxu0 %vm3901_vm0, %v3900_v1  ;;  %3614 = vmatprep.mubr.msk.bf16.mxu1 %vm3901_vm0, %v3900_v1 }
 0x111   : > { %2222 = vst.msk [vmem:[%s4234_s12 + $0x10] sm:$0xf] %vm2217_vm3, %v3128_v61  ;;  %v3129_v3 = vpack.c.bf16 %v1536_v62, %v1536_v62  ;;  %2292 = vst.msk [vmem:[%s4234_s12 + $0x128] sm:$0xf] %vm2217_vm3, %v3198_v0  ;;  %v3199_v4 = vpack.c.bf16 %v1606_v2, %v1606_v2 }
 0x112   : > { %v1005_v5 = vpop.f32.mrb[12].mxu0  ;;  %v1285_v6 = vpop.f32.mrb[12].mxu1 }
 0x113   : > { %2223 = vst.msk [vmem:[%s4234_s12 + $0x14] sm:$0xf] %vm2217_vm3, %v3129_v3  ;;  %v1006_v7 = vadd.f32 %v4216_v63, %v1005_v5  ;;  %v3368_v8 = vpop.f32.mrb[13].mxu0  ;;  %2293 = vst.msk [vmem:[%s4234_s12 + $0x12c] sm:$0xf] %vm2217_vm3, %v3199_v4  ;;  %v1286_v10 = vadd.f32 %v4216_v63, %v1285_v6  ;;  %v3508_v11 = vpop.f32.mrb[13].mxu1 }
 0x114   : > { %v1008_v13 = vpop.f32.mrb[14].mxu0  ;;  %v1288_v14 = vpop.f32.mrb[14].mxu1 }
 0x115   : > { %v1537_v15 = vmax.f32 %v1006_v7, 0.0  ;;  %v1009_v16 = vadd.f32 %v4216_v63, %v1008_v13  ;;  %v3369_v17 = vpop.f32.mrb[15].mxu0  ;;  %v1607_v18 = vmax.f32 %v1286_v10, 0.0  ;;  %v1289_v19 = vadd.f32 %v4216_v63, %v1288_v14  ;;  %v3509_v20 = vpop.f32.mrb[15].mxu1  ;;  %v3808_v13 = vld [vmem:[%s3981_s7 + $0x108] sm:$0xff]  }
 0x117   : > { %v3130_v21 = vpack.c.bf16 %v1537_v15, %v1537_v15  ;;  %v1538_v22 = vmax.f32 %v1009_v16, 0.0  ;;  %3475 = vmatmul.mubr.msk.bf16.gmra.mrb[120].mxu0 %vm735_vm2, %v3802_v9  ;;  %v3200_v23 = vpack.c.bf16 %v1607_v18, %v1607_v18  ;;  %v1608_v24 = vmax.f32 %v1289_v19, 0.0  ;;  %3615 = vmatmul.mubr.msk.bf16.gmra.mrb[120].mxu1 %vm735_vm2, %v3803_v12  ;;  %v3809_v16 = vld [vmem:[%s3981_s7 + $0x220] ss:$0 sps:$4 sm:$0xff]  }
 0x118   : > { %3478 = vmatprep.mubr.msk.bf16.mxu0 %vm3901_vm0, %v3900_v1  ;;  %3618 = vmatprep.mubr.msk.bf16.mxu1 %vm3901_vm0, %v3900_v1 }
 0x119   : > { %2224 = vst.msk [vmem:[%s4234_s12 + $0x18] sm:$0xf] %vm2217_vm3, %v3130_v21  ;;  %v3131_v25 = vpack.c.bf16 %v1538_v22, %v1538_v22  ;;  %2294 = vst.msk [vmem:[%s4234_s12 + $0x130] sm:$0xf] %vm2217_vm3, %v3200_v23  ;;  %v3201_v26 = vpack.c.bf16 %v1608_v24, %v1608_v24 }
 0x11a   : > { %v1013_v27 = vpop.f32.mrb[16].mxu0  ;;  %v1293_v28 = vpop.f32.mrb[16].mxu1 }
 0x11b   : > { %2225 = vst.msk [vmem:[%s4234_s12 + $0x1c] sm:$0xf] %vm2217_vm3, %v3131_v25  ;;  %v1014_v29 = vadd.f32 %v4216_v63, %v1013_v27  ;;  %v3372_v30 = vpop.f32.mrb[17].mxu0  ;;  %2295 = vst.msk [vmem:[%s4234_s12 + $0x134] sm:$0xf] %vm2217_vm3, %v3201_v26  ;;  %v1294_v32 = vadd.f32 %v4216_v63, %v1293_v28  ;;  %v3512_v33 = vpop.f32.mrb[17].mxu1 }
 0x11c   : > { %v1016_v35 = vpop.f32.mrb[18].mxu0  ;;  %v1296_v36 = vpop.f32.mrb[18].mxu1 }
 0x11d   : > { %v1539_v37 = vmax.f32 %v1014_v29, 0.0  ;;  %v1017_v38 = vadd.f32 %v4216_v63, %v1016_v35  ;;  %v3373_v39 = vpop.f32.mrb[19].mxu0  ;;  %v1609_v40 = vmax.f32 %v1294_v32, 0.0  ;;  %v1297_v41 = vadd.f32 %v4216_v63, %v1296_v36  ;;  %v3513_v42 = vpop.f32.mrb[19].mxu1  ;;  %v3810_v35 = vld [vmem:[%s3981_s7 + $0x110] sm:$0xff]  }
 0x11f   : > { %v3132_v43 = vpack.c.bf16 %v1539_v37, %v1539_v37  ;;  %v1540_v44 = vmax.f32 %v1017_v38, 0.0  ;;  %3479 = vmatmul.mubr.msk.bf16.gmra.mrb[124].mxu0 %vm735_vm2, %v3804_v31  ;;  %v3202_v45 = vpack.c.bf16 %v1609_v40, %v1609_v40  ;;  %v1610_v46 = vmax.f32 %v1297_v41, 0.0  ;;  %3619 = vmatmul.mubr.msk.bf16.gmra.mrb[124].mxu1 %vm735_vm2, %v3805_v34 }
 0x120   : > { %3482 = vmatprep.mubr.msk.bf16.mxu0 %vm3901_vm0, %v3900_v1  ;;  %3622 = vmatprep.mubr.msk.bf16.mxu1 %vm3901_vm0, %v3900_v1 }
 0x121   : > { %2226 = vst.msk [vmem:[%s4234_s12 + $0x20] sm:$0xf] %vm2217_vm3, %v3132_v43  ;;  %v3133_v47 = vpack.c.bf16 %v1540_v44, %v1540_v44  ;;  %2296 = vst.msk [vmem:[%s4234_s12 + $0x138] sm:$0xf] %vm2217_vm3, %v3202_v45  ;;  %v3203_v48 = vpack.c.bf16 %v1610_v46, %v1610_v46 }
 0x122   : > { %v1021_v49 = vpop.f32.mrb[20].mxu0  ;;  %v1301_v50 = vpop.f32.mrb[20].mxu1 }
 0x123   : > { %2227 = vst.msk [vmem:[%s4234_s12 + $0x24] sm:$0xf] %vm2217_vm3, %v3133_v47  ;;  %v1022_v51 = vadd.f32 %v4216_v63, %v1021_v49  ;;  %v3376_v52 = vpop.f32.mrb[21].mxu0  ;;  %2297 = vst.msk [vmem:[%s4234_s12 + $0x13c] sm:$0xf] %vm2217_vm3, %v3203_v48  ;;  %v1302_v54 = vadd.f32 %v4216_v63, %v1301_v50  ;;  %v3516_v55 = vpop.f32.mrb[21].mxu1 }
 0x124   : > { %v1024_v57 = vpop.f32.mrb[22].mxu0  ;;  %v1304_v58 = vpop.f32.mrb[22].mxu1 }
 0x125   : > { %v1541_v59 = vmax.f32 %v1022_v51, 0.0  ;;  %v1025_v60 = vadd.f32 %v4216_v63, %v1024_v57  ;;  %v3377_v61 = vpop.f32.mrb[23].mxu0  ;;  %v1611_v62 = vmax.f32 %v1302_v54, 0.0  ;;  %v1305_v0 = vadd.f32 %v4216_v63, %v1304_v58  ;;  %v3517_v2 = vpop.f32.mrb[23].mxu1 }
 0x127   : > { %v3134_v3 = vpack.c.bf16 %v1541_v59, %v1541_v59  ;;  %v1542_v4 = vmax.f32 %v1025_v60, 0.0  ;;  %3483 = vmatmul.mubr.msk.bf16.gmra.mrb[128].mxu0 %vm735_vm2, %v3806_v53  ;;  %v3204_v5 = vpack.c.bf16 %v1611_v62, %v1611_v62  ;;  %v1612_v6 = vmax.f32 %v1305_v0, 0.0  ;;  %3623 = vmatmul.mubr.msk.bf16.gmra.mrb[128].mxu1 %vm735_vm2, %v3807_v56 }
 0x128   : > { %3486 = vmatprep.mubr.msk.bf16.mxu0 %vm3901_vm0, %v3900_v1  ;;  %3626 = vmatprep.mubr.msk.bf16.mxu1 %vm3901_vm0, %v3900_v1 }
 0x129   : > { %2228 = vst.msk [vmem:[%s4234_s12 + $0x28] sm:$0xf] %vm2217_vm3, %v3134_v3  ;;  %v3135_v7 = vpack.c.bf16 %v1542_v4, %v1542_v4  ;;  %2298 = vst.msk [vmem:[%s4234_s12 + $0x140] sm:$0xf] %vm2217_vm3, %v3204_v5  ;;  %v3205_v8 = vpack.c.bf16 %v1612_v6, %v1612_v6 }
 0x12a   : > { %v1029_v9 = vpop.f32.mrb[24].mxu0  ;;  %v1309_v10 = vpop.f32.mrb[24].mxu1 }
 0x12b   : > { %2229 = vst.msk [vmem:[%s4234_s12 + $0x2c] sm:$0xf] %vm2217_vm3, %v3135_v7  ;;  %v1030_v11 = vadd.f32 %v4216_v63, %v1029_v9  ;;  %v3380_v12 = vpop.f32.mrb[25].mxu0  ;;  %2299 = vst.msk [vmem:[%s4234_s12 + $0x144] sm:$0xf] %vm2217_vm3, %v3205_v8  ;;  %v1310_v14 = vadd.f32 %v4216_v63, %v1309_v10  ;;  %v3520_v15 = vpop.f32.mrb[25].mxu1 }
 0x12c   : > { %v1032_v17 = vpop.f32.mrb[26].mxu0  ;;  %v1312_v18 = vpop.f32.mrb[26].mxu1 }
 0x12d   : > { %v1543_v19 = vmax.f32 %v1030_v11, 0.0  ;;  %v1033_v20 = vadd.f32 %v4216_v63, %v1032_v17  ;;  %v3381_v21 = vpop.f32.mrb[27].mxu0  ;;  %v1613_v22 = vmax.f32 %v1310_v14, 0.0  ;;  %v1313_v23 = vadd.f32 %v4216_v63, %v1312_v18  ;;  %v3521_v24 = vpop.f32.mrb[27].mxu1 }
 0x12f   : > { %v3136_v25 = vpack.c.bf16 %v1543_v19, %v1543_v19  ;;  %v1544_v26 = vmax.f32 %v1033_v20, 0.0  ;;  %3487 = vmatmul.mubr.msk.bf16.gmra.mrb[132].mxu0 %vm735_vm2, %v3808_v13  ;;  %v3206_v27 = vpack.c.bf16 %v1613_v22, %v1613_v22  ;;  %v1614_v28 = vmax.f32 %v1313_v23, 0.0  ;;  %3627 = vmatmul.mubr.msk.bf16.gmra.mrb[132].mxu1 %vm735_vm2, %v3809_v16 }
 0x130   : > { %3490 = vmatprep.mubr.msk.bf16.mxu0 %vm3901_vm0, %v3900_v1 }
 0x131   : > { %2230 = vst.msk [vmem:[%s4234_s12 + $0x30] sm:$0xf] %vm2217_vm3, %v3136_v25  ;;  %v3137_v29 = vpack.c.bf16 %v1544_v26, %v1544_v26  ;;  %2300 = vst.msk [vmem:[%s4234_s12 + $0x148] sm:$0xf] %vm2217_vm3, %v3206_v27  ;;  %v3207_v30 = vpack.c.bf16 %v1614_v28, %v1614_v28 }
 0x132   : > { %v1037_v31 = vpop.f32.mrb[28].mxu0  ;;  %v1317_v32 = vpop.f32.mrb[28].mxu1 }
 0x133   : > { %2231 = vst.msk [vmem:[%s4234_s12 + $0x34] sm:$0xf] %vm2217_vm3, %v3137_v29  ;;  %v1038_v33 = vadd.f32 %v4216_v63, %v1037_v31  ;;  %v3384_v34 = vpop.f32.mrb[29].mxu0  ;;  %2301 = vst.msk [vmem:[%s4234_s12 + $0x14c] sm:$0xf] %vm2217_vm3, %v3207_v30  ;;  %v1318_v36 = vadd.f32 %v4216_v63, %v1317_v32  ;;  %v3524_v1 = vpop.f32.mrb[29].mxu1 }
 0x134   : > { %v1040_v37 = vpop.f32.mrb[30].mxu0  ;;  %v1320_v38 = vpop.f32.mrb[30].mxu1 }
 0x135   : > { %v1545_v39 = vmax.f32 %v1038_v33, 0.0  ;;  %v1041_v40 = vadd.f32 %v4216_v63, %v1040_v37  ;;  %v3385_v41 = vpop.f32.mrb[31].mxu0  ;;  %v1615_v42 = vmax.f32 %v1318_v36, 0.0  ;;  %v1321_v43 = vadd.f32 %v4216_v63, %v1320_v38  ;;  %v3525_v44 = vpop.f32.mrb[31].mxu1 }
 0x137   : > { %v3138_v45 = vpack.c.bf16 %v1545_v39, %v1545_v39  ;;  %v1546_v46 = vmax.f32 %v1041_v40, 0.0  ;;  %3491 = vmatmul.mubr.msk.bf16.gmra.mrb[136].mxu0 %vm735_vm2, %v3810_v35  ;;  %v3208_v47 = vpack.c.bf16 %v1615_v42, %v1615_v42  ;;  %v1616_v48 = vmax.f32 %v1321_v43, 0.0 }
 0x139   : > { %2232 = vst.msk [vmem:[%s4234_s12 + $0x38] sm:$0xf] %vm2217_vm3, %v3138_v45  ;;  %v3139_v49 = vpack.c.bf16 %v1546_v46, %v1546_v46  ;;  %2302 = vst.msk [vmem:[%s4234_s12 + $0x150] sm:$0xf] %vm2217_vm3, %v3208_v47  ;;  %v3209_v50 = vpack.c.bf16 %v1616_v48, %v1616_v48 }
 0x13a   : > { %v1045_v51 = vpop.f32.mrb[32].mxu0  ;;  %v1325_v52 = vpop.f32.mrb[32].mxu1 }
 0x13b   : > { %2233 = vst.msk [vmem:[%s4234_s12 + $0x3c] sm:$0xf] %vm2217_vm3, %v3139_v49  ;;  %v1046_v53 = vadd.f32 %v4216_v63, %v1045_v51  ;;  %v3388_v54 = vpop.f32.mrb[33].mxu0  ;;  %2303 = vst.msk [vmem:[%s4234_s12 + $0x154] sm:$0xf] %vm2217_vm3, %v3209_v50  ;;  %v1326_v55 = vadd.f32 %v4216_v63, %v1325_v52  ;;  %v3528_v56 = vpop.f32.mrb[33].mxu1 }
 0x13c   : > { %v1048_v57 = vpop.f32.mrb[34].mxu0  ;;  %v1328_v58 = vpop.f32.mrb[34].mxu1 }
 0x13d   : > { %v1547_v59 = vmax.f32 %v1046_v53, 0.0  ;;  %v1049_v60 = vadd.f32 %v4216_v63, %v1048_v57  ;;  %v3389_v61 = vpop.f32.mrb[35].mxu0  ;;  %v1617_v62 = vmax.f32 %v1326_v55, 0.0  ;;  %v1329_v0 = vadd.f32 %v4216_v63, %v1328_v58  ;;  %v3529_v2 = vpop.f32.mrb[35].mxu1 }
 0x13f   : > { %v3140_v3 = vpack.c.bf16 %v1547_v59, %v1547_v59  ;;  %v1548_v4 = vmax.f32 %v1049_v60, 0.0  ;;  %v3210_v5 = vpack.c.bf16 %v1617_v62, %v1617_v62  ;;  %v1618_v6 = vmax.f32 %v1329_v0, 0.0 }
 0x141   : > { %2234 = vst.msk [vmem:[%s4234_s12 + $0x40] sm:$0xf] %vm2217_vm3, %v3140_v3  ;;  %v3141_v7 = vpack.c.bf16 %v1548_v4, %v1548_v4  ;;  %2304 = vst.msk [vmem:[%s4234_s12 + $0x158] sm:$0xf] %vm2217_vm3, %v3210_v5  ;;  %v3211_v8 = vpack.c.bf16 %v1618_v6, %v1618_v6 }
 0x142   : > { %v1053_v9 = vpop.f32.mrb[36].mxu0  ;;  %v1333_v10 = vpop.f32.mrb[36].mxu1 }
 0x143   : > { %2235 = vst.msk [vmem:[%s4234_s12 + $0x44] sm:$0xf] %vm2217_vm3, %v3141_v7  ;;  %v1054_v11 = vadd.f32 %v4216_v63, %v1053_v9  ;;  %v3392_v12 = vpop.f32.mrb[37].mxu0  ;;  %2305 = vst.msk [vmem:[%s4234_s12 + $0x15c] sm:$0xf] %vm2217_vm3, %v3211_v8  ;;  %v1334_v13 = vadd.f32 %v4216_v63, %v1333_v10  ;;  %v3532_v14 = vpop.f32.mrb[37].mxu1 }
 0x144   : > { %v1056_v15 = vpop.f32.mrb[38].mxu0  ;;  %v1336_v16 = vpop.f32.mrb[38].mxu1 }
 0x145   : > { %v1549_v17 = vmax.f32 %v1054_v11, 0.0  ;;  %v1057_v18 = vadd.f32 %v4216_v63, %v1056_v15  ;;  %v3393_v19 = vpop.f32.mrb[39].mxu0  ;;  %v1619_v20 = vmax.f32 %v1334_v13, 0.0  ;;  %v1337_v21 = vadd.f32 %v4216_v63, %v1336_v16  ;;  %v3533_v22 = vpop.f32.mrb[39].mxu1 }
 0x147   : > { %v3142_v23 = vpack.c.bf16 %v1549_v17, %v1549_v17  ;;  %v1550_v24 = vmax.f32 %v1057_v18, 0.0  ;;  %v3212_v25 = vpack.c.bf16 %v1619_v20, %v1619_v20  ;;  %v1620_v26 = vmax.f32 %v1337_v21, 0.0 }
 0x149   : > { %2236 = vst.msk [vmem:[%s4234_s12 + $0x48] sm:$0xf] %vm2217_vm3, %v3142_v23  ;;  %v3143_v27 = vpack.c.bf16 %v1550_v24, %v1550_v24  ;;  %2306 = vst.msk [vmem:[%s4234_s12 + $0x160] sm:$0xf] %vm2217_vm3, %v3212_v25  ;;  %v3213_v28 = vpack.c.bf16 %v1620_v26, %v1620_v26 }
 0x14a   : > { %v1061_v29 = vpop.f32.mrb[40].mxu0  ;;  %v1341_v30 = vpop.f32.mrb[40].mxu1 }
 0x14b   : > { %2237 = vst.msk [vmem:[%s4234_s12 + $0x4c] sm:$0xf] %vm2217_vm3, %v3143_v27  ;;  %v1062_v31 = vadd.f32 %v4216_v63, %v1061_v29  ;;  %v3396_v32 = vpop.f32.mrb[41].mxu0  ;;  %2307 = vst.msk [vmem:[%s4234_s12 + $0x164] sm:$0xf] %vm2217_vm3, %v3213_v28  ;;  %v1342_v33 = vadd.f32 %v4216_v63, %v1341_v30  ;;  %v3536_v34 = vpop.f32.mrb[41].mxu1 }
 0x14c   : > { %v1064_v35 = vpop.f32.mrb[42].mxu0  ;;  %v1344_v36 = vpop.f32.mrb[42].mxu1 }
 0x14d   : > { %v1551_v1 = vmax.f32 %v1062_v31, 0.0  ;;  %v1065_v37 = vadd.f32 %v4216_v63, %v1064_v35  ;;  %v3397_v38 = vpop.f32.mrb[43].mxu0  ;;  %v1621_v39 = vmax.f32 %v1342_v33, 0.0  ;;  %v1345_v40 = vadd.f32 %v4216_v63, %v1344_v36  ;;  %v3537_v41 = vpop.f32.mrb[43].mxu1 }
 0x14f   : > { %v3144_v42 = vpack.c.bf16 %v1551_v1, %v1551_v1  ;;  %v1552_v43 = vmax.f32 %v1065_v37, 0.0  ;;  %v3214_v44 = vpack.c.bf16 %v1621_v39, %v1621_v39  ;;  %v1622_v45 = vmax.f32 %v1345_v40, 0.0 }
 0x151   : > { %2238 = vst.msk [vmem:[%s4234_s12 + $0x50] sm:$0xf] %vm2217_vm3, %v3144_v42  ;;  %v3145_v46 = vpack.c.bf16 %v1552_v43, %v1552_v43  ;;  %2308 = vst.msk [vmem:[%s4234_s12 + $0x168] sm:$0xf] %vm2217_vm3, %v3214_v44  ;;  %v3215_v47 = vpack.c.bf16 %v1622_v45, %v1622_v45 }
 0x152   : > { %v1069_v48 = vpop.f32.mrb[44].mxu0  ;;  %v1349_v49 = vpop.f32.mrb[44].mxu1 }
 0x153   : > { %2239 = vst.msk [vmem:[%s4234_s12 + $0x54] sm:$0xf] %vm2217_vm3, %v3145_v46  ;;  %v1070_v50 = vadd.f32 %v4216_v63, %v1069_v48  ;;  %v3400_v51 = vpop.f32.mrb[45].mxu0  ;;  %2309 = vst.msk [vmem:[%s4234_s12 + $0x16c] sm:$0xf] %vm2217_vm3, %v3215_v47  ;;  %v1350_v52 = vadd.f32 %v4216_v63, %v1349_v49  ;;  %v3540_v53 = vpop.f32.mrb[45].mxu1 }
 0x154   : > { %v1072_v54 = vpop.f32.mrb[46].mxu0  ;;  %v1352_v55 = vpop.f32.mrb[46].mxu1 }
 0x155   : > { %v1553_v56 = vmax.f32 %v1070_v50, 0.0  ;;  %v1073_v57 = vadd.f32 %v4216_v63, %v1072_v54  ;;  %v3401_v58 = vpop.f32.mrb[47].mxu0  ;;  %v1623_v59 = vmax.f32 %v1350_v52, 0.0  ;;  %v1353_v60 = vadd.f32 %v4216_v63, %v1352_v55  ;;  %v3541_v61 = vpop.f32.mrb[47].mxu1 }
 0x157   : > { %v3146_v62 = vpack.c.bf16 %v1553_v56, %v1553_v56  ;;  %v1554_v0 = vmax.f32 %v1073_v57, 0.0  ;;  %v3216_v2 = vpack.c.bf16 %v1623_v59, %v1623_v59  ;;  %v1624_v3 = vmax.f32 %v1353_v60, 0.0 }
 0x159   : > { %2240 = vst.msk [vmem:[%s4234_s12 + $0x58] sm:$0xf] %vm2217_vm3, %v3146_v62  ;;  %v3147_v4 = vpack.c.bf16 %v1554_v0, %v1554_v0  ;;  %2310 = vst.msk [vmem:[%s4234_s12 + $0x170] sm:$0xf] %vm2217_vm3, %v3216_v2  ;;  %v3217_v5 = vpack.c.bf16 %v1624_v3, %v1624_v3 }
 0x15a   : > { %v1077_v6 = vpop.f32.mrb[48].mxu0  ;;  %v1357_v7 = vpop.f32.mrb[48].mxu1 }
 0x15b   : > { %2241 = vst.msk [vmem:[%s4234_s12 + $0x5c] sm:$0xf] %vm2217_vm3, %v3147_v4  ;;  %v1078_v8 = vadd.f32 %v4216_v63, %v1077_v6  ;;  %v3404_v9 = vpop.f32.mrb[49].mxu0  ;;  %2311 = vst.msk [vmem:[%s4234_s12 + $0x174] sm:$0xf] %vm2217_vm3, %v3217_v5  ;;  %v1358_v10 = vadd.f32 %v4216_v63, %v1357_v7  ;;  %v3544_v11 = vpop.f32.mrb[49].mxu1 }
 0x15c   : > { %v1080_v12 = vpop.f32.mrb[50].mxu0  ;;  %v1360_v13 = vpop.f32.mrb[50].mxu1 }
 0x15d   : > { %v1555_v14 = vmax.f32 %v1078_v8, 0.0  ;;  %v1081_v15 = vadd.f32 %v4216_v63, %v1080_v12  ;;  %v3405_v16 = vpop.f32.mrb[51].mxu0  ;;  %v1625_v17 = vmax.f32 %v1358_v10, 0.0  ;;  %v1361_v18 = vadd.f32 %v4216_v63, %v1360_v13  ;;  %v3545_v19 = vpop.f32.mrb[51].mxu1 }
 0x15f   : > { %v3148_v20 = vpack.c.bf16 %v1555_v14, %v1555_v14  ;;  %v1556_v21 = vmax.f32 %v1081_v15, 0.0  ;;  %v3218_v22 = vpack.c.bf16 %v1625_v17, %v1625_v17  ;;  %v1626_v23 = vmax.f32 %v1361_v18, 0.0 }
 0x161   : > { %2242 = vst.msk [vmem:[%s4234_s12 + $0x60] sm:$0xf] %vm2217_vm3, %v3148_v20  ;;  %v3149_v24 = vpack.c.bf16 %v1556_v21, %v1556_v21  ;;  %2312 = vst.msk [vmem:[%s4234_s12 + $0x178] sm:$0xf] %vm2217_vm3, %v3218_v22  ;;  %v3219_v25 = vpack.c.bf16 %v1626_v23, %v1626_v23 }
 0x162   : > { %v1085_v26 = vpop.f32.mrb[52].mxu0  ;;  %v1365_v27 = vpop.f32.mrb[52].mxu1 }
 0x163   : > { %2243 = vst.msk [vmem:[%s4234_s12 + $0x64] sm:$0xf] %vm2217_vm3, %v3149_v24  ;;  %v1086_v28 = vadd.f32 %v4216_v63, %v1085_v26  ;;  %v3408_v29 = vpop.f32.mrb[53].mxu0  ;;  %2313 = vst.msk [vmem:[%s4234_s12 + $0x17c] sm:$0xf] %vm2217_vm3, %v3219_v25  ;;  %v1366_v30 = vadd.f32 %v4216_v63, %v1365_v27  ;;  %v3548_v31 = vpop.f32.mrb[53].mxu1 }
 0x164   : > { %v1088_v32 = vpop.f32.mrb[54].mxu0  ;;  %v1368_v33 = vpop.f32.mrb[54].mxu1 }
 0x165   : > { %v1557_v34 = vmax.f32 %v1086_v28, 0.0  ;;  %v1089_v35 = vadd.f32 %v4216_v63, %v1088_v32  ;;  %v3409_v36 = vpop.f32.mrb[55].mxu0  ;;  %v1627_v1 = vmax.f32 %v1366_v30, 0.0  ;;  %v1369_v37 = vadd.f32 %v4216_v63, %v1368_v33  ;;  %v3549_v38 = vpop.f32.mrb[55].mxu1 }
 0x167   : > { %v3150_v39 = vpack.c.bf16 %v1557_v34, %v1557_v34  ;;  %v1558_v40 = vmax.f32 %v1089_v35, 0.0  ;;  %v3220_v41 = vpack.c.bf16 %v1627_v1, %v1627_v1  ;;  %v1628_v42 = vmax.f32 %v1369_v37, 0.0 }
 0x169   : > { %2244 = vst.msk [vmem:[%s4234_s12 + $0x68] sm:$0xf] %vm2217_vm3, %v3150_v39  ;;  %v3151_v43 = vpack.c.bf16 %v1558_v40, %v1558_v40  ;;  %2314 = vst.msk [vmem:[%s4234_s12 + $0x180] sm:$0xf] %vm2217_vm3, %v3220_v41  ;;  %v3221_v44 = vpack.c.bf16 %v1628_v42, %v1628_v42 }
 0x16a   : > { %v1093_v45 = vpop.f32.mrb[56].mxu0  ;;  %v1373_v46 = vpop.f32.mrb[56].mxu1 }
 0x16b   : > { %2245 = vst.msk [vmem:[%s4234_s12 + $0x6c] sm:$0xf] %vm2217_vm3, %v3151_v43  ;;  %v1094_v47 = vadd.f32 %v4216_v63, %v1093_v45  ;;  %v3412_v48 = vpop.f32.mrb[57].mxu0  ;;  %2315 = vst.msk [vmem:[%s4234_s12 + $0x184] sm:$0xf] %vm2217_vm3, %v3221_v44  ;;  %v1374_v49 = vadd.f32 %v4216_v63, %v1373_v46  ;;  %v3552_v50 = vpop.f32.mrb[57].mxu1 }
 0x16c   : > { %v1096_v51 = vpop.f32.mrb[58].mxu0  ;;  %v1376_v52 = vpop.f32.mrb[58].mxu1 }
 0x16d   : > { %v1559_v53 = vmax.f32 %v1094_v47, 0.0  ;;  %v1097_v54 = vadd.f32 %v4216_v63, %v1096_v51  ;;  %v3413_v55 = vpop.f32.mrb[59].mxu0  ;;  %v1629_v56 = vmax.f32 %v1374_v49, 0.0  ;;  %v1377_v57 = vadd.f32 %v4216_v63, %v1376_v52  ;;  %v3553_v58 = vpop.f32.mrb[59].mxu1 }
 0x16f   : > { %v3152_v59 = vpack.c.bf16 %v1559_v53, %v1559_v53  ;;  %v1560_v60 = vmax.f32 %v1097_v54, 0.0  ;;  %v3222_v61 = vpack.c.bf16 %v1629_v56, %v1629_v56  ;;  %v1630_v62 = vmax.f32 %v1377_v57, 0.0 }
 0x171   : > { %2246 = vst.msk [vmem:[%s4234_s12 + $0x70] sm:$0xf] %vm2217_vm3, %v3152_v59  ;;  %v3153_v0 = vpack.c.bf16 %v1560_v60, %v1560_v60  ;;  %2316 = vst.msk [vmem:[%s4234_s12 + $0x188] sm:$0xf] %vm2217_vm3, %v3222_v61  ;;  %v3223_v2 = vpack.c.bf16 %v1630_v62, %v1630_v62 }
 0x172   : > { %v1101_v3 = vpop.f32.mrb[60].mxu0  ;;  %v1381_v4 = vpop.f32.mrb[60].mxu1 }
 0x173   : > { %2247 = vst.msk [vmem:[%s4234_s12 + $0x74] sm:$0xf] %vm2217_vm3, %v3153_v0  ;;  %v1102_v5 = vadd.f32 %v4216_v63, %v1101_v3  ;;  %v3416_v6 = vpop.f32.mrb[61].mxu0  ;;  %2317 = vst.msk [vmem:[%s4234_s12 + $0x18c] sm:$0xf] %vm2217_vm3, %v3223_v2  ;;  %v1382_v7 = vadd.f32 %v4216_v63, %v1381_v4  ;;  %v3556_v8 = vpop.f32.mrb[61].mxu1 }
 0x174   : > { %v1104_v9 = vpop.f32.mrb[62].mxu0  ;;  %v1384_v10 = vpop.f32.mrb[62].mxu1 }
 0x175   : > { %v1561_v11 = vmax.f32 %v1102_v5, 0.0  ;;  %v1105_v12 = vadd.f32 %v4216_v63, %v1104_v9  ;;  %v3417_v13 = vpop.f32.mrb[63].mxu0  ;;  %v1631_v14 = vmax.f32 %v1382_v7, 0.0  ;;  %v1385_v15 = vadd.f32 %v4216_v63, %v1384_v10  ;;  %v3557_v16 = vpop.f32.mrb[63].mxu1 }
 0x177   : > { %v3154_v17 = vpack.c.bf16 %v1561_v11, %v1561_v11  ;;  %v1562_v18 = vmax.f32 %v1105_v12, 0.0  ;;  %v3224_v19 = vpack.c.bf16 %v1631_v14, %v1631_v14  ;;  %v1632_v20 = vmax.f32 %v1385_v15, 0.0 }
 0x179   : > { %2248 = vst.msk [vmem:[%s4234_s12 + $0x78] sm:$0xf] %vm2217_vm3, %v3154_v17  ;;  %v3155_v21 = vpack.c.bf16 %v1562_v18, %v1562_v18  ;;  %2318 = vst.msk [vmem:[%s4234_s12 + $0x190] sm:$0xf] %vm2217_vm3, %v3224_v19  ;;  %v3225_v22 = vpack.c.bf16 %v1632_v20, %v1632_v20 }
 0x17a   : > { %v1109_v23 = vpop.f32.mrb[64].mxu0  ;;  %v1389_v24 = vpop.f32.mrb[64].mxu1 }
 0x17b   : > { %2249 = vst.msk [vmem:[%s4234_s12 + $0x7c] sm:$0xf] %vm2217_vm3, %v3155_v21  ;;  %v1110_v25 = vadd.f32 %v4216_v63, %v1109_v23  ;;  %v3420_v26 = vpop.f32.mrb[65].mxu0  ;;  %2319 = vst.msk [vmem:[%s4234_s12 + $0x194] sm:$0xf] %vm2217_vm3, %v3225_v22  ;;  %v1390_v27 = vadd.f32 %v4216_v63, %v1389_v24  ;;  %v3560_v28 = vpop.f32.mrb[65].mxu1 }
 0x17c   : > { %v1112_v29 = vpop.f32.mrb[66].mxu0  ;;  %v1392_v30 = vpop.f32.mrb[66].mxu1 }
 0x17d   : > { %v1563_v31 = vmax.f32 %v1110_v25, 0.0  ;;  %v1113_v32 = vadd.f32 %v4216_v63, %v1112_v29  ;;  %v3421_v33 = vpop.f32.mrb[67].mxu0  ;;  %v1633_v34 = vmax.f32 %v1390_v27, 0.0  ;;  %v1393_v35 = vadd.f32 %v4216_v63, %v1392_v30  ;;  %v3561_v36 = vpop.f32.mrb[67].mxu1  ;;  %v4513_v29 = vld [vmem:[%s4897_s2] ss:$0 sm:$0xff] }
 0x17f   : > { %v3156_v1 = vpack.c.bf16 %v1563_v31, %v1563_v31  ;;  %v1564_v37 = vmax.f32 %v1113_v32, 0.0  ;;  %v3226_v38 = vpack.c.bf16 %v1633_v34, %v1633_v34  ;;  %v1634_v39 = vmax.f32 %v1393_v35, 0.0 }
 0x181   : > { %2250 = vst.msk [vmem:[%s4234_s12 + $0x80] sm:$0xf] %vm2217_vm3, %v3156_v1  ;;  %v3157_v40 = vpack.c.bf16 %v1564_v37, %v1564_v37  ;;  %2320 = vst.msk [vmem:[%s4234_s12 + $0x198] sm:$0xf] %vm2217_vm3, %v3226_v38  ;;  %v3227_v41 = vpack.c.bf16 %v1634_v39, %v1634_v39 }
 0x182   : > { %v1117_v42 = vpop.f32.mrb[68].mxu0  ;;  %v1397_v43 = vpop.f32.mrb[68].mxu1 }
 0x183   : > { %2251 = vst.msk [vmem:[%s4234_s12 + $0x84] sm:$0xf] %vm2217_vm3, %v3157_v40  ;;  %v1118_v44 = vadd.f32 %v4216_v63, %v1117_v42  ;;  %v3424_v45 = vpop.f32.mrb[69].mxu0  ;;  %2321 = vst.msk [vmem:[%s4234_s12 + $0x19c] sm:$0xf] %vm2217_vm3, %v3227_v41  ;;  %v1398_v46 = vadd.f32 %v4216_v63, %v1397_v43  ;;  %v3564_v47 = vpop.f32.mrb[69].mxu1 }
 0x184   : > { %v1120_v48 = vpop.f32.mrb[70].mxu0  ;;  %v1400_v49 = vpop.f32.mrb[70].mxu1 }
 0x185   : > { %v1565_v50 = vmax.f32 %v1118_v44, 0.0  ;;  %v1121_v51 = vadd.f32 %v4216_v63, %v1120_v48  ;;  %v3425_v52 = vpop.f32.mrb[71].mxu0  ;;  %v1635_v53 = vmax.f32 %v1398_v46, 0.0  ;;  %v1401_v54 = vadd.f32 %v4216_v63, %v1400_v49  ;;  %v3565_v55 = vpop.f32.mrb[71].mxu1 }
 0x187   : > { %v3158_v56 = vpack.c.bf16 %v1565_v50, %v1565_v50  ;;  %v1566_v57 = vmax.f32 %v1121_v51, 0.0  ;;  %v3228_v58 = vpack.c.bf16 %v1635_v53, %v1635_v53  ;;  %v1636_v59 = vmax.f32 %v1401_v54, 0.0 }
 0x189   : > { %2252 = vst.msk [vmem:[%s4234_s12 + $0x88] sm:$0xf] %vm2217_vm3, %v3158_v56  ;;  %v3159_v60 = vpack.c.bf16 %v1566_v57, %v1566_v57  ;;  %2322 = vst.msk [vmem:[%s4234_s12 + $0x1a0] sm:$0xf] %vm2217_vm3, %v3228_v58  ;;  %v3229_v61 = vpack.c.bf16 %v1636_v59, %v1636_v59 }
 0x18a   : > { %v1125_v62 = vpop.f32.mrb[72].mxu0  ;;  %v1405_v0 = vpop.f32.mrb[72].mxu1 }
 0x18b   : > { %2253 = vst.msk [vmem:[%s4234_s12 + $0x8c] sm:$0xf] %vm2217_vm3, %v3159_v60  ;;  %v1126_v2 = vadd.f32 %v4216_v63, %v1125_v62  ;;  %v3428_v3 = vpop.f32.mrb[73].mxu0  ;;  %2323 = vst.msk [vmem:[%s4234_s12 + $0x1a4] sm:$0xf] %vm2217_vm3, %v3229_v61  ;;  %v1406_v4 = vadd.f32 %v4216_v63, %v1405_v0  ;;  %v3568_v5 = vpop.f32.mrb[73].mxu1 }
 0x18c   : > { %v1128_v6 = vpop.f32.mrb[74].mxu0  ;;  %v1408_v7 = vpop.f32.mrb[74].mxu1 }
 0x18d   : > { %v1567_v8 = vmax.f32 %v1126_v2, 0.0  ;;  %v1129_v9 = vadd.f32 %v4216_v63, %v1128_v6  ;;  %v3429_v10 = vpop.f32.mrb[75].mxu0  ;;  %v1637_v11 = vmax.f32 %v1406_v4, 0.0  ;;  %v1409_v12 = vadd.f32 %v4216_v63, %v1408_v7  ;;  %v3569_v13 = vpop.f32.mrb[75].mxu1 }
 0x18f   : > { %v3160_v14 = vpack.c.bf16 %v1567_v8, %v1567_v8  ;;  %v1568_v15 = vmax.f32 %v1129_v9, 0.0  ;;  %v3230_v16 = vpack.c.bf16 %v1637_v11, %v1637_v11  ;;  %v1638_v17 = vmax.f32 %v1409_v12, 0.0 }
 0x191   : > { %2254 = vst.msk [vmem:[%s4234_s12 + $0x90] sm:$0xf] %vm2217_vm3, %v3160_v14  ;;  %v3161_v18 = vpack.c.bf16 %v1568_v15, %v1568_v15  ;;  %2324 = vst.msk [vmem:[%s4234_s12 + $0x1a8] sm:$0xf] %vm2217_vm3, %v3230_v16  ;;  %v3231_v19 = vpack.c.bf16 %v1638_v17, %v1638_v17 }
 0x192   : > { %v1133_v20 = vpop.f32.mrb[76].mxu0  ;;  %v1413_v21 = vpop.f32.mrb[76].mxu1 }
 0x193   : > { %2255 = vst.msk [vmem:[%s4234_s12 + $0x94] sm:$0xf] %vm2217_vm3, %v3161_v18  ;;  %v1134_v22 = vadd.f32 %v4216_v63, %v1133_v20  ;;  %v3432_v23 = vpop.f32.mrb[77].mxu0  ;;  %2325 = vst.msk [vmem:[%s4234_s12 + $0x1ac] sm:$0xf] %vm2217_vm3, %v3231_v19  ;;  %v1414_v24 = vadd.f32 %v4216_v63, %v1413_v21  ;;  %v3572_v25 = vpop.f32.mrb[77].mxu1 }
 0x194   : > { %v1136_v26 = vpop.f32.mrb[78].mxu0  ;;  %v1416_v27 = vpop.f32.mrb[78].mxu1 }
 0x195   : > { %v1569_v28 = vmax.f32 %v1134_v22, 0.0  ;;  %v1137_v30 = vadd.f32 %v4513_v29, %v1136_v26  ;;  %v3433_v31 = vpop.f32.mrb[79].mxu0  ;;  %v1639_v32 = vmax.f32 %v1414_v24, 0.0  ;;  %v1417_v33 = vadd.f32 %v4513_v29, %v1416_v27  ;;  %v3573_v34 = vpop.f32.mrb[79].mxu1 }
 0x197   : > { %v3162_v63 = vpack.c.bf16 %v1569_v28, %v1569_v28  ;;  %v1570_v35 = vmax.f32 %v1137_v30, 0.0  ;;  %v3232_v36 = vpack.c.bf16 %v1639_v32, %v1639_v32  ;;  %v1640_v1 = vmax.f32 %v1417_v33, 0.0 }
 0x199   : > { %2256 = vst.msk [vmem:[%s4234_s12 + $0x98] sm:$0xf] %vm2217_vm3, %v3162_v63  ;;  %v3163_v37 = vpack.c.bf16 %v1570_v35, %v1570_v35  ;;  %2326 = vst.msk [vmem:[%s4234_s12 + $0x1b0] sm:$0xf] %vm2217_vm3, %v3232_v36  ;;  %v3233_v38 = vpack.c.bf16 %v1640_v1, %v1640_v1 }
 0x19a   : > { %v1141_v39 = vpop.f32.mrb[80].mxu0  ;;  %v1421_v40 = vpop.f32.mrb[80].mxu1 }
 0x19b   : > { %2257 = vst.msk [vmem:[%s4234_s12 + $0x9c] sm:$0xf] %vm2217_vm3, %v3163_v37  ;;  %v1142_v41 = vadd.f32 %v4513_v29, %v1141_v39  ;;  %v3436_v42 = vpop.f32.mrb[81].mxu0  ;;  %2327 = vst.msk [vmem:[%s4234_s12 + $0x1b4] sm:$0xf] %vm2217_vm3, %v3233_v38  ;;  %v1422_v43 = vadd.f32 %v4513_v29, %v1421_v40  ;;  %v3576_v44 = vpop.f32.mrb[81].mxu1 }
 0x19c   : > { %v1144_v45 = vpop.f32.mrb[82].mxu0  ;;  %v1424_v46 = vpop.f32.mrb[82].mxu1 }
 0x19d   : > { %v1571_v47 = vmax.f32 %v1142_v41, 0.0  ;;  %v1145_v48 = vadd.f32 %v4513_v29, %v1144_v45  ;;  %v3437_v49 = vpop.f32.mrb[83].mxu0  ;;  %v1641_v50 = vmax.f32 %v1422_v43, 0.0  ;;  %v1425_v51 = vadd.f32 %v4513_v29, %v1424_v46  ;;  %v3577_v52 = vpop.f32.mrb[83].mxu1 }
 0x19f   : > { %v3164_v53 = vpack.c.bf16 %v1571_v47, %v1571_v47  ;;  %v1572_v54 = vmax.f32 %v1145_v48, 0.0  ;;  %v3234_v55 = vpack.c.bf16 %v1641_v50, %v1641_v50  ;;  %v1642_v56 = vmax.f32 %v1425_v51, 0.0 }
 0x1a1   : > { %2258 = vst.msk [vmem:[%s4234_s12 + $0xa0] sm:$0xf] %vm2217_vm3, %v3164_v53  ;;  %v3165_v57 = vpack.c.bf16 %v1572_v54, %v1572_v54  ;;  %2328 = vst.msk [vmem:[%s4234_s12 + $0x1b8] sm:$0xf] %vm2217_vm3, %v3234_v55  ;;  %v3235_v58 = vpack.c.bf16 %v1642_v56, %v1642_v56 }
 0x1a2   : > { %v1149_v59 = vpop.f32.mrb[84].mxu0  ;;  %v1429_v60 = vpop.f32.mrb[84].mxu1 }
 0x1a3   : > { %2259 = vst.msk [vmem:[%s4234_s12 + $0xa4] sm:$0xf] %vm2217_vm3, %v3165_v57  ;;  %v1150_v61 = vadd.f32 %v4513_v29, %v1149_v59  ;;  %v3440_v62 = vpop.f32.mrb[85].mxu0  ;;  %2329 = vst.msk [vmem:[%s4234_s12 + $0x1bc] sm:$0xf] %vm2217_vm3, %v3235_v58  ;;  %v1430_v0 = vadd.f32 %v4513_v29, %v1429_v60  ;;  %v3580_v2 = vpop.f32.mrb[85].mxu1 }
 0x1a4   : > { %v1152_v3 = vpop.f32.mrb[86].mxu0  ;;  %v1432_v4 = vpop.f32.mrb[86].mxu1 }
 0x1a5   : > { %v1573_v5 = vmax.f32 %v1150_v61, 0.0  ;;  %v1153_v6 = vadd.f32 %v4513_v29, %v1152_v3  ;;  %v3441_v7 = vpop.f32.mrb[87].mxu0  ;;  %v1643_v8 = vmax.f32 %v1430_v0, 0.0  ;;  %v1433_v9 = vadd.f32 %v4513_v29, %v1432_v4  ;;  %v3581_v10 = vpop.f32.mrb[87].mxu1 }
 0x1a7   : > { %v3166_v11 = vpack.c.bf16 %v1573_v5, %v1573_v5  ;;  %v1574_v12 = vmax.f32 %v1153_v6, 0.0  ;;  %v3236_v13 = vpack.c.bf16 %v1643_v8, %v1643_v8  ;;  %v1644_v14 = vmax.f32 %v1433_v9, 0.0 }
 0x1a9   : > { %2260 = vst.msk [vmem:[%s4234_s12 + $0xa8] sm:$0xf] %vm2217_vm3, %v3166_v11  ;;  %v3167_v15 = vpack.c.bf16 %v1574_v12, %v1574_v12  ;;  %2330 = vst.msk [vmem:[%s4234_s12 + $0x1c0] sm:$0xf] %vm2217_vm3, %v3236_v13  ;;  %v3237_v16 = vpack.c.bf16 %v1644_v14, %v1644_v14 }
 0x1aa   : > { %v1157_v17 = vpop.f32.mrb[88].mxu0  ;;  %v1437_v18 = vpop.f32.mrb[88].mxu1 }
 0x1ab   : > { %2261 = vst.msk [vmem:[%s4234_s12 + $0xac] sm:$0xf] %vm2217_vm3, %v3167_v15  ;;  %v1158_v19 = vadd.f32 %v4513_v29, %v1157_v17  ;;  %v3444_v20 = vpop.f32.mrb[89].mxu0  ;;  %2331 = vst.msk [vmem:[%s4234_s12 + $0x1c4] sm:$0xf] %vm2217_vm3, %v3237_v16  ;;  %v1438_v21 = vadd.f32 %v4513_v29, %v1437_v18  ;;  %v3584_v22 = vpop.f32.mrb[89].mxu1 }
 0x1ac   : > { %v1160_v23 = vpop.f32.mrb[90].mxu0  ;;  %v1440_v24 = vpop.f32.mrb[90].mxu1 }
 0x1ad   : > { %v1575_v25 = vmax.f32 %v1158_v19, 0.0  ;;  %v1161_v26 = vadd.f32 %v4513_v29, %v1160_v23  ;;  %v3445_v27 = vpop.f32.mrb[91].mxu0  ;;  %v1645_v28 = vmax.f32 %v1438_v21, 0.0  ;;  %v1441_v30 = vadd.f32 %v4513_v29, %v1440_v24  ;;  %v3585_v31 = vpop.f32.mrb[91].mxu1 }
 0x1af   : > { %v3168_v32 = vpack.c.bf16 %v1575_v25, %v1575_v25  ;;  %v1576_v33 = vmax.f32 %v1161_v26, 0.0  ;;  %v3238_v34 = vpack.c.bf16 %v1645_v28, %v1645_v28  ;;  %v1646_v63 = vmax.f32 %v1441_v30, 0.0 }
 0x1b1   : > { %2262 = vst.msk [vmem:[%s4234_s12 + $0xb0] sm:$0xf] %vm2217_vm3, %v3168_v32  ;;  %v3169_v35 = vpack.c.bf16 %v1576_v33, %v1576_v33  ;;  %2332 = vst.msk [vmem:[%s4234_s12 + $0x1c8] sm:$0xf] %vm2217_vm3, %v3238_v34  ;;  %v3239_v36 = vpack.c.bf16 %v1646_v63, %v1646_v63 }
 0x1b2   : > { %v1165_v1 = vpop.f32.mrb[92].mxu0  ;;  %v1445_v37 = vpop.f32.mrb[92].mxu1 }
 0x1b3   : > { %2263 = vst.msk [vmem:[%s4234_s12 + $0xb4] sm:$0xf] %vm2217_vm3, %v3169_v35  ;;  %v1166_v38 = vadd.f32 %v4513_v29, %v1165_v1  ;;  %v3448_v39 = vpop.f32.mrb[93].mxu0  ;;  %2333 = vst.msk [vmem:[%s4234_s12 + $0x1cc] sm:$0xf] %vm2217_vm3, %v3239_v36  ;;  %v1446_v40 = vadd.f32 %v4513_v29, %v1445_v37  ;;  %v3588_v41 = vpop.f32.mrb[93].mxu1 }
 0x1b4   : > { %v1168_v42 = vpop.f32.mrb[94].mxu0  ;;  %v1448_v43 = vpop.f32.mrb[94].mxu1 }
 0x1b5   : > { %v1577_v44 = vmax.f32 %v1166_v38, 0.0  ;;  %v1169_v45 = vadd.f32 %v4513_v29, %v1168_v42  ;;  %v3449_v46 = vpop.f32.mrb[95].mxu0  ;;  %v1647_v47 = vmax.f32 %v1446_v40, 0.0  ;;  %v1449_v48 = vadd.f32 %v4513_v29, %v1448_v43  ;;  %v3589_v49 = vpop.f32.mrb[95].mxu1 }
 0x1b7   : > { %v3170_v50 = vpack.c.bf16 %v1577_v44, %v1577_v44  ;;  %v1578_v51 = vmax.f32 %v1169_v45, 0.0  ;;  %v3240_v52 = vpack.c.bf16 %v1647_v47, %v1647_v47  ;;  %v1648_v53 = vmax.f32 %v1449_v48, 0.0 }
 0x1b9   : > { %2264 = vst.msk [vmem:[%s4234_s12 + $0xb8] sm:$0xf] %vm2217_vm3, %v3170_v50  ;;  %v3171_v54 = vpack.c.bf16 %v1578_v51, %v1578_v51  ;;  %2334 = vst.msk [vmem:[%s4234_s12 + $0x1d0] sm:$0xf] %vm2217_vm3, %v3240_v52  ;;  %v3241_v55 = vpack.c.bf16 %v1648_v53, %v1648_v53 }
 0x1ba   : > { %v1173_v56 = vpop.f32.mrb[96].mxu0  ;;  %v1453_v57 = vpop.f32.mrb[96].mxu1 }
 0x1bb   : > { %2265 = vst.msk [vmem:[%s4234_s12 + $0xbc] sm:$0xf] %vm2217_vm3, %v3171_v54  ;;  %v1174_v58 = vadd.f32 %v4513_v29, %v1173_v56  ;;  %v3452_v59 = vpop.f32.mrb[97].mxu0  ;;  %2335 = vst.msk [vmem:[%s4234_s12 + $0x1d4] sm:$0xf] %vm2217_vm3, %v3241_v55  ;;  %v1454_v60 = vadd.f32 %v4513_v29, %v1453_v57  ;;  %v3592_v61 = vpop.f32.mrb[97].mxu1 }
 0x1bc   : > { %v1176_v62 = vpop.f32.mrb[98].mxu0  ;;  %v1456_v0 = vpop.f32.mrb[98].mxu1 }
 0x1bd   : > { %v1579_v2 = vmax.f32 %v1174_v58, 0.0  ;;  %v1177_v3 = vadd.f32 %v4513_v29, %v1176_v62  ;;  %v3453_v4 = vpop.f32.mrb[99].mxu0  ;;  %v1649_v5 = vmax.f32 %v1454_v60, 0.0  ;;  %v1457_v6 = vadd.f32 %v4513_v29, %v1456_v0  ;;  %v3593_v7 = vpop.f32.mrb[99].mxu1 }
 0x1bf   : > { %v3172_v8 = vpack.c.bf16 %v1579_v2, %v1579_v2  ;;  %v1580_v9 = vmax.f32 %v1177_v3, 0.0  ;;  %v3242_v10 = vpack.c.bf16 %v1649_v5, %v1649_v5  ;;  %v1650_v11 = vmax.f32 %v1457_v6, 0.0 }
 0x1c1   : > { %2266 = vst.msk [vmem:[%s4234_s12 + $0xc0] sm:$0xf] %vm2217_vm3, %v3172_v8  ;;  %v3173_v12 = vpack.c.bf16 %v1580_v9, %v1580_v9  ;;  %2336 = vst.msk [vmem:[%s4234_s12 + $0x1d8] sm:$0xf] %vm2217_vm3, %v3242_v10  ;;  %v3243_v13 = vpack.c.bf16 %v1650_v11, %v1650_v11 }
 0x1c2   : > { %v1181_v14 = vpop.f32.mrb[100].mxu0  ;;  %v1461_v15 = vpop.f32.mrb[100].mxu1 }
 0x1c3   : > { %2267 = vst.msk [vmem:[%s4234_s12 + $0xc4] sm:$0xf] %vm2217_vm3, %v3173_v12  ;;  %v1182_v16 = vadd.f32 %v4513_v29, %v1181_v14  ;;  %v3456_v17 = vpop.f32.mrb[101].mxu0  ;;  %2337 = vst.msk [vmem:[%s4234_s12 + $0x1dc] sm:$0xf] %vm2217_vm3, %v3243_v13  ;;  %v1462_v18 = vadd.f32 %v4513_v29, %v1461_v15  ;;  %v3596_v19 = vpop.f32.mrb[101].mxu1 }
 0x1c4   : > { %v1184_v20 = vpop.f32.mrb[102].mxu0  ;;  %v1464_v21 = vpop.f32.mrb[102].mxu1 }
 0x1c5   : > { %v1581_v22 = vmax.f32 %v1182_v16, 0.0  ;;  %v1185_v23 = vadd.f32 %v4513_v29, %v1184_v20  ;;  %v3457_v24 = vpop.f32.mrb[103].mxu0  ;;  %v1651_v25 = vmax.f32 %v1462_v18, 0.0  ;;  %v1465_v26 = vadd.f32 %v4513_v29, %v1464_v21  ;;  %v3597_v27 = vpop.f32.mrb[103].mxu1 }
 0x1c7   : > { %v3174_v28 = vpack.c.bf16 %v1581_v22, %v1581_v22  ;;  %v1582_v30 = vmax.f32 %v1185_v23, 0.0  ;;  %v3244_v31 = vpack.c.bf16 %v1651_v25, %v1651_v25  ;;  %v1652_v32 = vmax.f32 %v1465_v26, 0.0 }
 0x1c9   : > { %2268 = vst.msk [vmem:[%s4234_s12 + $0xc8] sm:$0xf] %vm2217_vm3, %v3174_v28  ;;  %v3175_v33 = vpack.c.bf16 %v1582_v30, %v1582_v30  ;;  %2338 = vst.msk [vmem:[%s4234_s12 + $0x1e0] sm:$0xf] %vm2217_vm3, %v3244_v31  ;;  %v3245_v34 = vpack.c.bf16 %v1652_v32, %v1652_v32 }
 0x1ca   : > { %v1189_v63 = vpop.f32.mrb[104].mxu0  ;;  %v1469_v35 = vpop.f32.mrb[104].mxu1 }
 0x1cb   : > { %2269 = vst.msk [vmem:[%s4234_s12 + $0xcc] sm:$0xf] %vm2217_vm3, %v3175_v33  ;;  %v1190_v36 = vadd.f32 %v4513_v29, %v1189_v63  ;;  %v3460_v1 = vpop.f32.mrb[105].mxu0  ;;  %2339 = vst.msk [vmem:[%s4234_s12 + $0x1e4] sm:$0xf] %vm2217_vm3, %v3245_v34  ;;  %v1470_v37 = vadd.f32 %v4513_v29, %v1469_v35  ;;  %v3600_v38 = vpop.f32.mrb[105].mxu1 }
 0x1cc   : > { %v1192_v39 = vpop.f32.mrb[106].mxu0  ;;  %v1472_v40 = vpop.f32.mrb[106].mxu1 }
 0x1cd   : > { %v1583_v41 = vmax.f32 %v1190_v36, 0.0  ;;  %v1193_v42 = vadd.f32 %v4513_v29, %v1192_v39  ;;  %v3461_v43 = vpop.f32.mrb[107].mxu0  ;;  %v1653_v44 = vmax.f32 %v1470_v37, 0.0  ;;  %v1473_v45 = vadd.f32 %v4513_v29, %v1472_v40  ;;  %v3601_v46 = vpop.f32.mrb[107].mxu1 }
 0x1cf   : > { %v3176_v47 = vpack.c.bf16 %v1583_v41, %v1583_v41  ;;  %v1584_v48 = vmax.f32 %v1193_v42, 0.0  ;;  %v3246_v49 = vpack.c.bf16 %v1653_v44, %v1653_v44  ;;  %v1654_v50 = vmax.f32 %v1473_v45, 0.0 }
 0x1d1   : > { %2270 = vst.msk [vmem:[%s4234_s12 + $0xd0] sm:$0xf] %vm2217_vm3, %v3176_v47  ;;  %v3177_v51 = vpack.c.bf16 %v1584_v48, %v1584_v48  ;;  %2340 = vst.msk [vmem:[%s4234_s12 + $0x1e8] sm:$0xf] %vm2217_vm3, %v3246_v49  ;;  %v3247_v52 = vpack.c.bf16 %v1654_v50, %v1654_v50 }
 0x1d2   : > { %v1197_v53 = vpop.f32.mrb[108].mxu0  ;;  %v1477_v54 = vpop.f32.mrb[108].mxu1 }
 0x1d3   : > { %2271 = vst.msk [vmem:[%s4234_s12 + $0xd4] sm:$0xf] %vm2217_vm3, %v3177_v51  ;;  %v1198_v55 = vadd.f32 %v4513_v29, %v1197_v53  ;;  %v3464_v56 = vpop.f32.mrb[109].mxu0  ;;  %2341 = vst.msk [vmem:[%s4234_s12 + $0x1ec] sm:$0xf] %vm2217_vm3, %v3247_v52  ;;  %v1478_v57 = vadd.f32 %v4513_v29, %v1477_v54  ;;  %v3604_v58 = vpop.f32.mrb[109].mxu1 }
 0x1d4   : > { %v1200_v59 = vpop.f32.mrb[110].mxu0  ;;  %v1480_v60 = vpop.f32.mrb[110].mxu1 }
 0x1d5   : > { %v1585_v61 = vmax.f32 %v1198_v55, 0.0  ;;  %v1201_v62 = vadd.f32 %v4513_v29, %v1200_v59  ;;  %v3465_v0 = vpop.f32.mrb[111].mxu0  ;;  %v1655_v2 = vmax.f32 %v1478_v57, 0.0  ;;  %v1481_v3 = vadd.f32 %v4513_v29, %v1480_v60  ;;  %v3605_v4 = vpop.f32.mrb[111].mxu1 }
 0x1d7   : > { %v3178_v5 = vpack.c.bf16 %v1585_v61, %v1585_v61  ;;  %v1586_v6 = vmax.f32 %v1201_v62, 0.0  ;;  %v3248_v7 = vpack.c.bf16 %v1655_v2, %v1655_v2  ;;  %v1656_v8 = vmax.f32 %v1481_v3, 0.0 }
 0x1d9   : > { %2272 = vst.msk [vmem:[%s4234_s12 + $0xd8] sm:$0xf] %vm2217_vm3, %v3178_v5  ;;  %v3179_v9 = vpack.c.bf16 %v1586_v6, %v1586_v6  ;;  %2342 = vst.msk [vmem:[%s4234_s12 + $0x1f0] sm:$0xf] %vm2217_vm3, %v3248_v7  ;;  %v3249_v10 = vpack.c.bf16 %v1656_v8, %v1656_v8 }
 0x1da   : > { %v1205_v11 = vpop.f32.mrb[112].mxu0  ;;  %v1485_v12 = vpop.f32.mrb[112].mxu1 }
 0x1db   : > { %2273 = vst.msk [vmem:[%s4234_s12 + $0xdc] sm:$0xf] %vm2217_vm3, %v3179_v9  ;;  %v1206_v13 = vadd.f32 %v4513_v29, %v1205_v11  ;;  %v3468_v14 = vpop.f32.mrb[113].mxu0  ;;  %2343 = vst.msk [vmem:[%s4234_s12 + $0x1f4] sm:$0xf] %vm2217_vm3, %v3249_v10  ;;  %v1486_v15 = vadd.f32 %v4513_v29, %v1485_v12  ;;  %v3608_v16 = vpop.f32.mrb[113].mxu1 }
 0x1dc   : > { %v1208_v17 = vpop.f32.mrb[114].mxu0  ;;  %v1488_v18 = vpop.f32.mrb[114].mxu1 }
 0x1dd   : > { %v1587_v19 = vmax.f32 %v1206_v13, 0.0  ;;  %v1209_v20 = vadd.f32 %v4513_v29, %v1208_v17  ;;  %v3469_v21 = vpop.f32.mrb[115].mxu0  ;;  %v1657_v22 = vmax.f32 %v1486_v15, 0.0  ;;  %v1489_v23 = vadd.f32 %v4513_v29, %v1488_v18  ;;  %v3609_v24 = vpop.f32.mrb[115].mxu1 }
 0x1df   : > { %v3180_v25 = vpack.c.bf16 %v1587_v19, %v1587_v19  ;;  %v1588_v26 = vmax.f32 %v1209_v20, 0.0  ;;  %v3250_v27 = vpack.c.bf16 %v1657_v22, %v1657_v22  ;;  %v1658_v28 = vmax.f32 %v1489_v23, 0.0 }
 0x1e1   : > { %2274 = vst.msk [vmem:[%s4234_s12 + $0xe0] sm:$0xf] %vm2217_vm3, %v3180_v25  ;;  %v3181_v30 = vpack.c.bf16 %v1588_v26, %v1588_v26  ;;  %2344 = vst.msk [vmem:[%s4234_s12 + $0x1f8] sm:$0xf] %vm2217_vm3, %v3250_v27  ;;  %v3251_v31 = vpack.c.bf16 %v1658_v28, %v1658_v28 }
 0x1e2   : > { %v1213_v32 = vpop.f32.mrb[116].mxu0  ;;  %v1493_v33 = vpop.f32.mrb[116].mxu1 }
 0x1e3   : > { %2275 = vst.msk [vmem:[%s4234_s12 + $0xe4] sm:$0xf] %vm2217_vm3, %v3181_v30  ;;  %v1214_v34 = vadd.f32 %v4513_v29, %v1213_v32  ;;  %v3472_v63 = vpop.f32.mrb[117].mxu0  ;;  %2345 = vst.msk [vmem:[%s4234_s12 + $0x1fc] sm:$0xf] %vm2217_vm3, %v3251_v31  ;;  %v1494_v35 = vadd.f32 %v4513_v29, %v1493_v33  ;;  %v3612_v36 = vpop.f32.mrb[117].mxu1 }
 0x1e4   : > { %v1216_v1 = vpop.f32.mrb[118].mxu0  ;;  %v1496_v37 = vpop.f32.mrb[118].mxu1 }
 0x1e5   : > { %v1589_v38 = vmax.f32 %v1214_v34, 0.0  ;;  %v1217_v39 = vadd.f32 %v4513_v29, %v1216_v1  ;;  %v3473_v40 = vpop.f32.mrb[119].mxu0  ;;  %v1659_v41 = vmax.f32 %v1494_v35, 0.0  ;;  %v1497_v42 = vadd.f32 %v4513_v29, %v1496_v37  ;;  %v3613_v43 = vpop.f32.mrb[119].mxu1 }
 0x1e7   : > { %v3182_v44 = vpack.c.bf16 %v1589_v38, %v1589_v38  ;;  %v1590_v45 = vmax.f32 %v1217_v39, 0.0  ;;  %v3252_v46 = vpack.c.bf16 %v1659_v41, %v1659_v41  ;;  %v1660_v47 = vmax.f32 %v1497_v42, 0.0 }
 0x1e9   : > { %2276 = vst.msk [vmem:[%s4234_s12 + $0xe8] sm:$0xf] %vm2217_vm3, %v3182_v44  ;;  %v3183_v48 = vpack.c.bf16 %v1590_v45, %v1590_v45  ;;  %2346 = vst.msk [vmem:[%s4234_s12 + $0x200] sm:$0xf] %vm2217_vm3, %v3252_v46  ;;  %v3253_v49 = vpack.c.bf16 %v1660_v47, %v1660_v47 }
 0x1ea   : > { %v1221_v50 = vpop.f32.mrb[120].mxu0  ;;  %v1501_v51 = vpop.f32.mrb[120].mxu1 }
 0x1eb   : > { %2277 = vst.msk [vmem:[%s4234_s12 + $0xec] sm:$0xf] %vm2217_vm3, %v3183_v48  ;;  %v1222_v52 = vadd.f32 %v4513_v29, %v1221_v50  ;;  %v3476_v53 = vpop.f32.mrb[121].mxu0  ;;  %2347 = vst.msk [vmem:[%s4234_s12 + $0x204] sm:$0xf] %vm2217_vm3, %v3253_v49  ;;  %v1502_v54 = vadd.f32 %v4513_v29, %v1501_v51  ;;  %v3616_v55 = vpop.f32.mrb[121].mxu1 }
 0x1ec   : > { %v1224_v56 = vpop.f32.mrb[122].mxu0  ;;  %v1504_v57 = vpop.f32.mrb[122].mxu1 }
 0x1ed   : > { %v1591_v58 = vmax.f32 %v1222_v52, 0.0  ;;  %v1225_v59 = vadd.f32 %v4513_v29, %v1224_v56  ;;  %v3477_v60 = vpop.f32.mrb[123].mxu0  ;;  %v1661_v61 = vmax.f32 %v1502_v54, 0.0  ;;  %v1505_v62 = vadd.f32 %v4513_v29, %v1504_v57  ;;  %v3617_v0 = vpop.f32.mrb[123].mxu1 }
 0x1ef   : > { %v3184_v2 = vpack.c.bf16 %v1591_v58, %v1591_v58  ;;  %v1592_v3 = vmax.f32 %v1225_v59, 0.0  ;;  %v3254_v4 = vpack.c.bf16 %v1661_v61, %v1661_v61  ;;  %v1662_v5 = vmax.f32 %v1505_v62, 0.0 }
 0x1f1   : > { %2278 = vst.msk [vmem:[%s4234_s12 + $0xf0] sm:$0xf] %vm2217_vm3, %v3184_v2  ;;  %v3185_v6 = vpack.c.bf16 %v1592_v3, %v1592_v3  ;;  %2348 = vst.msk [vmem:[%s4234_s12 + $0x208] sm:$0xf] %vm2217_vm3, %v3254_v4  ;;  %v3255_v7 = vpack.c.bf16 %v1662_v5, %v1662_v5 }
 0x1f2   : > { %v1229_v8 = vpop.f32.mrb[124].mxu0  ;;  %v1509_v9 = vpop.f32.mrb[124].mxu1 }
 0x1f3   : > { %2279 = vst.msk [vmem:[%s4234_s12 + $0xf4] sm:$0xf] %vm2217_vm3, %v3185_v6  ;;  %v1230_v10 = vadd.f32 %v4513_v29, %v1229_v8  ;;  %v3480_v11 = vpop.f32.mrb[125].mxu0  ;;  %2349 = vst.msk [vmem:[%s4234_s12 + $0x20c] sm:$0xf] %vm2217_vm3, %v3255_v7  ;;  %v1510_v12 = vadd.f32 %v4513_v29, %v1509_v9  ;;  %v3620_v13 = vpop.f32.mrb[125].mxu1 }
 0x1f4   : > { %v1232_v14 = vpop.f32.mrb[126].mxu0  ;;  %v1512_v15 = vpop.f32.mrb[126].mxu1 }
 0x1f5   : > { %v1593_v16 = vmax.f32 %v1230_v10, 0.0  ;;  %v1233_v17 = vadd.f32 %v4513_v29, %v1232_v14  ;;  %v3481_v18 = vpop.f32.mrb[127].mxu0  ;;  %v1663_v19 = vmax.f32 %v1510_v12, 0.0  ;;  %v1513_v20 = vadd.f32 %v4513_v29, %v1512_v15  ;;  %v3621_v21 = vpop.f32.mrb[127].mxu1 }
 0x1f7   : > { %v3186_v22 = vpack.c.bf16 %v1593_v16, %v1593_v16  ;;  %v1594_v23 = vmax.f32 %v1233_v17, 0.0  ;;  %v3256_v24 = vpack.c.bf16 %v1663_v19, %v1663_v19  ;;  %v1664_v25 = vmax.f32 %v1513_v20, 0.0 }
 0x1f9   : > { %2280 = vst.msk [vmem:[%s4234_s12 + $0xf8] sm:$0xf] %vm2217_vm3, %v3186_v22  ;;  %v3187_v26 = vpack.c.bf16 %v1594_v23, %v1594_v23  ;;  %2350 = vst.msk [vmem:[%s4234_s12 + $0x210] sm:$0xf] %vm2217_vm3, %v3256_v24  ;;  %v3257_v27 = vpack.c.bf16 %v1664_v25, %v1664_v25 }
 0x1fa   : > { %v1237_v28 = vpop.f32.mrb[128].mxu0  ;;  %v1517_v30 = vpop.f32.mrb[128].mxu1 }
 0x1fb   : > { %2281 = vst.msk [vmem:[%s4234_s12 + $0xfc] sm:$0xf] %vm2217_vm3, %v3187_v26  ;;  %v1238_v31 = vadd.f32 %v4513_v29, %v1237_v28  ;;  %v3484_v32 = vpop.f32.mrb[129].mxu0  ;;  %2351 = vst.msk [vmem:[%s4234_s12 + $0x214] sm:$0xf] %vm2217_vm3, %v3257_v27  ;;  %v1518_v33 = vadd.f32 %v4513_v29, %v1517_v30  ;;  %v3624_v34 = vpop.f32.mrb[129].mxu1 }
 0x1fc   : > { %v1240_v63 = vpop.f32.mrb[130].mxu0  ;;  %v1520_v35 = vpop.f32.mrb[130].mxu1 }
 0x1fd   : > { %v1595_v36 = vmax.f32 %v1238_v31, 0.0  ;;  %v1241_v1 = vadd.f32 %v4513_v29, %v1240_v63  ;;  %v3485_v37 = vpop.f32.mrb[131].mxu0  ;;  %v1665_v38 = vmax.f32 %v1518_v33, 0.0  ;;  %v1521_v39 = vadd.f32 %v4513_v29, %v1520_v35  ;;  %v3625_v40 = vpop.f32.mrb[131].mxu1 }
 0x1ff   : > { %v3188_v41 = vpack.c.bf16 %v1595_v36, %v1595_v36  ;;  %v1596_v42 = vmax.f32 %v1241_v1, 0.0  ;;  %v3258_v43 = vpack.c.bf16 %v1665_v38, %v1665_v38  ;;  %v1666_v44 = vmax.f32 %v1521_v39, 0.0 }
 0x201   : > { %2282 = vst.msk [vmem:[%s4234_s12 + $0x100] sm:$0xf] %vm2217_vm3, %v3188_v41  ;;  %v3189_v45 = vpack.c.bf16 %v1596_v42, %v1596_v42  ;;  %2352 = vst.msk [vmem:[%s4234_s12 + $0x218] sm:$0xf] %vm2217_vm3, %v3258_v43  ;;  %v3259_v46 = vpack.c.bf16 %v1666_v44, %v1666_v44 }
 0x202   : > { %v1245_v47 = vpop.f32.mrb[132].mxu0  ;;  %v1525_v48 = vpop.f32.mrb[132].mxu1 }
 0x203   : > { %2283 = vst.msk [vmem:[%s4234_s12 + $0x104] sm:$0xf] %vm2217_vm3, %v3189_v45  ;;  %v1246_v49 = vadd.f32 %v4513_v29, %v1245_v47  ;;  %v3488_v50 = vpop.f32.mrb[133].mxu0  ;;  %2353 = vst.msk [vmem:[%s4234_s12 + $0x21c] sm:$0xf] %vm2217_vm3, %v3259_v46  ;;  %v1526_v51 = vadd.f32 %v4513_v29, %v1525_v48  ;;  %v3628_v52 = vpop.f32.mrb[133].mxu1 }
 0x204   : > { %v1248_v53 = vpop.f32.mrb[134].mxu0  ;;  %v1528_v54 = vpop.f32.mrb[134].mxu1 }
 0x205   : > { %v1597_v55 = vmax.f32 %v1246_v49, 0.0  ;;  %v1249_v56 = vadd.f32 %v4513_v29, %v1248_v53  ;;  %v3489_v57 = vpop.f32.mrb[135].mxu0  ;;  %v1667_v58 = vmax.f32 %v1526_v51, 0.0  ;;  %v3629_v59 = vpop.f32.mrb[135].mxu1 }
 0x207   : > { %v3190_v60 = vpack.c.bf16 %v1597_v55, %v1597_v55  ;;  %v1598_v61 = vmax.f32 %v1249_v56, 0.0  ;;  %v3260_v62 = vpack.c.bf16 %v1667_v58, %v1667_v58 }
 0x209   : > { %2284 = vst.msk [vmem:[%s4234_s12 + $0x108] sm:$0xf] %vm2217_vm3, %v3190_v60  ;;  %v3191_v0 = vpack.c.bf16 %v1598_v61, %v1598_v61  ;;  %2354 = vst.msk [vmem:[%s4234_s12 + $0x220] sm:$0xf] %vm2217_vm3, %v3260_v62 }
 0x20a   : > { %v1253_v2 = vpop.f32.mrb[136].mxu0 }
 0x20b   : > { %2285 = vst.msk [vmem:[%s4234_s12 + $0x10c] sm:$0xf] %vm2217_vm3, %v3191_v0  ;;  %v1254_v3 = vadd.f32 %v4513_v29, %v1253_v2  ;;  %v3492_v4 = vpop.f32.mrb[137].mxu0 }
 0x20c   : > { %v1256_v5 = vpop.f32.mrb[138].mxu0 }
 0x20d   : > { %v1599_v6 = vmax.f32 %v1254_v3, 0.0  ;;  %v1257_v7 = vadd.f32 %v4513_v29, %v1256_v5  ;;  %v3493_v8 = vpop.f32.mrb[139].mxu0  ;;  %2361 = sbr.rel (!%p3947_p4) target bundleno = 623 (0x26f), region = 36 }
 0x20f   : > { %v3192_v9 = vpack.c.bf16 %v1599_v6, %v1599_v6  ;;  %v1600_v10 = vmax.f32 %v1257_v7, 0.0 }
 0x211   : > { %2286 = vst.msk [vmem:[%s4234_s12 + $0x110] sm:$0xf] %vm2217_vm3, %v3192_v9  ;;  %v3193_v11 = vpack.c.bf16 %v1600_v10, %v1600_v10 }
 0x213   : > { %2287 = vst.msk [vmem:[%s4234_s12 + $0x114] sm:$0xf] %vm2217_vm3, %v3193_v11 }
 0x214   : > { %s4907_s27 = smov (!%p2364_p8, %s2363_s27), 137 }
 0x215   : > { %s3109_s5 = sshll.u32 %s4907_s27, 6 }
 0x216   : > { %p3112_p9 = scmp.eq.s32.totalorder %s3109_s5, 0 }
 0x217   : > { %s4709_s6 = sshrl.u32 (!%p3112_p9), %s4907_s27, 6 }
 0x218   : > { %2372 = sbr.rel (%p3112_p9) target bundleno = 623 (0x26f), region = 40  ;;  %p3113_p10 = scmp.le.s32.totalorder (!%p3112_p9), %s4709_s6, 0 }
 0x21f   : > { %2777 = sbr.rel (%p3113_p10) target bundleno = 602 (0x25a), region = 112  ;;  %s4900_s15 = smov (!%p3113_p10), %s4703_s4 }
 0x220   : > { %s4901_s20 = smov (!%p3113_p10), %s4234_s12  ;;  %s4718_s25 = smov (!%p3113_p10), 0  }
 0x221   : > { %s4720_s7 = smov (!%p3113_p10), 0  }
 0x226 LB: >> { %v2388_v29 = vld [vmem:[%s3874_s20] sm:$0xf]  ;;  %v2390_v12 = vld [vmem:[%s3874_s20 + $0x4] sm:$0xf]  ;;  %v2392_v13 = vld [vmem:[%s3874_s20 + $0x8] sm:$0xf]  ;;  %s3882_s7 = sphi %s4720_s7, %s2382_s7   ;;  %s3878_s25 = sphi %s4718_s25, %s4902_s25   ;;  %s3874_s20 = sphi %s4901_s20, %s2521_s20   ;;  %s3870_s15 = sphi %s4900_s15, %s2522_s15  }
 0x227   : >> { %2389 = vst [vmem:[%s3870_s15] sm:$0xf] %v2388_v29  ;;  %2391 = vst [vmem:[%s3870_s15 + $0x4] sm:$0xf] %v2390_v12  ;;  %v2394_v14 = vld [vmem:[%s3874_s20 + $0xc] sm:$0xf]  ;;  %s2516_s8 = sadd.s32 1, %s3878_s25 }
 0x228   : >> { %2393 = vst [vmem:[%s3870_s15 + $0x8] sm:$0xf] %v2392_v13  ;;  %v2396_v15 = vld [vmem:[%s3874_s20 + $0x10] sm:$0xf]  ;;  %v2398_v16 = vld [vmem:[%s3874_s20 + $0x14] sm:$0xf]  ;;  %p2517_p11 = scmp.ge.s32.totalorder %s2516_s8, %s4709_s6 }
 0x229   : >> { %2395 = vst [vmem:[%s3870_s15 + $0xc] sm:$0xf] %v2394_v14  ;;  %2397 = vst [vmem:[%s3870_s15 + $0x10] sm:$0xf] %v2396_v15  ;;  %v2400_v17 = vld [vmem:[%s3874_s20 + $0x18] sm:$0xf] }
 0x22a   : >> { %2399 = vst [vmem:[%s3870_s15 + $0x14] sm:$0xf] %v2398_v16  ;;  %v2402_v18 = vld [vmem:[%s3874_s20 + $0x1c] sm:$0xf]  ;;  %v2404_v19 = vld [vmem:[%s3874_s20 + $0x20] sm:$0xf] }
 0x22b   : >> { %2401 = vst [vmem:[%s3870_s15 + $0x18] sm:$0xf] %v2400_v17  ;;  %2403 = vst [vmem:[%s3870_s15 + $0x1c] sm:$0xf] %v2402_v18  ;;  %v2406_v20 = vld [vmem:[%s3874_s20 + $0x24] sm:$0xf] }
 0x22c   : >> { %2405 = vst [vmem:[%s3870_s15 + $0x20] sm:$0xf] %v2404_v19  ;;  %v2408_v21 = vld [vmem:[%s3874_s20 + $0x28] sm:$0xf]  ;;  %v2410_v22 = vld [vmem:[%s3874_s20 + $0x2c] sm:$0xf] }
 0x22d   : >> { %2407 = vst [vmem:[%s3870_s15 + $0x24] sm:$0xf] %v2406_v20  ;;  %2409 = vst [vmem:[%s3870_s15 + $0x28] sm:$0xf] %v2408_v21  ;;  %v2412_v23 = vld [vmem:[%s3874_s20 + $0x30] sm:$0xf] }
 0x22e   : >> { %2411 = vst [vmem:[%s3870_s15 + $0x2c] sm:$0xf] %v2410_v22  ;;  %v2414_v24 = vld [vmem:[%s3874_s20 + $0x34] sm:$0xf]  ;;  %v2416_v25 = vld [vmem:[%s3874_s20 + $0x38] sm:$0xf] }
 0x22f   : >> { %2413 = vst [vmem:[%s3870_s15 + $0x30] sm:$0xf] %v2412_v23  ;;  %2415 = vst [vmem:[%s3870_s15 + $0x34] sm:$0xf] %v2414_v24  ;;  %v2418_v26 = vld [vmem:[%s3874_s20 + $0x3c] sm:$0xf] }
 0x230   : >> { %2417 = vst [vmem:[%s3870_s15 + $0x38] sm:$0xf] %v2416_v25  ;;  %v2420_v27 = vld [vmem:[%s3874_s20 + $0x40] sm:$0xf]  ;;  %v2422_v28 = vld [vmem:[%s3874_s20 + $0x44] sm:$0xf] }
 0x231   : >> { %2419 = vst [vmem:[%s3870_s15 + $0x3c] sm:$0xf] %v2418_v26  ;;  %2421 = vst [vmem:[%s3870_s15 + $0x40] sm:$0xf] %v2420_v27  ;;  %v2424_v30 = vld [vmem:[%s3874_s20 + $0x48] sm:$0xf] }
 0x232   : >> { %2423 = vst [vmem:[%s3870_s15 + $0x44] sm:$0xf] %v2422_v28  ;;  %v2426_v31 = vld [vmem:[%s3874_s20 + $0x4c] sm:$0xf]  ;;  %v2428_v32 = vld [vmem:[%s3874_s20 + $0x50] sm:$0xf] }
 0x233   : >> { %2425 = vst [vmem:[%s3870_s15 + $0x48] sm:$0xf] %v2424_v30  ;;  %2427 = vst [vmem:[%s3870_s15 + $0x4c] sm:$0xf] %v2426_v31  ;;  %v2430_v33 = vld [vmem:[%s3874_s20 + $0x54] sm:$0xf] }
 0x234   : >> { %2429 = vst [vmem:[%s3870_s15 + $0x50] sm:$0xf] %v2428_v32  ;;  %v2432_v34 = vld [vmem:[%s3874_s20 + $0x58] sm:$0xf]  ;;  %v2434_v63 = vld [vmem:[%s3874_s20 + $0x5c] sm:$0xf] }
 0x235   : >> { %2431 = vst [vmem:[%s3870_s15 + $0x54] sm:$0xf] %v2430_v33  ;;  %2433 = vst [vmem:[%s3870_s15 + $0x58] sm:$0xf] %v2432_v34  ;;  %v2436_v35 = vld [vmem:[%s3874_s20 + $0x60] sm:$0xf] }
 0x236   : >> { %2435 = vst [vmem:[%s3870_s15 + $0x5c] sm:$0xf] %v2434_v63  ;;  %v2438_v36 = vld [vmem:[%s3874_s20 + $0x64] sm:$0xf]  ;;  %v2440_v1 = vld [vmem:[%s3874_s20 + $0x68] sm:$0xf] }
 0x237   : >> { %2437 = vst [vmem:[%s3870_s15 + $0x60] sm:$0xf] %v2436_v35  ;;  %2439 = vst [vmem:[%s3870_s15 + $0x64] sm:$0xf] %v2438_v36  ;;  %v2442_v37 = vld [vmem:[%s3874_s20 + $0x6c] sm:$0xf] }
 0x238   : >> { %2441 = vst [vmem:[%s3870_s15 + $0x68] sm:$0xf] %v2440_v1  ;;  %v2444_v38 = vld [vmem:[%s3874_s20 + $0x70] sm:$0xf]  ;;  %v2446_v39 = vld [vmem:[%s3874_s20 + $0x74] sm:$0xf] }
 0x239   : >> { %2443 = vst [vmem:[%s3870_s15 + $0x6c] sm:$0xf] %v2442_v37  ;;  %2445 = vst [vmem:[%s3870_s15 + $0x70] sm:$0xf] %v2444_v38  ;;  %v2448_v40 = vld [vmem:[%s3874_s20 + $0x78] sm:$0xf] }
 0x23a   : >> { %2447 = vst [vmem:[%s3870_s15 + $0x74] sm:$0xf] %v2446_v39  ;;  %v2450_v41 = vld [vmem:[%s3874_s20 + $0x7c] sm:$0xf]  ;;  %v2452_v42 = vld [vmem:[%s3874_s20 + $0x80] sm:$0xf] }
 0x23b   : >> { %2449 = vst [vmem:[%s3870_s15 + $0x78] sm:$0xf] %v2448_v40  ;;  %2451 = vst [vmem:[%s3870_s15 + $0x7c] sm:$0xf] %v2450_v41  ;;  %v2454_v43 = vld [vmem:[%s3874_s20 + $0x84] sm:$0xf] }
 0x23c   : >> { %2453 = vst [vmem:[%s3870_s15 + $0x80] sm:$0xf] %v2452_v42  ;;  %v2456_v44 = vld [vmem:[%s3874_s20 + $0x88] sm:$0xf]  ;;  %v2458_v45 = vld [vmem:[%s3874_s20 + $0x8c] sm:$0xf] }
 0x23d   : >> { %2455 = vst [vmem:[%s3870_s15 + $0x84] sm:$0xf] %v2454_v43  ;;  %2457 = vst [vmem:[%s3870_s15 + $0x88] sm:$0xf] %v2456_v44  ;;  %v2460_v46 = vld [vmem:[%s3874_s20 + $0x90] sm:$0xf] }
 0x23e   : >> { %2459 = vst [vmem:[%s3870_s15 + $0x8c] sm:$0xf] %v2458_v45  ;;  %v2462_v47 = vld [vmem:[%s3874_s20 + $0x94] sm:$0xf]  ;;  %v2464_v48 = vld [vmem:[%s3874_s20 + $0x98] sm:$0xf] }
 0x23f   : >> { %2461 = vst [vmem:[%s3870_s15 + $0x90] sm:$0xf] %v2460_v46  ;;  %2463 = vst [vmem:[%s3870_s15 + $0x94] sm:$0xf] %v2462_v47  ;;  %v2466_v49 = vld [vmem:[%s3874_s20 + $0x9c] sm:$0xf] }
 0x240   : >> { %2465 = vst [vmem:[%s3870_s15 + $0x98] sm:$0xf] %v2464_v48  ;;  %v2468_v50 = vld [vmem:[%s3874_s20 + $0xa0] sm:$0xf]  ;;  %v2470_v51 = vld [vmem:[%s3874_s20 + $0xa4] sm:$0xf] }
 0x241   : >> { %2467 = vst [vmem:[%s3870_s15 + $0x9c] sm:$0xf] %v2466_v49  ;;  %2469 = vst [vmem:[%s3870_s15 + $0xa0] sm:$0xf] %v2468_v50  ;;  %v2472_v52 = vld [vmem:[%s3874_s20 + $0xa8] sm:$0xf] }
 0x242   : >> { %2471 = vst [vmem:[%s3870_s15 + $0xa4] sm:$0xf] %v2470_v51  ;;  %v2474_v53 = vld [vmem:[%s3874_s20 + $0xac] sm:$0xf]  ;;  %v2476_v54 = vld [vmem:[%s3874_s20 + $0xb0] sm:$0xf] }
 0x243   : >> { %2473 = vst [vmem:[%s3870_s15 + $0xa8] sm:$0xf] %v2472_v52  ;;  %2475 = vst [vmem:[%s3870_s15 + $0xac] sm:$0xf] %v2474_v53  ;;  %v2478_v55 = vld [vmem:[%s3874_s20 + $0xb4] sm:$0xf] }
 0x244   : >> { %2477 = vst [vmem:[%s3870_s15 + $0xb0] sm:$0xf] %v2476_v54  ;;  %v2480_v56 = vld [vmem:[%s3874_s20 + $0xb8] sm:$0xf]  ;;  %v2482_v57 = vld [vmem:[%s3874_s20 + $0xbc] sm:$0xf] }
 0x245   : >> { %2479 = vst [vmem:[%s3870_s15 + $0xb4] sm:$0xf] %v2478_v55  ;;  %2481 = vst [vmem:[%s3870_s15 + $0xb8] sm:$0xf] %v2480_v56  ;;  %v2484_v58 = vld [vmem:[%s3874_s20 + $0xc0] sm:$0xf] }
 0x246   : >> { %2483 = vst [vmem:[%s3870_s15 + $0xbc] sm:$0xf] %v2482_v57  ;;  %v2486_v59 = vld [vmem:[%s3874_s20 + $0xc4] sm:$0xf]  ;;  %v2488_v60 = vld [vmem:[%s3874_s20 + $0xc8] sm:$0xf] }
 0x247   : >> { %2485 = vst [vmem:[%s3870_s15 + $0xc0] sm:$0xf] %v2484_v58  ;;  %2487 = vst [vmem:[%s3870_s15 + $0xc4] sm:$0xf] %v2486_v59  ;;  %v2490_v61 = vld [vmem:[%s3874_s20 + $0xcc] sm:$0xf] }
 0x248   : >> { %2489 = vst [vmem:[%s3870_s15 + $0xc8] sm:$0xf] %v2488_v60  ;;  %v2492_v62 = vld [vmem:[%s3874_s20 + $0xd0] sm:$0xf]  ;;  %v2494_v0 = vld [vmem:[%s3874_s20 + $0xd4] sm:$0xf] }
 0x249   : >> { %2491 = vst [vmem:[%s3870_s15 + $0xcc] sm:$0xf] %v2490_v61  ;;  %2493 = vst [vmem:[%s3870_s15 + $0xd0] sm:$0xf] %v2492_v62  ;;  %v2496_v2 = vld [vmem:[%s3874_s20 + $0xd8] sm:$0xf] }
 0x24a   : >> { %2495 = vst [vmem:[%s3870_s15 + $0xd4] sm:$0xf] %v2494_v0  ;;  %v2498_v3 = vld [vmem:[%s3874_s20 + $0xdc] sm:$0xf]  ;;  %v2500_v4 = vld [vmem:[%s3874_s20 + $0xe0] sm:$0xf] }
 0x24b   : >> { %2497 = vst [vmem:[%s3870_s15 + $0xd8] sm:$0xf] %v2496_v2  ;;  %2499 = vst [vmem:[%s3870_s15 + $0xdc] sm:$0xf] %v2498_v3  ;;  %v2502_v5 = vld [vmem:[%s3874_s20 + $0xe4] sm:$0xf] }
 0x24c   : >> { %2501 = vst [vmem:[%s3870_s15 + $0xe0] sm:$0xf] %v2500_v4  ;;  %v2504_v6 = vld [vmem:[%s3874_s20 + $0xe8] sm:$0xf]  ;;  %v2506_v7 = vld [vmem:[%s3874_s20 + $0xec] sm:$0xf] }
 0x24d   : >> { %2503 = vst [vmem:[%s3870_s15 + $0xe4] sm:$0xf] %v2502_v5  ;;  %2505 = vst [vmem:[%s3870_s15 + $0xe8] sm:$0xf] %v2504_v6  ;;  %v2508_v8 = vld [vmem:[%s3874_s20 + $0xf0] sm:$0xf] }
 0x24e   : >> { %2507 = vst [vmem:[%s3870_s15 + $0xec] sm:$0xf] %v2506_v7  ;;  %v2510_v9 = vld [vmem:[%s3874_s20 + $0xf4] sm:$0xf]  ;;  %v2512_v10 = vld [vmem:[%s3874_s20 + $0xf8] sm:$0xf] }
 0x24f   : >> { %2509 = vst [vmem:[%s3870_s15 + $0xf0] sm:$0xf] %v2508_v8  ;;  %2511 = vst [vmem:[%s3870_s15 + $0xf4] sm:$0xf] %v2510_v9  ;;  %v2514_v11 = vld [vmem:[%s3874_s20 + $0xfc] sm:$0xf] }
 0x250   : >> { %2513 = vst [vmem:[%s3870_s15 + $0xf8] sm:$0xf] %v2512_v10  ;;  %2515 = vst [vmem:[%s3870_s15 + $0xfc] sm:$0xf] %v2514_v11  ;;  %s4909_s8 = smov (%p2517_p11, %s2516_s8), 0  ;;  %s2382_s7 = sadd.s32 1, %s3882_s7  }
 0x251   : >> { %s3114_s9 = sshll.u32 %s4909_s8, 8  ;;  %p2381_p12 = scmp.ge.s32.totalorder %s2382_s7, %s4709_s6 }
 0x252   : >> { %s2521_s20 = scalar_lea.vmem %s4234_s12, %s3114_s9 [#allocation2]   ;;  %s2522_s15 = scalar_lea.vmem %s4703_s4, %s3114_s9  }
 0x253   : >> { %s4902_s25 = smov %s4909_s8  ;;  %2384 = sbr.rel (!%p2381_p12) target bundleno = 550 (0x226), region = 118 }
 0x25a PF: > { %s4877_s10 = sand.u32 63, %s4907_s27   ;;  %s3262_s11 = sshll.u32 %s4709_s6, 8 }
 0x25b   : > { %s2527_s14 = scalar_lea.vmem %s4234_s12, %s3262_s11 [#allocation2]   ;;  %s2529_s17 = scalar_lea.vmem %s4703_s4, %s3262_s11  }
 0x25c   : > { %p3119_p13 = scmp.le.s32.totalorder %s4877_s10, 0 }
 0x25d   : > { %s3884_s18 = smov (!%p3119_p13), %s2529_s17   ;;  %s3888_s21 = smov (!%p3119_p13), %s2527_s14  }
 0x25e   : > { %2791 = sbr.rel (%p3119_p13) target bundleno = 623 (0x26f), region = 123  ;;  %s3892_s22 = smov (!%p3119_p13), 0  }
 0x25f   : > { %s3896_s23 = smov (!%p3119_p13), 0  }
 0x265 LB: >> { %v2539_v29 = vld [vmem:[%s3890_s21] sm:$0xf]  ;;  %s2541_s24 = sadd.s32 1, %s3894_s22  ;;  %s2533_s23 = sadd.s32 1, %s3898_s23   ;;  %s3898_s23 = sphi %s3896_s23, %s2533_s23   ;;  %s3894_s22 = sphi %s3892_s22, %s3893_s22   ;;  %s3890_s21 = sphi %s3888_s21, %s2546_s21   ;;  %s3886_s18 = sphi %s3884_s18, %s2547_s18  }
 0x266   : >> { %2540 = vst [vmem:[%s3886_s18] sm:$0xf] %v2539_v29  ;;  %p2542_p0 = scmp.ge.s32.totalorder %s2541_s24, %s4877_s10  ;;  %p2532_p1 = scmp.ge.s32.totalorder %s2533_s23, %s4877_s10 }
 0x268   : >> { %s4911_s24 = smov (%p2542_p0, %s2541_s24), 0  ;;  %2535 = sbr.rel (!%p2532_p1) target bundleno = 613 (0x265), region = 129 }
 0x269   : >> { %s3120_s12 = sshll.u32 %s4911_s24, 2  ;;  %s3893_s22 = smov %s4911_s24  }
 0x26a   : >> { %s2546_s21 = scalar_lea.vmem %s2527_s14, %s3120_s12 [#allocation2]   ;;  %s2547_s18 = scalar_lea.vmem %s2529_s17, %s3120_s12  }
 0x26f PF: > { %p10_p2 = scmp.ge.s32.totalorder %s3937_s16, 4   ;;  %s4903_s12 = smov %s3862_s13 }
 0x270   : > { %s4904_s13 = smov %s3945_s19  ;;  %s4905_s14 = smov %s3937_s16 }
 0x271   :  { %12 = sbr.rel (!%p10_p2) target bundleno = 2 (0x2), region = 140 }

// kernel: cnn_forward.4
= control target key start
LH: loop header
LB: loop body
LE: loop exit
PB: predicated region body
PF: predicated region fallthrough
CT: control target
= control target key end

     0   :  { %vm384_vm0 = vcmask 257024   ;;  %vm397_vm1 = vcmask 253952   ;;  %s746_s1 = inlined_call_operand.vmem [shape: bf16[256,32], index: 1, kind: input, shape index: {}]   ;;  %s747_s0 = inlined_call_operand.vmem [shape: bf16[98,256], index: 0, kind: input, shape index: {}]   ;;  %s748_s2 = inlined_call_operand.vmem [shape: f32[1,32], index: 2, kind: input, shape index: {}]   ;;  %s749_s3 = inlined_call_operand.vmem [shape: bf16[98,32], index: 3, kind: output, shape index: {}]  }
   0x1   :  { %v534_v0 = vld [vmem:[%s746_s1 + $0x40] sm:$0xff]   ;;  %v536_v2 = vld [vmem:[%s746_s1 + $0x48] sm:$0xff]   ;;  %v538_v4 = vld [vmem:[%s746_s1 + $0x50] sm:$0xff]  }
   0x2   :  { %v535_v1 = vld [vmem:[%s746_s1] sm:$0xff]   ;;  %460 = vmatprep.subr.bf16.mxu0 %v534_v0  ;;  %518 = vmatprep.subr.bf16.mxu1 %v534_v0  ;;  %v537_v3 = vld [vmem:[%s746_s1 + $0x8] sm:$0xff]   ;;  %v539_v5 = vld [vmem:[%s746_s1 + $0x10] sm:$0xff]  }
   0x3   :  { %461 = vmatpush3.bf16.msra.mxu0 %v535_v1  ;;  %526 = vmatpush3.bf16.msra.mxu1 %v535_v1  ;;  %v540_v6 = vld [vmem:[%s746_s1 + $0x58] sm:$0xff]   ;;  %v542_v8 = vld [vmem:[%s746_s1 + $0x60] sm:$0xff]   ;;  %v544_v10 = vld [vmem:[%s746_s1 + $0x68] sm:$0xff]  }
   0x4   :  { %462 = vmatprep.subr.bf16.mxu0 %v536_v2  ;;  %519 = vmatprep.subr.bf16.mxu1 %v536_v2  ;;  %v541_v7 = vld [vmem:[%s746_s1 + $0x18] sm:$0xff]   ;;  %v543_v9 = vld [vmem:[%s746_s1 + $0x20] sm:$0xff]   ;;  %v545_v13 = vld [vmem:[%s746_s1 + $0x28] sm:$0xff]  }
   0x5   :  { %v552_v11 = vld [vmem:[%s747_s0 + $0x4] ss:$8 sps:$4 sm:$0xff]   ;;  %v546_v14 = vld [vmem:[%s746_s1 + $0x70] sm:$0xff]   ;;  %v548_v16 = vld [vmem:[%s746_s1 + $0x78] sm:$0xff]  }
   0x6   :  { %v555_v12 = vld [vmem:[%s747_s0 + $0x44] ss:$8 sps:$4 sm:$0xff]   ;;  %262 = vmatprep.mubr.bf16.mxu0 %v552_v11  ;;  %v547_v15 = vld [vmem:[%s746_s1 + $0x30] sm:$0xff]   ;;  %v549_v17 = vld [vmem:[%s746_s1 + $0x38] sm:$0xff]  }
   0x7   :  { %463 = vmatpush3.bf16.msra.mxu0 %v537_v3  ;;  %527 = vmatpush3.bf16.msra.mxu1 %v537_v3  ;;  %v550_v18 = vld [vmem:[%s747_s0] ss:$8 sps:$4 sm:$0xff]   ;;  %v556_v20 = vld [vmem:[%s747_s0 + $0x14] ss:$8 sps:$4 sm:$0xff]   ;;  %v558_v23 = vld [vmem:[%s747_s0 + $0x10] ss:$8 sps:$4 sm:$0xff]  }
   0x8   :  { %464 = vmatprep.subr.bf16.mxu0 %v538_v4  ;;  %520 = vmatprep.subr.bf16.mxu1 %v538_v4  ;;  %v553_v19 = vld [vmem:[%s747_s0 + $0x40] ss:$8 sps:$4 sm:$0xff]   ;;  %v559_v21 = vld [vmem:[%s747_s0 + $0x54] ss:$8 sps:$4 sm:$0xff]   ;;  %v563_v24 = vld [vmem:[%s747_s0 + $0x50] ss:$8 sps:$4 sm:$0xff]  }
   0x9   :  { %294 = vmatprep.mubr.bf16.mxu1 %v555_v12  ;;  %v27_v22 = vld [vmem:[%s747_s0 + $0x60] sm:$0x11]  ;;  %v566_v29 = vld [vmem:[%s747_s0 + $0x34] ss:$8 sps:$4 sm:$0xff]   ;;  %v569_v30 = vld [vmem:[%s747_s0 + $0x30] ss:$8 sps:$4 sm:$0xff]  }
   0xa   :  { %v561_v25 = vld [vmem:[%s747_s0 + $0x24] ss:$8 sps:$4 sm:$0xff]   ;;  %v417_v26 = vcombine.high %v27_v22, %v27_v22  ;;  %v564_v27 = vld [vmem:[%s747_s0 + $0x20] ss:$8 sps:$4 sm:$0xff]   ;;  %v416_v28 = vcombine.low %v27_v22, %v27_v22 }
   0xb   :  { %465 = vmatpush3.bf16.msra.mxu0 %v539_v5  ;;  %528 = vmatpush3.bf16.msra.mxu1 %v539_v5  ;;  %v680_v33 = vld [vmem:[%s748_s2] ss:$0 sm:$0xff] }
   0xc   :  { %466 = vmatprep.subr.bf16.mxu0 %v540_v6  ;;  %521 = vmatprep.subr.bf16.mxu1 %v540_v6 }
   0xf   :  { %467 = vmatpush3.bf16.msra.mxu0 %v541_v7  ;;  %529 = vmatpush3.bf16.msra.mxu1 %v541_v7 }
  0x10   :  { %468 = vmatprep.subr.bf16.mxu0 %v542_v8  ;;  %522 = vmatprep.subr.bf16.mxu1 %v542_v8 }
  0x13   :  { %469 = vmatpush3.bf16.msra.mxu0 %v543_v9  ;;  %530 = vmatpush3.bf16.msra.mxu1 %v543_v9 }
  0x14   :  { %470 = vmatprep.subr.bf16.mxu0 %v544_v10  ;;  %523 = vmatprep.subr.bf16.mxu1 %v544_v10 }
  0x17   :  { %471 = vmatpush3.bf16.msra.mxu0 %v545_v13  ;;  %531 = vmatpush3.bf16.msra.mxu1 %v545_v13 }
  0x18   :  { %472 = vmatprep.subr.bf16.mxu0 %v546_v14  ;;  %524 = vmatprep.subr.bf16.mxu1 %v546_v14 }
  0x1b   :  { %473 = vmatpush3.bf16.msra.mxu0 %v547_v15  ;;  %532 = vmatpush3.bf16.msra.mxu1 %v547_v15 }
  0x1c   :  { %474 = vmatprep.subr.bf16.mxu0 %v548_v16  ;;  %525 = vmatprep.subr.bf16.mxu1 %v548_v16 }
  0x1f   :  { %475 = vmatpush3.bf16.msra.mxu0 %v549_v17  ;;  %533 = vmatpush3.bf16.msra.mxu1 %v549_v17 }
  0x22   :  { %263 = vmatmul.mubr.bf16.vlgmr.msra.gmra.mrb[0].mxu0 %v550_v18  ;;  %295 = vmatmul.mubr.bf16.vlgmr.msra.gmra.mrb[0].mxu1 %v553_v19 }
  0x23   :  { %270 = vmatprep.mubr.bf16.mxu0 %v556_v20  ;;  %302 = vmatprep.mubr.bf16.mxu1 %v559_v21 }
  0x2a   :  { %271 = vmatmul.mubr.bf16.gmra.mrb[4].mxu0 %v558_v23  ;;  %303 = vmatmul.mubr.bf16.gmra.mrb[4].mxu1 %v563_v24 }
  0x2b   :  { %278 = vmatprep.mubr.bf16.mxu0 %v561_v25  ;;  %310 = vmatprep.mubr.bf16.mxu1 %v417_v26 }
  0x32   :  { %279 = vmatmul.mubr.bf16.gmra.mrb[8].mxu0 %v564_v27  ;;  %311 = vmatmul.mubr.bf16.gmra.mrb[8].mxu1 %v416_v28 }
  0x33   :  { %286 = vmatprep.mubr.bf16.mxu0 %v566_v29 }
  0x3a   :  { %287 = vmatmul.mubr.bf16.gmra.mrb[12].mxu0 %v569_v30 }
  0xf5   :  { %v476_v31 = vpop.f32.mrb[0].mxu0  ;;  %v500_v32 = vpop.f32.mrb[0].mxu1 }
  0xf6   :  { %v477_v34 = vpop.f32.mrb[1].mxu0  ;;  %v501_v35 = vpop.f32.mrb[1].mxu1 }
  0xf7   :  { %v478_v36 = vadd.f32 %v477_v34, %v476_v31  ;;  %v479_v37 = vpop.f32.mrb[2].mxu0  ;;  %v502_v38 = vadd.f32 %v501_v35, %v500_v32  ;;  %v503_v39 = vpop.f32.mrb[2].mxu1 }
  0xf8   :  { %v480_v40 = vpop.f32.mrb[3].mxu0  ;;  %v504_v41 = vpop.f32.mrb[3].mxu1 }
  0xf9   :  { %v265_v42 = vadd.f32 %v478_v36, %v680_v33  ;;  %v481_v43 = vadd.f32 %v480_v40, %v479_v37  ;;  %v297_v44 = vadd.f32 %v502_v38, %v680_v33  ;;  %v505_v45 = vadd.f32 %v504_v41, %v503_v39 }
  0xfb   :  { %v318_v46 = vmax.f32 %v265_v42, 0.0  ;;  %v268_v47 = vadd.f32 %v481_v43, %v680_v33  ;;  %v326_v48 = vmax.f32 %v297_v44, 0.0  ;;  %v300_v49 = vadd.f32 %v505_v45, %v680_v33 }
  0xfd   :  { %v447_v50 = vpack.c.bf16 %v318_v46, %v318_v46  ;;  %v319_v51 = vmax.f32 %v268_v47, 0.0  ;;  %v482_v52 = vpop.f32.mrb[4].mxu0  ;;  %v455_v53 = vpack.c.bf16 %v326_v48, %v326_v48  ;;  %v327_v54 = vmax.f32 %v300_v49, 0.0  ;;  %v506_v55 = vpop.f32.mrb[4].mxu1 }
  0xfe   :  { %v483_v56 = vpop.f32.mrb[5].mxu0  ;;  %v507_v57 = vpop.f32.mrb[5].mxu1 }
  0xff   :  { %385 = vst.msk [vmem:[%s749_s3] sm:$0xf] %vm384_vm0, %v447_v50  ;;  %v448_v58 = vpack.c.bf16 %v319_v51, %v319_v51  ;;  %393 = vst.msk [vmem:[%s749_s3 + $0x20] sm:$0xf] %vm384_vm0, %v455_v53  ;;  %v484_v59 = vadd.f32 %v483_v56, %v482_v52  ;;  %v485_v60 = vpop.f32.mrb[6].mxu0  ;;  %v456_v61 = vpack.c.bf16 %v327_v54, %v327_v54  ;;  %v509_v63 = vpop.f32.mrb[6].mxu1 }
 0x100   :  { %v508_v62 = vadd.f32 %v507_v57, %v506_v55  ;;  %v486_v0 = vpop.f32.mrb[7].mxu0  ;;  %v510_v1 = vpop.f32.mrb[7].mxu1 }
 0x101   :  { %386 = vst.msk [vmem:[%s749_s3 + $0x4] sm:$0xf] %vm384_vm0, %v448_v58  ;;  %v273_v2 = vadd.f32 %v484_v59, %v680_v33  ;;  %394 = vst.msk [vmem:[%s749_s3 + $0x24] sm:$0xf] %vm384_vm0, %v456_v61  ;;  %v487_v3 = vadd.f32 %v486_v0, %v485_v60  ;;  %v511_v5 = vadd.f32 %v510_v1, %v509_v63 }
 0x102   :  { %v305_v4 = vadd.f32 %v508_v62, %v680_v33 }
 0x103   :  { %v320_v6 = vmax.f32 %v273_v2, 0.0  ;;  %v276_v7 = vadd.f32 %v487_v3, %v680_v33  ;;  %v308_v9 = vadd.f32 %v511_v5, %v680_v33 }
 0x104   :  { %v328_v8 = vmax.f32 %v305_v4, 0.0 }
 0x105   :  { %v449_v10 = vpack.c.bf16 %v320_v6, %v320_v6  ;;  %v321_v11 = vmax.f32 %v276_v7, 0.0  ;;  %v488_v12 = vpop.f32.mrb[8].mxu0  ;;  %v329_v14 = vmax.f32 %v308_v9, 0.0  ;;  %v512_v15 = vpop.f32.mrb[8].mxu1 }
 0x106   :  { %v457_v13 = vpack.c.bf16 %v328_v8, %v328_v8  ;;  %v489_v16 = vpop.f32.mrb[9].mxu0  ;;  %v513_v17 = vpop.f32.mrb[9].mxu1 }
 0x107   :  { %387 = vst.msk [vmem:[%s749_s3 + $0x8] sm:$0xf] %vm384_vm0, %v449_v10  ;;  %v450_v18 = vpack.c.bf16 %v321_v11, %v321_v11  ;;  %v490_v19 = vadd.f32 %v489_v16, %v488_v12  ;;  %v491_v20 = vpop.f32.mrb[10].mxu0  ;;  %v458_v21 = vpack.c.bf16 %v329_v14, %v329_v14  ;;  %v514_v22 = vadd.f32 %v513_v17, %v512_v15  ;;  %v515_v23 = vpop.f32.mrb[10].mxu1 }
 0x108   :  { %395 = vst.msk [vmem:[%s749_s3 + $0x28] sm:$0xf] %vm384_vm0, %v457_v13  ;;  %v492_v24 = vpop.f32.mrb[11].mxu0  ;;  %v516_v25 = vpop.f32.mrb[11].mxu1 }
 0x109   :  { %388 = vst.msk [vmem:[%s749_s3 + $0xc] sm:$0xf] %vm384_vm0, %v450_v18  ;;  %v281_v26 = vadd.f32 %v490_v19, %v680_v33  ;;  %396 = vst.msk [vmem:[%s749_s3 + $0x2c] sm:$0xf] %vm384_vm0, %v458_v21  ;;  %v493_v27 = vadd.f32 %v492_v24, %v491_v20  ;;  %v313_v28 = vadd.f32 %v514_v22, %v680_v33 }
 0x10b   :  { %v322_v29 = vmax.f32 %v281_v26, 0.0  ;;  %v284_v30 = vadd.f32 %v493_v27, %v680_v33  ;;  %v330_v31 = vmax.f32 %v313_v28, 0.0 }
 0x10d   :  { %v451_v32 = vpack.c.bf16 %v322_v29, %v322_v29  ;;  %v323_v34 = vmax.f32 %v284_v30, 0.0  ;;  %v494_v35 = vpop.f32.mrb[12].mxu0  ;;  %v459_v36 = vpack.c.bf16 %v330_v31, %v330_v31 }
 0x10e   :  { %v495_v37 = vpop.f32.mrb[13].mxu0 }
 0x10f   :  { %389 = vst.msk [vmem:[%s749_s3 + $0x10] sm:$0xf] %vm384_vm0, %v451_v32  ;;  %v452_v38 = vpack.c.bf16 %v323_v34, %v323_v34  ;;  %v496_v39 = vadd.f32 %v495_v37, %v494_v35  ;;  %v497_v40 = vpop.f32.mrb[14].mxu0 }
 0x110   :  { %398 = vst.msk [vmem:[%s749_s3 + $0x30] sm:$0x1] %vm397_vm1, %v459_v36  ;;  %v498_v41 = vpop.f32.mrb[15].mxu0 }
 0x111   :  { %390 = vst.msk [vmem:[%s749_s3 + $0x14] sm:$0xf] %vm384_vm0, %v452_v38  ;;  %v289_v42 = vadd.f32 %v496_v39, %v680_v33  ;;  %v499_v43 = vadd.f32 %v498_v41, %v497_v40 }
 0x113   :  { %v324_v44 = vmax.f32 %v289_v42, 0.0  ;;  %v292_v45 = vadd.f32 %v499_v43, %v680_v33 }
 0x115   :  { %v453_v46 = vpack.c.bf16 %v324_v44, %v324_v44  ;;  %v325_v47 = vmax.f32 %v292_v45, 0.0 }
 0x117   :  { %391 = vst.msk [vmem:[%s749_s3 + $0x18] sm:$0xf] %vm384_vm0, %v453_v46  ;;  %v454_v48 = vpack.c.bf16 %v325_v47, %v325_v47 }
 0x119   :  { %392 = vst.msk [vmem:[%s749_s3 + $0x1c] sm:$0xf] %vm384_vm0, %v454_v48 }

// kernel: cnn_forward.5
= control target key start
LH: loop header
LB: loop body
LE: loop exit
PB: predicated region body
PF: predicated region fallthrough
CT: control target
= control target key end

     0   :  { %vm1684_vm0 = vmmov 0   ;;  %vm864_vm1 = vcmask 261120   ;;  %vm1262_vm2 = vcmask 64512   ;;  %s2063_s1 = inlined_call_operand.vmem [shape: bf16[1568,128], index: 1, kind: input, shape index: {}]   ;;  %s2064_s0 = inlined_call_operand.vmem [shape: bf16[8,1568], index: 0, kind: input, shape index: {}]   ;;  %s2065_s3 = inlined_call_operand.vmem [shape: bf16[128,8], index: 3, kind: input, shape index: {}]   ;;  %s2066_s2 = inlined_call_operand.vmem [shape: f32[1,128], index: 2, kind: input, shape index: {}]   ;;  %s2067_s4 = inlined_call_operand.vmem [shape: f32[1,8], index: 4, kind: input, shape index: {}]   ;;  %s2068_s5 = inlined_call_operand.vmem [shape: f32[8,8], index: 5, kind: output, shape index: {}]  }
   0x1   :  { %v1564_v0 = vld [vmem:[%s2063_s1 + $0x40] sm:$0xff]   ;;  %v1568_v4 = vld [vmem:[%s2063_s1 + $0x48] sm:$0xff]   ;;  %v1572_v8 = vld [vmem:[%s2063_s1 + $0x50] sm:$0xff]  }
   0x2   :  { %v1565_v1 = vld [vmem:[%s2063_s1] sm:$0xff]   ;;  %1390 = vmatprep.subr.bf16.mxu0 %v1564_v0  ;;  %v1569_v5 = vld [vmem:[%s2063_s1 + $0x8] sm:$0xff]   ;;  %v1573_v9 = vld [vmem:[%s2063_s1 + $0x10] sm:$0xff]  }
   0x3   :  { %v1566_v2 = vld [vmem:[%s2063_s1 + $0xc0] sm:$0xff]   ;;  %1391 = vmatpush3.bf16.msra.mxu0 %v1565_v1  ;;  %v1570_v6 = vld [vmem:[%s2063_s1 + $0xc8] sm:$0xff]   ;;  %v1574_v10 = vld [vmem:[%s2063_s1 + $0xd0] sm:$0xff]  }
   0x4   :  { %v1567_v3 = vld [vmem:[%s2063_s1 + $0x80] sm:$0xff]   ;;  %1412 = vmatprep.subr.bf16.mxu1 %v1566_v2  ;;  %1392 = vmatprep.subr.bf16.mxu0 %v1568_v4  ;;  %v1571_v7 = vld [vmem:[%s2063_s1 + $0x88] sm:$0xff]   ;;  %v1575_v11 = vld [vmem:[%s2063_s1 + $0x90] sm:$0xff]  }
   0x5   :  { %1413 = vmatpush3.bf16.msra.mxu1 %v1567_v3  ;;  %v1576_v12 = vld [vmem:[%s2063_s1 + $0x58] sm:$0xff]   ;;  %v1580_v16 = vld [vmem:[%s2063_s1 + $0x60] sm:$0xff]   ;;  %v1584_v20 = vld [vmem:[%s2063_s1 + $0x68] sm:$0xff]  }
   0x6   :  { %1414 = vmatprep.subr.bf16.mxu1 %v1570_v6  ;;  %v1577_v13 = vld [vmem:[%s2063_s1 + $0x18] sm:$0xff]   ;;  %v1581_v17 = vld [vmem:[%s2063_s1 + $0x20] sm:$0xff]   ;;  %v1585_v21 = vld [vmem:[%s2063_s1 + $0x28] sm:$0xff]  }
   0x7   :  { %1393 = vmatpush3.bf16.msra.mxu0 %v1569_v5  ;;  %v1578_v14 = vld [vmem:[%s2063_s1 + $0xd8] sm:$0xff]   ;;  %v1582_v18 = vld [vmem:[%s2063_s1 + $0xe0] sm:$0xff]   ;;  %v1586_v22 = vld [vmem:[%s2063_s1 + $0xe8] sm:$0xff]  }
   0x8   :  { %1394 = vmatprep.subr.bf16.mxu0 %v1572_v8  ;;  %v1579_v15 = vld [vmem:[%s2063_s1 + $0x98] sm:$0xff]   ;;  %v1583_v19 = vld [vmem:[%s2063_s1 + $0xa0] sm:$0xff]   ;;  %v1587_v23 = vld [vmem:[%s2063_s1 + $0xa8] sm:$0xff]  }
   0x9   :  { %1415 = vmatpush3.bf16.msra.mxu1 %v1571_v7  ;;  %v1588_v24 = vld [vmem:[%s2063_s1 + $0x70] sm:$0xff]   ;;  %v1592_v28 = vld [vmem:[%s2063_s1 + $0x78] sm:$0xff]   ;;  %v21_v32 = vld [vmem:[%s2064_s0] sm:$0xff] }
   0xa   :  { %1416 = vmatprep.subr.bf16.mxu1 %v1574_v10  ;;  %v1589_v25 = vld [vmem:[%s2063_s1 + $0x30] sm:$0xff]   ;;  %v1593_v29 = vld [vmem:[%s2063_s1 + $0x38] sm:$0xff]   ;;  %v1269_v33 = vcombine.low %v21_v32, %v21_v32  ;;  %v1270_v34 = vcombine.high %v21_v32, %v21_v32  ;;  %v1598_v35 = vld [vmem:[%s2063_s1 + $0x140] sm:$0xff]  }
   0xb   :  { %1395 = vmatpush3.bf16.msra.mxu0 %v1573_v9  ;;  %v1590_v26 = vld [vmem:[%s2063_s1 + $0xf0] sm:$0xff]   ;;  %v1594_v30 = vld [vmem:[%s2063_s1 + $0xf8] sm:$0xff]   ;;  %v22_v36 = vld [vmem:[%s2064_s0 + $0x8] sm:$0xff] }
   0xc   :  { %1396 = vmatprep.subr.bf16.mxu0 %v1576_v12  ;;  %v1591_v27 = vld [vmem:[%s2063_s1 + $0xb0] sm:$0xff]   ;;  %v1595_v31 = vld [vmem:[%s2063_s1 + $0xb8] sm:$0xff]   ;;  %v1271_v37 = vcombine.low %v22_v36, %v22_v36  ;;  %v1272_v38 = vcombine.high %v22_v36, %v22_v36  ;;  %v1601_v39 = vld [vmem:[%s2063_s1 + $0x100] sm:$0xff]   ;;  %900 = vmatprep.mubr.bf16.mxu0 %v1270_v34 }
   0xd   :  { %1417 = vmatpush3.bf16.msra.mxu1 %v1575_v11  ;;  %v1602_v40 = vld [vmem:[%s2063_s1 + $0x1c0] sm:$0xff]   ;;  %v1604_v42 = vld [vmem:[%s2063_s1 + $0x148] sm:$0xff]   ;;  %v1608_v46 = vld [vmem:[%s2063_s1 + $0x150] sm:$0xff]  }
   0xe   :  { %1418 = vmatprep.subr.bf16.mxu1 %v1578_v14  ;;  %940 = vmatprep.mubr.bf16.mxu1 %v1272_v38  ;;  %v1603_v41 = vld [vmem:[%s2063_s1 + $0x180] sm:$0xff]   ;;  %v1605_v43 = vld [vmem:[%s2063_s1 + $0x108] sm:$0xff]   ;;  %v1609_v47 = vld [vmem:[%s2063_s1 + $0x110] sm:$0xff]  }
   0xf   :  { %1397 = vmatpush3.bf16.msra.mxu0 %v1577_v13  ;;  %v1606_v44 = vld [vmem:[%s2063_s1 + $0x1c8] sm:$0xff]   ;;  %v1610_v48 = vld [vmem:[%s2063_s1 + $0x1d0] sm:$0xff]   ;;  %v1612_v50 = vld [vmem:[%s2063_s1 + $0x158] sm:$0xff]  }
  0x10   :  { %1398 = vmatprep.subr.bf16.mxu0 %v1580_v16  ;;  %v1607_v45 = vld [vmem:[%s2063_s1 + $0x188] sm:$0xff]   ;;  %v1611_v49 = vld [vmem:[%s2063_s1 + $0x190] sm:$0xff]   ;;  %v1613_v51 = vld [vmem:[%s2063_s1 + $0x118] sm:$0xff]  }
  0x11   :  { %1419 = vmatpush3.bf16.msra.mxu1 %v1579_v15  ;;  %v1614_v52 = vld [vmem:[%s2063_s1 + $0x1d8] sm:$0xff]   ;;  %v1616_v54 = vld [vmem:[%s2063_s1 + $0x160] sm:$0xff]   ;;  %v1620_v58 = vld [vmem:[%s2063_s1 + $0x168] sm:$0xff]  }
  0x12   :  { %1420 = vmatprep.subr.bf16.mxu1 %v1582_v18  ;;  %v1615_v53 = vld [vmem:[%s2063_s1 + $0x198] sm:$0xff]   ;;  %v1617_v55 = vld [vmem:[%s2063_s1 + $0x120] sm:$0xff]   ;;  %v1621_v59 = vld [vmem:[%s2063_s1 + $0x128] sm:$0xff]  }
  0x13   :  { %1399 = vmatpush3.bf16.msra.mxu0 %v1581_v17  ;;  %v1618_v56 = vld [vmem:[%s2063_s1 + $0x1e0] sm:$0xff]   ;;  %v1622_v60 = vld [vmem:[%s2063_s1 + $0x1e8] sm:$0xff]   ;;  %v1624_v62 = vld [vmem:[%s2063_s1 + $0x170] sm:$0xff]  }
  0x14   :  { %1400 = vmatprep.subr.bf16.mxu0 %v1584_v20  ;;  %v1619_v57 = vld [vmem:[%s2063_s1 + $0x1a0] sm:$0xff]   ;;  %v1623_v61 = vld [vmem:[%s2063_s1 + $0x1a8] sm:$0xff]   ;;  %v1625_v63 = vld [vmem:[%s2063_s1 + $0x130] sm:$0xff]  }
  0x15   :  { %1421 = vmatpush3.bf16.msra.mxu1 %v1583_v19  ;;  %v1626_v0 = vld [vmem:[%s2063_s1 + $0x1f0] sm:$0xff]   ;;  %v1628_v2 = vld [vmem:[%s2063_s1 + $0x178] sm:$0xff]   ;;  %v1634_v9 = vld [vmem:[%s2063_s1 + $0x240] sm:$0xff]  }
  0x16   :  { %1422 = vmatprep.subr.bf16.mxu1 %v1586_v22  ;;  %v1627_v1 = vld [vmem:[%s2063_s1 + $0x1b0] sm:$0xff]   ;;  %v1629_v3 = vld [vmem:[%s2063_s1 + $0x138] sm:$0xff]   ;;  %v1637_v13 = vld [vmem:[%s2063_s1 + $0x200] sm:$0xff]  }
  0x17   :  { %1401 = vmatpush3.bf16.msra.mxu0 %v1585_v21  ;;  %v1630_v4 = vld [vmem:[%s2063_s1 + $0x1f8] sm:$0xff]   ;;  %v23_v6 = vld [vmem:[%s2064_s0 + $0x10] sm:$0xff]  ;;  %v1638_v14 = vld [vmem:[%s2063_s1 + $0x2c0] sm:$0xff]  }
  0x18   :  { %1402 = vmatprep.subr.bf16.mxu0 %v1588_v24  ;;  %v1631_v5 = vld [vmem:[%s2063_s1 + $0x1b8] sm:$0xff]   ;;  %v1273_v7 = vcombine.low %v23_v6, %v23_v6  ;;  %v1274_v8 = vcombine.high %v23_v6, %v23_v6  ;;  %v1639_v15 = vld [vmem:[%s2063_s1 + $0x280] sm:$0xff]   ;;  %v1640_v16 = vld [vmem:[%s2063_s1 + $0x248] sm:$0xff]  }
  0x19   :  { %1423 = vmatpush3.bf16.msra.mxu1 %v1587_v23  ;;  %v24_v10 = vld [vmem:[%s2064_s0 + $0x18] sm:$0xff]  ;;  %v1641_v17 = vld [vmem:[%s2063_s1 + $0x208] sm:$0xff]   ;;  %v1644_v20 = vld [vmem:[%s2063_s1 + $0x250] sm:$0xff]  }
  0x1a   :  { %1424 = vmatprep.subr.bf16.mxu1 %v1590_v26  ;;  %v1275_v11 = vcombine.low %v24_v10, %v24_v10  ;;  %v1276_v12 = vcombine.high %v24_v10, %v24_v10  ;;  %v1642_v18 = vld [vmem:[%s2063_s1 + $0x2c8] sm:$0xff]   ;;  %v1645_v21 = vld [vmem:[%s2063_s1 + $0x210] sm:$0xff]   ;;  %v1648_v24 = vld [vmem:[%s2063_s1 + $0x258] sm:$0xff]  }
  0x1b   :  { %1403 = vmatpush3.bf16.msra.mxu0 %v1589_v25  ;;  %v1643_v19 = vld [vmem:[%s2063_s1 + $0x288] sm:$0xff]   ;;  %v1646_v22 = vld [vmem:[%s2063_s1 + $0x2d0] sm:$0xff]   ;;  %v1649_v25 = vld [vmem:[%s2063_s1 + $0x218] sm:$0xff]  }
  0x1c   :  { %1404 = vmatprep.subr.bf16.mxu0 %v1592_v28  ;;  %v1647_v23 = vld [vmem:[%s2063_s1 + $0x290] sm:$0xff]   ;;  %v1650_v26 = vld [vmem:[%s2063_s1 + $0x2d8] sm:$0xff]   ;;  %v1652_v28 = vld [vmem:[%s2063_s1 + $0x260] sm:$0xff]  }
  0x1d   :  { %1425 = vmatpush3.bf16.msra.mxu1 %v1591_v27  ;;  %v1651_v27 = vld [vmem:[%s2063_s1 + $0x298] sm:$0xff]   ;;  %v1656_v32 = vld [vmem:[%s2063_s1 + $0x268] sm:$0xff]   ;;  %v1660_v36 = vld [vmem:[%s2063_s1 + $0x270] sm:$0xff]  }
  0x1e   :  { %1426 = vmatprep.subr.bf16.mxu1 %v1594_v30  ;;  %v1654_v30 = vld [vmem:[%s2063_s1 + $0x2e0] sm:$0xff]   ;;  %v1658_v34 = vld [vmem:[%s2063_s1 + $0x2e8] sm:$0xff]   ;;  %v1662_v38 = vld [vmem:[%s2063_s1 + $0x2f0] sm:$0xff]  }
  0x1f   :  { %1405 = vmatpush3.bf16.msra.mxu0 %v1593_v29  ;;  %v1653_v29 = vld [vmem:[%s2063_s1 + $0x220] sm:$0xff]  }
  0x20   :  { %1434 = vmatprep.subr.bf16.mxu0 %v1598_v35  ;;  %v1659_v35 = vld [vmem:[%s2063_s1 + $0x2a8] sm:$0xff]  }
  0x21   :  { %1427 = vmatpush3.bf16.msra.mxu1 %v1595_v31  ;;  %v1655_v31 = vld [vmem:[%s2063_s1 + $0x2a0] sm:$0xff]  }
  0x22   :  { %901 = vmatmul.mubr.bf16.vlgmr.msra.gmra.mrb[0].mxu0 %v1269_v33  ;;  %1456 = vmatprep.subr.bf16.mxu1 %v1602_v40  ;;  %v1657_v33 = vld [vmem:[%s2063_s1 + $0x228] sm:$0xff]   ;;  %v1664_v40 = vld [vmem:[%s2063_s1 + $0x278] sm:$0xff]  }
  0x23   :  { %1435 = vmatpush3.bf16.msra.mxu0 %v1601_v39  ;;  %980 = vmatprep.mubr.bf16.mxu0 %v1274_v8  ;;  %v1663_v39 = vld [vmem:[%s2063_s1 + $0x2b0] sm:$0xff]  }
  0x24   :  { %941 = vmatmul.mubr.bf16.vlgmr.msra.gmra.mrb[0].mxu1 %v1271_v37  ;;  %1436 = vmatprep.subr.bf16.mxu0 %v1604_v42  ;;  %v1661_v37 = vld [vmem:[%s2063_s1 + $0x230] sm:$0xff]   ;;  %v1666_v42 = vld [vmem:[%s2063_s1 + $0x2f8] sm:$0xff]  }
  0x25   :  { %1457 = vmatpush3.bf16.msra.mxu1 %v1603_v41  ;;  %1020 = vmatprep.mubr.bf16.mxu1 %v1276_v12  ;;  %v1665_v41 = vld [vmem:[%s2063_s1 + $0x238] sm:$0xff]  }
  0x26   :  { %1458 = vmatprep.subr.bf16.mxu1 %v1606_v44  ;;  %v25_v44 = vld [vmem:[%s2064_s0 + $0x20] sm:$0xff] }
  0x27   :  { %1437 = vmatpush3.bf16.msra.mxu0 %v1605_v43  ;;  %v1667_v43 = vld [vmem:[%s2063_s1 + $0x2b8] sm:$0xff]  }
  0x28   :  { %1438 = vmatprep.subr.bf16.mxu0 %v1608_v46  ;;  %v1277_v46 = vcombine.low %v25_v44, %v25_v44 }
  0x29   :  { %1459 = vmatpush3.bf16.msra.mxu1 %v1607_v45  ;;  %v26_v45 = vld [vmem:[%s2064_s0 + $0x28] sm:$0xff] }
  0x2a   :  { %1460 = vmatprep.subr.bf16.mxu1 %v1610_v48  ;;  %v1279_v48 = vcombine.low %v26_v45, %v26_v45 }
  0x2b   :  { %1439 = vmatpush3.bf16.msra.mxu0 %v1609_v47  ;;  %v1278_v47 = vcombine.high %v25_v44, %v25_v44 }
  0x2c   :  { %1440 = vmatprep.subr.bf16.mxu0 %v1612_v50  ;;  %v1672_v50 = vld [vmem:[%s2063_s1 + $0x300] sm:$0xff]  }
  0x2d   :  { %1461 = vmatpush3.bf16.msra.mxu1 %v1611_v49  ;;  %v1280_v49 = vcombine.high %v26_v45, %v26_v45 }
  0x2e   :  { %1462 = vmatprep.subr.bf16.mxu1 %v1614_v52  ;;  %v1673_v52 = vld [vmem:[%s2063_s1 + $0x308] sm:$0xff]  }
  0x2f   :  { %1441 = vmatpush3.bf16.msra.mxu0 %v1613_v51  ;;  %v1683_v51 = vmov 0.0  }
  0x30   :  { %1442 = vmatprep.subr.bf16.mxu0 %v1616_v54  ;;  %v1675_v54 = vld [vmem:[%s2065_s3] sm:$0xff]  }
  0x31   :  { %1463 = vmatpush3.bf16.msra.mxu1 %v1615_v53  ;;  %v1674_v53 = vld [vmem:[%s2064_s0 + $0x30] ss:$0 sps:$4 sm:$0xff]  }
  0x32   :  { %1464 = vmatprep.subr.bf16.mxu1 %v1618_v56  ;;  %v1677_v56 = vld [vmem:[%s2065_s3 + $0x10] sm:$0xff]  }
  0x33   :  { %1443 = vmatpush3.bf16.msra.mxu0 %v1617_v55  ;;  %v1676_v55 = vld [vmem:[%s2065_s3 + $0x8] sm:$0xff]  }
  0x34   :  { %1444 = vmatprep.subr.bf16.mxu0 %v1620_v58  ;;  %v1679_v58 = vld [vmem:[%s2065_s3 + $0x20] sm:$0xff]  }
  0x35   :  { %1465 = vmatpush3.bf16.msra.mxu1 %v1619_v57  ;;  %v1678_v57 = vld [vmem:[%s2065_s3 + $0x18] sm:$0xff]  }
  0x36   :  { %1466 = vmatprep.subr.bf16.mxu1 %v1622_v60  ;;  %v1681_v60 = vld [vmem:[%s2065_s3 + $0x30] sm:$0xff]  }
  0x37   :  { %1445 = vmatpush3.bf16.msra.mxu0 %v1621_v59  ;;  %v1680_v59 = vld [vmem:[%s2065_s3 + $0x28] sm:$0xff]  }
  0x38   :  { %1446 = vmatprep.subr.bf16.mxu0 %v1624_v62 }
  0x39   :  { %1467 = vmatpush3.bf16.msra.mxu1 %v1623_v61  ;;  %v1682_v61 = vld [vmem:[%s2065_s3 + $0x38] sm:$0xff]  }
  0x3a   :  { %1468 = vmatprep.subr.bf16.mxu1 %v1626_v0 }
  0x3b   :  { %1447 = vmatpush3.bf16.msra.mxu0 %v1625_v63  ;;  %v1268_v63 = vld [vmem:[%s2066_s2] ss:$0 sm:$0xff] }
  0x3c   :  { %1448 = vmatprep.subr.bf16.mxu0 %v1628_v2 }
  0x3d   :  { %1469 = vmatpush3.bf16.msra.mxu1 %v1627_v1 }
  0x3e   :  { %1470 = vmatprep.subr.bf16.mxu1 %v1630_v4 }
  0x3f   :  { %1449 = vmatpush3.bf16.msra.mxu0 %v1629_v3 }
  0x40   :  { %1478 = vmatprep.subr.bf16.mxu0 %v1634_v9 }
  0x41   :  { %1471 = vmatpush3.bf16.msra.mxu1 %v1631_v5 }
  0x42   :  { %981 = vmatmul.mubr.bf16.vlgmr.msra.gmra.mrb[4].mxu0 %v1273_v7  ;;  %1500 = vmatprep.subr.bf16.mxu1 %v1638_v14 }
  0x43   :  { %1479 = vmatpush3.bf16.msra.mxu0 %v1637_v13  ;;  %1060 = vmatprep.mubr.bf16.mxu0 %v1278_v47 }
  0x44   :  { %1021 = vmatmul.mubr.bf16.vlgmr.msra.gmra.mrb[4].mxu1 %v1275_v11  ;;  %1480 = vmatprep.subr.bf16.mxu0 %v1640_v16 }
  0x45   :  { %1501 = vmatpush3.bf16.msra.mxu1 %v1639_v15  ;;  %1100 = vmatprep.mubr.bf16.mxu1 %v1280_v49 }
  0x46   :  { %1502 = vmatprep.subr.bf16.mxu1 %v1642_v18 }
  0x47   :  { %1481 = vmatpush3.bf16.msra.mxu0 %v1641_v17 }
  0x48   :  { %1482 = vmatprep.subr.bf16.mxu0 %v1644_v20 }
  0x49   :  { %1503 = vmatpush3.bf16.msra.mxu1 %v1643_v19 }
  0x4a   :  { %1504 = vmatprep.subr.bf16.mxu1 %v1646_v22 }
  0x4b   :  { %1483 = vmatpush3.bf16.msra.mxu0 %v1645_v21 }
  0x4c   :  { %1484 = vmatprep.subr.bf16.mxu0 %v1648_v24 }
  0x4d   :  { %1505 = vmatpush3.bf16.msra.mxu1 %v1647_v23 }
  0x4e   :  { %1506 = vmatprep.subr.bf16.mxu1 %v1650_v26 }
  0x4f   :  { %1485 = vmatpush3.bf16.msra.mxu0 %v1649_v25 }
  0x50   :  { %1486 = vmatprep.subr.bf16.mxu0 %v1652_v28 }
  0x51   :  { %1507 = vmatpush3.bf16.msra.mxu1 %v1651_v27 }
  0x52   :  { %1508 = vmatprep.subr.bf16.mxu1 %v1654_v30 }
  0x53   :  { %1487 = vmatpush3.bf16.msra.mxu0 %v1653_v29 }
  0x54   :  { %1488 = vmatprep.subr.bf16.mxu0 %v1656_v32 }
  0x55   :  { %1509 = vmatpush3.bf16.msra.mxu1 %v1655_v31 }
  0x56   :  { %1510 = vmatprep.subr.bf16.mxu1 %v1658_v34 }
  0x57   :  { %1489 = vmatpush3.bf16.msra.mxu0 %v1657_v33 }
  0x58   :  { %1490 = vmatprep.subr.bf16.mxu0 %v1660_v36 }
  0x59   :  { %1511 = vmatpush3.bf16.msra.mxu1 %v1659_v35 }
  0x5a   :  { %1512 = vmatprep.subr.bf16.mxu1 %v1662_v38 }
  0x5b   :  { %1491 = vmatpush3.bf16.msra.mxu0 %v1661_v37 }
  0x5c   :  { %1492 = vmatprep.subr.bf16.mxu0 %v1664_v40 }
  0x5d   :  { %1513 = vmatpush3.bf16.msra.mxu1 %v1663_v39 }
  0x5e   :  { %1514 = vmatprep.subr.bf16.mxu1 %v1666_v42  ;;  %v1381_v42 = vld [vmem:[%s2067_s4] ss:$0 sm:$0xff] }
  0x5f   :  { %1493 = vmatpush3.bf16.msra.mxu0 %v1665_v41 }
  0x60   :  { %1534 = vmatprep.subr.bf16.mxu0 %v1683_v51 }
  0x61   :  { %1515 = vmatpush3.bf16.msra.mxu1 %v1667_v43 }
  0x62   :  { %1061 = vmatmul.mubr.bf16.vlgmr.msra.gmra.mrb[8].mxu0 %v1277_v46  ;;  %1542 = vmatprep.subr.bf16.mxu1 %v1683_v51 }
  0x63   :  { %1535 = vmatpush3.bf16.msra.mxu0 %v1672_v50  ;;  %1538 = vmatprep.mubr.msk.bf16.mxu0 %vm1684_vm0, %v1683_v51 }
  0x64   :  { %1101 = vmatmul.mubr.bf16.vlgmr.msra.gmra.mrb[8].mxu1 %v1279_v48  ;;  %1536 = vmatprep.subr.bf16.mxu0 %v1683_v51 }
  0x65   :  { %1558 = vmatprep.mubr.msk.bf16.mxu1 %vm1684_vm0, %v1683_v51  ;;  %1543 = vmatpush3.bf16.msra.mxu1 %v1675_v54 }
  0x66   :  { %1544 = vmatprep.subr.bf16.mxu1 %v1683_v51 }
  0x67   :  { %1537 = vmatpush3.bf16.msra.mxu0 %v1673_v52 }
  0x69   :  { %1545 = vmatpush3.bf16.msra.mxu1 %v1676_v55 }
  0x6a   :  { %1539 = vmatmul.mubr.msk.bf16.vlgmr.msra.gmra.mrb[12].mxu0 %vm864_vm1, %v1674_v53  ;;  %1546 = vmatprep.subr.bf16.mxu1 %v1683_v51 }
  0x6d   :  { %1547 = vmatpush3.bf16.msra.mxu1 %v1677_v56 }
  0x6e   :  { %1548 = vmatprep.subr.bf16.mxu1 %v1683_v51 }
  0x71   :  { %1549 = vmatpush3.bf16.msra.mxu1 %v1678_v57 }
  0x72   :  { %1550 = vmatprep.subr.bf16.mxu1 %v1683_v51 }
  0x75   :  { %1551 = vmatpush3.bf16.msra.mxu1 %v1679_v58 }
  0x76   :  { %1552 = vmatprep.subr.bf16.mxu1 %v1683_v51 }
  0x79   :  { %1553 = vmatpush3.bf16.msra.mxu1 %v1680_v59 }
  0x7a   :  { %1554 = vmatprep.subr.bf16.mxu1 %v1683_v51 }
  0x7d   :  { %1555 = vmatpush3.bf16.msra.mxu1 %v1681_v60 }
  0x7e   :  { %1556 = vmatprep.subr.bf16.mxu1 %v1683_v51 }
  0x81   :  { %1557 = vmatpush3.bf16.msra.mxu1 %v1682_v61 }
  0xf5   :  { %v1406_v62 = vpop.f32.mrb[0].mxu0 }
  0xf6   :  { %v1407_v0 = vpop.f32.mrb[1].mxu0 }
  0xf7   :  { %v1408_v1 = vadd.f32 %v1407_v0, %v1406_v62  ;;  %v1409_v2 = vpop.f32.mrb[2].mxu0  ;;  %v1428_v3 = vpop.f32.mrb[0].mxu1 }
  0xf8   :  { %v1410_v4 = vpop.f32.mrb[3].mxu0  ;;  %v1429_v5 = vpop.f32.mrb[1].mxu1 }
  0xf9   :  { %v903_v6 = vadd.f32 %v1408_v1, %v1268_v63  ;;  %v1430_v7 = vadd.f32 %v1429_v5, %v1428_v3  ;;  %v1431_v8 = vpop.f32.mrb[2].mxu1 }
  0xfa   :  { %v1432_v9 = vpop.f32.mrb[3].mxu1 }
  0xfb   :  { %v943_v10 = vadd.f32 %v1430_v7, %v903_v6 }
 0x115   :  { %v1450_v11 = vpop.f32.mrb[4].mxu0 }
 0x116   :  { %v1451_v12 = vpop.f32.mrb[5].mxu0 }
 0x117   :  { %v1452_v13 = vadd.f32 %v1451_v12, %v1450_v11  ;;  %v1453_v14 = vpop.f32.mrb[6].mxu0  ;;  %v1472_v15 = vpop.f32.mrb[4].mxu1 }
 0x118   :  { %v1454_v16 = vpop.f32.mrb[7].mxu0  ;;  %v1473_v17 = vpop.f32.mrb[5].mxu1 }
 0x119   :  { %v983_v18 = vadd.f32 %v1452_v13, %v943_v10  ;;  %v1474_v19 = vadd.f32 %v1473_v17, %v1472_v15  ;;  %v1475_v20 = vpop.f32.mrb[6].mxu1 }
 0x11a   :  { %v1476_v21 = vpop.f32.mrb[7].mxu1 }
 0x11b   :  { %v1023_v22 = vadd.f32 %v1474_v19, %v983_v18 }
 0x135   :  { %v1494_v23 = vpop.f32.mrb[8].mxu0 }
 0x136   :  { %v1495_v24 = vpop.f32.mrb[9].mxu0 }
 0x137   :  { %v1516_v25 = vpop.f32.mrb[8].mxu1  ;;  %v1496_v26 = vadd.f32 %v1495_v24, %v1494_v23  ;;  %v1497_v27 = vpop.f32.mrb[10].mxu0 }
 0x138   :  { %v1517_v28 = vpop.f32.mrb[9].mxu1  ;;  %v1498_v30 = vpop.f32.mrb[11].mxu0 }
 0x139   :  { %v1518_v29 = vadd.f32 %v1517_v28, %v1516_v25  ;;  %v1519_v31 = vpop.f32.mrb[10].mxu1  ;;  %v1063_v32 = vadd.f32 %v1496_v26, %v1023_v22 }
 0x13a   :  { %v1520_v33 = vpop.f32.mrb[11].mxu1 }
 0x13b   :  { %v1103_v34 = vadd.f32 %v1518_v29, %v1063_v32 }
 0x13d   :  { %v1142_v35 = vpop.f32.mrb[12].mxu0 }
 0x13e   :  { %v1143_v36 = vadd.f32 %v1142_v35, %v1103_v34  ;;  %v1540_v37 = vpop.f32.mrb[13].mxu0 }
 0x13f   :  { %v1145_v38 = vpop.f32.mrb[14].mxu0 }
 0x140   :  { %v1148_v39 = vmax.f32 %v1143_v36, 0.0  ;;  %v1541_v40 = vpop.f32.mrb[15].mxu0 }
 0x142   :  { %v1149_v41 = vpack.c.bf16 %v1148_v39, %v1148_v39 }
 0x144   :  { %1559 = vmatmul.mubr.bf16.vlgmr.msra.gmra.mrb[12].mxu1 %v1149_v41 }
 0x217   :  { %v1255_v43 = vpop.f32.mrb[12].mxu1 }
 0x218   :  { %v1256_v44 = vadd.f32 %v1381_v42, %v1255_v43  ;;  %v1560_v45 = vpop.f32.mrb[13].mxu1 }
 0x219   :  { %v1258_v46 = vpop.f32.mrb[14].mxu1 }
 0x21a   :  { %v1261_v47 = vmax.f32 %v1256_v44, 0.0  ;;  %v1561_v48 = vpop.f32.mrb[15].mxu1 }
 0x21c   :  { %1263 = vst.msk [vmem:[%s2068_s5] sm:$0xff] %vm1262_vm2, %v1261_v47 }

</bundles_post_ra>
